<compile_context>
chip_gen: v6e
topology: v6e:2x2x1
jax: 0.10.0
libtpu: 0.0.40
codegen_flags: <defaults>
</compile_context>

<pallas_src>
import functools

import jax
import jax.numpy as jnp
from jax.experimental import pallas as pl
from jax.experimental.pallas import tpu as pltpu


# ----------------------------------------------------------------------------
# Single Pallas kernel: the entire multi-layer bidirectional LSTM.
#
# Ref layout (all full arrays, resident in VMEM, no grid):
#   refs[0]            x_ref   (T*Bp, D0)   time-major flattened embeddings
#   refs[1]            m_ref   (T*Bp, 2H)   combined float mask:
#                                           cols 0:H  = m(t)  (fwd)
#                                           cols H:2H = m(T-1-t) (bwd)
#   refs[2 + 3l + 0]   wih_l   (Din_l, 8H)  bf16, interleaved gate columns
#   refs[2 + 3l + 1]   whh_l   (2H, 8H)     bf16, block-structured recurrent W
#   refs[2 + 3l + 2]   b_l     (1, 8H)      f32, b_ih + b_hh (interleaved)
#   refs[2 + 3L]       y_ref   (T*Bp, 2H)   output [h_fwd | h_bwd]
#   refs[3 + 3L]       g_sc    (T*Bp, 8H)   scratch: hoisted input gates
#   refs[4 + 3L]       act_sc  (T*Bp, 2H)   scratch: inter-layer activations
#
# Gate column order (interleaved, each H wide):
#   [i_f, i_b, f_f, f_b, g_f, g_b, o_f, o_b]
# so every 2H-wide slice [gate_fwd | gate_bwd] lines up with the (Bp,2H)
# h / c state layout [h_fwd | h_bwd_timereversed].
# ----------------------------------------------------------------------------
def _bilstm_stack_kernel(*refs, T, Bp, H, L):
    x_ref, m_ref = refs[0], refs[1]
    w_refs = refs[2:2 + 3 * L]
    y_ref = refs[2 + 3 * L]
    g_sc = refs[3 + 3 * L]
    act_sc = refs[4 + 3 * L]

    H2 = 2 * H
    G8 = 8 * H

    # Static lane masks, hoisted out of the layer loop (loop-invariant).
    col8 = jax.lax.broadcasted_iota(jnp.int32, (T * Bp, G8), 1)
    fwd_cols8 = (col8 % H2) < H                      # fwd gate columns
    col2 = jax.lax.broadcasted_iota(jnp.int32, (T * Bp, H2), 1)
    fwd_cols2 = col2 < H                             # fwd state columns

    for l in range(L):
        wih_ref = w_refs[3 * l + 0]
        whh_ref = w_refs[3 * l + 1]
        b_ref = w_refs[3 * l + 2]
        # NOTE: act_sc is both this layer's input and (for middle layers) its
        # output.  Safe: the projection below fully consumes the input before
        # any store to act_sc happens (ref effects are program-ordered).
        in_ref = x_ref if l == 0 else act_sc
        out_ref = y_ref if l == L - 1 else act_sc

        # 1) Hoisted input projection: one bf16 MXU matmul covering all
        #    timesteps and both directions -> (T*Bp, 8H) f32 gates.
        proj = (jnp.dot(in_ref[...].astype(jnp.bfloat16), wih_ref[...],
                        preferred_element_type=jnp.float32)
                + b_ref[...])

        # 2) Bulk time-reversal of the backward-direction gate columns
        #    (row-block permute + one lane select), so each step reads one
        #    contiguous aligned slab.
        rev = jnp.concatenate(
            [proj[(T - 1 - t) * Bp:(T - t) * Bp, :] for t in range(T)],
            axis=0)
        g_sc[...] = jnp.where(fwd_cols8, proj, rev)

        whh = whh_ref[...]                           # (2H, 8H) bf16

        # 3) Serial recurrence: both directions fused at (Bp, 2H)/(Bp, 8H)
        #    width; the bwd direction runs in reversed time.
        h = jnp.zeros((Bp, H2), jnp.float32)
        c = jnp.zeros((Bp, H2), jnp.float32)
        outs = []
        for t in range(T):
            gates = (g_sc[t * Bp:(t + 1) * Bp, :]
                     + jnp.dot(h.astype(jnp.bfloat16), whh,
                               preferred_element_type=jnp.float32))  # (Bp,8H)
            sg = jax.nn.sigmoid(gates)               # one whole-row EUP pass
            th = jnp.tanh(gates)                     # one whole-row EUP pass
            i = sg[:, 0 * H2:1 * H2]
            f = sg[:, 1 * H2:2 * H2]
            g = th[:, 2 * H2:3 * H2]
            o = sg[:, 3 * H2:4 * H2]
            c_new = f * c + i * g
            h_new = o * jnp.tanh(c_new)

            # packed-sequence semantics: freeze state / zero output at pads.
            mk = m_ref[t * Bp:(t + 1) * Bp, :] > 0.0
            h = jnp.where(mk, h_new, h)
            c = jnp.where(mk, c_new, c)
            outs.append(jnp.where(mk, h_new, 0.0))

        # 4) Bulk un-reversal of the backward half of the layer output and a
        #    single store per layer (no per-step output stores).
        fwd_stack = jnp.concatenate(outs, axis=0)                       # (T*Bp, 2H)
        bwd_stack = jnp.concatenate([outs[T - 1 - t] for t in range(T)],
                                    axis=0)
        out_ref[...] = jnp.where(fwd_cols2, fwd_stack, bwd_stack)


def bilstm_stack(x_flat, m_flat, packed_layers, *, T, Bp, H):
    """Run the whole BiLSTM stack in one pallas_call.

    x_flat: (T*Bp, D0) f32, m_flat: (T*Bp, 2H) f32 -> (T*Bp, 2H) f32.
    """
    L = len(packed_layers)
    w_args = []
    for p in packed_layers:
        w_args += [p["wih"], p["whh"], p["bias"]]

    kernel = functools.partial(_bilstm_stack_kernel, T=T, Bp=Bp, H=H, L=L)
    n_in = 2 + 3 * L
    return pl.pallas_call(
        kernel,
        out_shape=jax.ShapeDtypeStruct((T * Bp, 2 * H), jnp.float32),
        in_specs=[pl.BlockSpec(memory_space=pltpu.MemorySpace.VMEM)
                  for _ in range(n_in)],
        out_specs=pl.BlockSpec(memory_space=pltpu.MemorySpace.VMEM),
        scratch_shapes=[
            pltpu.VMEM((T * Bp, 8 * H), jnp.float32),   # g_sc: input gates
            pltpu.VMEM((T * Bp, 2 * H), jnp.float32),   # act_sc: layer acts
        ],
    )(x_flat, m_flat, *w_args)


# ----------------------------------------------------------------------------
# Features module (JAX/Pallas port)
# ----------------------------------------------------------------------------
class FeaturesPallas:
    def __init__(self, vocab_size, pos_size, embedding_dim=32, pos_dim=16,
                 num_layers=3, hidden_dim=32, key=None):
        assert hidden_dim % 2 == 0
        self.vocab_size = vocab_size
        self.pos_size = pos_size
        self.embedding_dim = embedding_dim
        self.pos_dim = pos_dim
        self.num_layers = num_layers
        self.hidden_dim = hidden_dim
        H = hidden_dim // 2

        key = jax.random.PRNGKey(0) if key is None else key
        k_emb, k_pos, k_lstm = jax.random.split(key, 3)

        # nn.Embedding init ~ N(0, 1)
        self.word_embeds = jax.random.normal(
            k_emb, (vocab_size, embedding_dim), jnp.float32)
        self.pos_embeds = jax.random.normal(
            k_pos, (pos_size, pos_dim), jnp.float32) if pos_dim else None

        # LSTM params, PyTorch-style uniform(-1/sqrt(H), 1/sqrt(H)).
        # Stored transposed: w_ih (Din, 4H), w_hh (H, 4H); bias = b_ih + b_hh.
        bound = 1.0 / (H ** 0.5)
        self.layers = []
        for layer in range(num_layers):
            d_in = (embedding_dim + (pos_dim or 0)) if layer == 0 else hidden_dim
            params = {}
            for direction in ("fwd", "bwd"):
                k_lstm, k1, k2, k3, k4 = jax.random.split(k_lstm, 5)
                params[direction] = dict(
                    w_ih=jax.random.uniform(k1, (d_in, 4 * H), jnp.float32,
                                            -bound, bound),
                    w_hh=jax.random.uniform(k2, (H, 4 * H), jnp.float32,
                                            -bound, bound),
                    bias=(jax.random.uniform(k3, (1, 4 * H), jnp.float32,
                                             -bound, bound)
                          + jax.random.uniform(k4, (1, 4 * H), jnp.float32,
                                               -bound, bound)),
                )
            self.layers.append(params)

        # Packed layout for the fused kernel, gate columns interleaved
        # [i_f, i_b, f_f, f_b, g_f, g_b, o_f, o_b] (each H wide):
        #   wih (Din, 8H) bf16, whh (2H, 8H) bf16 block-structured, b (1, 8H) f32.
        self.packed_layers = []
        for params in self.layers:
            f, b = params["fwd"], params["bwd"]
            d_in = f["w_ih"].shape[0]
            wih = jnp.zeros((d_in, 8 * H), jnp.float32)
            whh = jnp.zeros((2 * H, 8 * H), jnp.float32)
            bias = jnp.zeros((1, 8 * H), jnp.float32)
            for k in range(4):                       # PyTorch gate order i,f,g,o
                src = slice(k * H, (k + 1) * H)
                fcol = slice((2 * k) * H, (2 * k + 1) * H)
                bcol = slice((2 * k + 1) * H, (2 * k + 2) * H)
                wih = wih.at[:, fcol].set(f["w_ih"][:, src])
                wih = wih.at[:, bcol].set(b["w_ih"][:, src])
                whh = whh.at[0:H, fcol].set(f["w_hh"][:, src])
                whh = whh.at[H:2 * H, bcol].set(b["w_hh"][:, src])
                bias = bias.at[:, fcol].set(f["bias"][:, src])
                bias = bias.at[:, bcol].set(b["bias"][:, src])
            self.packed_layers.append(dict(
                wih=wih.astype(jnp.bfloat16),
                whh=whh.astype(jnp.bfloat16),
                bias=bias))

    def __call__(self, sentence_seqs, pos_seqs):
        # Embedding lookups (glue, plain JAX gather).
        embeds = self.word_embeds[sentence_seqs]                  # (B, T, E)
        if self.pos_dim:
            embeds = jnp.concatenate(
                [embeds, self.pos_embeds[pos_seqs]], axis=-1)     # (B, T, E+P)

        # mask_idx = 1 - eq(sentence_seqs, 0)   (mask=True branch semantics)
        mask_idx = (sentence_seqs != 0).astype(jnp.int32)         # (B, T)

        B, T = sentence_seqs.shape
        D0 = embeds.shape[-1]
        H = self.hidden_dim // 2
        Bp = ((B + 7) // 8) * 8      # pad batch to a full sublane group

        # Time-major, batch-padded, flattened (row = t*Bp + b) layout.
        x_tm = jnp.transpose(embeds, (1, 0, 2)).astype(jnp.float32)   # (T, B, D0)
        x_pad = jnp.zeros((T, Bp, D0), jnp.float32).at[:, :B, :].set(x_tm)
        x_flat = x_pad.reshape(T * Bp, D0)

        m_tm = jnp.transpose(mask_idx, (1, 0)).astype(jnp.float32)    # (T, B)
        m_pad = jnp.zeros((T, Bp), jnp.float32).at[:, :B].set(m_tm)   # pads -> 0
        # Combined per-step mask: fwd half uses m(t), bwd half uses m(T-1-t)
        # (the kernel runs the bwd direction in reversed time).
        m_comb = jnp.concatenate(
            [jnp.repeat(m_pad[:, :, None], H, axis=2),
             jnp.repeat(m_pad[::-1, :, None], H, axis=2)], axis=-1)   # (T, Bp, 2H)
        m_flat = m_comb.reshape(T * Bp, 2 * H)

        y_flat = bilstm_stack(x_flat, m_flat, self.packed_layers,
                              T=T, Bp=Bp, H=H)                        # (T*Bp, 2H)

        y = y_flat.reshape(T, Bp, self.hidden_dim)[:, :B, :]
        sentence_features = jnp.transpose(y, (1, 0, 2))               # (B, T, hidden)
        return sentence_features, mask_idx


# ----------------------------------------------------------------------------
# Pure-JAX reference (lax.scan) for numerical validation of the kernel.
# Uses the same bf16 MXU operands (f32 accumulate/elementwise) as the kernel.
# ----------------------------------------------------------------------------
def _ref_lstm_dir(x, m, w_ih, w_hh, b, reverse):
    T, B, _ = x.shape
    H = w_hh.shape[0]
    w_ih = w_ih.astype(jnp.bfloat16)
    w_hh = w_hh.astype(jnp.bfloat16)

    def step(carry, inp):
        h, c = carry
        xt, mt = inp
        gates = (jnp.dot(xt.astype(jnp.bfloat16), w_ih,
                         preferred_element_type=jnp.float32) + b
                 + jnp.dot(h.astype(jnp.bfloat16), w_hh,
                           preferred_element_type=jnp.float32))
        i = jax.nn.sigmoid(gates[:, :H])
        f = jax.nn.sigmoid(gates[:, H:2 * H])
        g = jnp.tanh(gates[:, 2 * H:3 * H])
        o = jax.nn.sigmoid(gates[:, 3 * H:])
        cn = f * c + i * g
        hn = o * jnp.tanh(cn)
        return (mt * hn + (1 - mt) * h, mt * cn + (1 - mt) * c), mt * hn

    xs = (x[::-1], m[::-1]) if reverse else (x, m)
    init = (jnp.zeros((B, H), jnp.float32), jnp.zeros((B, H), jnp.float32))
    _, ys = jax.lax.scan(step, init, xs)
    return ys[::-1] if reverse else ys


def _ref_forward(model, sentence_seqs, pos_seqs):
    embeds = model.word_embeds[sentence_seqs]
    if model.pos_dim:
        embeds = jnp.concatenate([embeds, model.pos_embeds[pos_seqs]], axis=-1)
    mask_idx = (sentence_seqs != 0).astype(jnp.int32)
    x = jnp.transpose(embeds, (1, 0, 2)).astype(jnp.float32)
    m = jnp.transpose(mask_idx, (1, 0))[:, :, None].astype(jnp.float32)
    for params in model.layers:
        yf = _ref_lstm_dir(x, m, params["fwd"]["w_ih"], params["fwd"]["w_hh"],
                           params["fwd"]["bias"], reverse=False)
        yb = _ref_lstm_dir(x, m, params["bwd"]["w_ih"], params["bwd"]["w_hh"],
                           params["bwd"]["bias"], reverse=True)
        x = jnp.concatenate([yf, yb], axis=-1)
    return jnp.transpose(x, (1, 0, 2)), mask_idx


if __name__ == "__main__":
    # Small deterministic problem.
    B, T = 2, 8
    VOCAB, POS = 50, 10
    EMB, POSDIM, HID, LAYERS = 32, 16, 32, 3

    key = jax.random.PRNGKey(0)
    k_model, k_tok, k_pos = jax.random.split(key, 3)

    # Lengths sorted descending (pack_padded_sequence contract), padding = 0.
    lengths = jnp.array([8, 5], dtype=jnp.int32)
    tokens = jax.random.randint(k_tok, (B, T), 1, VOCAB, dtype=jnp.int32)
    valid = jnp.arange(T, dtype=jnp.int32)[None, :] < lengths[:, None]
    sentence_seqs = jnp.where(valid, tokens, 0)
    pos_seqs = jax.random.randint(k_pos, (B, T), 0, POS, dtype=jnp.int32)

    model = FeaturesPallas(VOCAB, POS, embedding_dim=EMB, pos_dim=POSDIM,
                           num_layers=LAYERS, hidden_dim=HID, key=k_model)

    feats, mask_idx = model(sentence_seqs, pos_seqs)
    feats = jax.block_until_ready(feats)
    mask_idx = jax.block_until_ready(mask_idx)

    # Validate against pure-JAX reference (same bf16 matmul operands).
    ref_feats, ref_mask = _ref_forward(model, sentence_seqs, pos_seqs)
    assert feats.shape == (B, T, HID)
    assert mask_idx.shape == (B, T)
    assert jnp.allclose(feats, ref_feats, rtol=2e-3, atol=2e-3)
    assert jnp.array_equal(mask_idx, ref_mask)

    print("KERNEL_OK")
</pallas_src>

<mosaic_0001>
module attributes {stable_mosaic.version = 11 : i64} {
  func.func @_bilstm_stack_kernel(%arg0: memref<64x48xf32, #tpu.memory_space<vmem>>, %arg1: memref<64x32xf32, #tpu.memory_space<vmem>>, %arg2: memref<48x128xbf16, #tpu.memory_space<vmem>>, %arg3: memref<32x128xbf16, #tpu.memory_space<vmem>>, %arg4: memref<1x128xf32, #tpu.memory_space<vmem>>, %arg5: memref<32x128xbf16, #tpu.memory_space<vmem>>, %arg6: memref<32x128xbf16, #tpu.memory_space<vmem>>, %arg7: memref<1x128xf32, #tpu.memory_space<vmem>>, %arg8: memref<32x128xbf16, #tpu.memory_space<vmem>>, %arg9: memref<32x128xbf16, #tpu.memory_space<vmem>>, %arg10: memref<1x128xf32, #tpu.memory_space<vmem>>, %arg11: memref<64x32xf32, #tpu.memory_space<vmem>>, %arg12: memref<64x128xf32, #tpu.memory_space<vmem>>, %arg13: memref<64x32xf32, #tpu.memory_space<vmem>>) attributes {dimension_semantics = [], scalar_prefetch = 0 : i64, scratch_operands = 2 : i64, tpu.core_type = #tpu.core_type<tc>} {
    %0 = tpu.iota {dimensions = array<i32: 1>} : vector<64x128xi32>
    %c32_i32 = arith.constant 32 : i32
    %c0_i32 = arith.constant 0 : i32
    %1 = arith.cmpi eq, %c32_i32, %c0_i32 : i32
    %c1_i32 = arith.constant 1 : i32
    %2 = arith.select %1, %c1_i32, %c32_i32 : i32
    %3 = vector.broadcast %2 : i32 to vector<64x128xi32>
    %4 = arith.remsi %0, %3 : vector<64x128xi32>
    %c0_i32_0 = arith.constant 0 : i32
    %5 = vector.broadcast %c0_i32_0 : i32 to vector<64x128xi32>
    %6 = arith.cmpi ne, %4, %5 : vector<64x128xi32>
    %c0_i32_1 = arith.constant 0 : i32
    %7 = vector.broadcast %c0_i32_1 : i32 to vector<64x128xi32>
    %8 = arith.cmpi slt, %4, %7 : vector<64x128xi32>
    %c0_i32_2 = arith.constant 0 : i32
    %9 = arith.cmpi slt, %2, %c0_i32_2 : i32
    %10 = vector.broadcast %9 : i1 to vector<64x128xi1>
    %11 = vector.broadcast %10 : vector<64x128xi1> to vector<64x128xi1>
    %12 = arith.xori %8, %11 : vector<64x128xi1>
    %13 = arith.andi %12, %6 : vector<64x128xi1>
    %14 = vector.broadcast %2 : i32 to vector<64x128xi32>
    %15 = arith.addi %4, %14 : vector<64x128xi32>
    %16 = arith.select %13, %15, %4 : vector<64x128xi1>, vector<64x128xi32>
    %c16_i32 = arith.constant 16 : i32
    %17 = vector.broadcast %c16_i32 : i32 to vector<64x128xi32>
    %18 = arith.cmpi slt, %16, %17 : vector<64x128xi32>
    %19 = tpu.iota {dimensions = array<i32: 1>} : vector<64x32xi32>
    %c16_i32_3 = arith.constant 16 : i32
    %20 = vector.broadcast %c16_i32_3 : i32 to vector<64x32xi32>
    %21 = arith.cmpi slt, %19, %20 : vector<64x32xi32>
    %c0 = arith.constant 0 : index
    %c0_4 = arith.constant 0 : index
    %22 = vector.load %arg0[%c0, %c0_4] : memref<64x48xf32, #tpu.memory_space<vmem>>, vector<64x48xf32>
    %23 = arith.truncf %22 : vector<64x48xf32> to vector<64x48xbf16>
    %c0_5 = arith.constant 0 : index
    %c0_6 = arith.constant 0 : index
    %24 = vector.load %arg2[%c0_5, %c0_6] : memref<48x128xbf16, #tpu.memory_space<vmem>>, vector<48x128xbf16>
    %cst = arith.constant dense<0.000000e+00> : vector<64x128xf32>
    %25 = tpu.matmul %23, %24, %cst {dimension_numbers = #tpu.dot_dimension_numbers<[1], [0], [0], [1], [0, 0, 1, 1], [], []>} : vector<64x48xbf16>, vector<48x128xbf16>, vector<64x128xf32> -> vector<64x128xf32>
    %c0_7 = arith.constant 0 : index
    %c0_8 = arith.constant 0 : index
    %26 = vector.load %arg4[%c0_7, %c0_8] : memref<1x128xf32, #tpu.memory_space<vmem>>, vector<1x128xf32>
    %27 = vector.broadcast %26 : vector<1x128xf32> to vector<64x128xf32>
    %28 = arith.addf %25, %27 : vector<64x128xf32>
    %29 = vector.extract_strided_slice %28 {offsets = [56, 0], sizes = [8, 128], strides = [1, 1]} : vector<64x128xf32> to vector<8x128xf32>
    %30 = vector.extract_strided_slice %28 {offsets = [48, 0], sizes = [8, 128], strides = [1, 1]} : vector<64x128xf32> to vector<8x128xf32>
    %31 = vector.extract_strided_slice %28 {offsets = [40, 0], sizes = [8, 128], strides = [1, 1]} : vector<64x128xf32> to vector<8x128xf32>
    %32 = vector.extract_strided_slice %28 {offsets = [32, 0], sizes = [8, 128], strides = [1, 1]} : vector<64x128xf32> to vector<8x128xf32>
    %33 = vector.extract_strided_slice %28 {offsets = [24, 0], sizes = [8, 128], strides = [1, 1]} : vector<64x128xf32> to vector<8x128xf32>
    %34 = vector.extract_strided_slice %28 {offsets = [16, 0], sizes = [8, 128], strides = [1, 1]} : vector<64x128xf32> to vector<8x128xf32>
    %35 = vector.extract_strided_slice %28 {offsets = [8, 0], sizes = [8, 128], strides = [1, 1]} : vector<64x128xf32> to vector<8x128xf32>
    %36 = vector.extract_strided_slice %28 {offsets = [0, 0], sizes = [8, 128], strides = [1, 1]} : vector<64x128xf32> to vector<8x128xf32>
    %37 = tpu.concatenate %29, %30, %31, %32, %33, %34, %35, %36 in 0 : vector<8x128xf32>, vector<8x128xf32>, vector<8x128xf32>, vector<8x128xf32>, vector<8x128xf32>, vector<8x128xf32>, vector<8x128xf32>, vector<8x128xf32> -> vector<64x128xf32>
    %38 = arith.select %18, %28, %37 : vector<64x128xi1>, vector<64x128xf32>
    %c0_9 = arith.constant 0 : index
    %c0_10 = arith.constant 0 : index
    %39 = vector.load %arg12[%c0_9, %c0_10] : memref<64x128xf32, #tpu.memory_space<vmem>>, vector<64x128xf32>
    tpu.vector_store %arg12[%c0_9, %c0_10], %38 {strides = array<i32>} : memref<64x128xf32, #tpu.memory_space<vmem>>, vector<64x128xf32>,
    %c0_11 = arith.constant 0 : index
    %c0_12 = arith.constant 0 : index
    %40 = vector.load %arg3[%c0_11, %c0_12] : memref<32x128xbf16, #tpu.memory_space<vmem>>, vector<32x128xbf16>
    %cst_13 = arith.constant 0.000000e+00 : f32
    %41 = vector.broadcast %cst_13 : f32 to vector<8x32xf32>
    %cst_14 = arith.constant 0.000000e+00 : f32
    %42 = vector.broadcast %cst_14 : f32 to vector<8x32xf32>
    %c0_15 = arith.constant 0 : index
    %c0_16 = arith.constant 0 : index
    %43 = vector.load %arg12[%c0_15, %c0_16] : memref<64x128xf32, #tpu.memory_space<vmem>>, vector<8x128xf32>
    %44 = arith.truncf %41 : vector<8x32xf32> to vector<8x32xbf16>
    %cst_17 = arith.constant dense<0.000000e+00> : vector<8x128xf32>
    %45 = tpu.matmul %44, %40, %cst_17 {dimension_numbers = #tpu.dot_dimension_numbers<[1], [0], [0], [1], [0, 0, 1, 1], [], []>} : vector<8x32xbf16>, vector<32x128xbf16>, vector<8x128xf32> -> vector<8x128xf32>
    %46 = arith.addf %43, %45 : vector<8x128xf32>
    %47 = arith.negf %46 : vector<8x128xf32>
    %48 = math.exp %47 : vector<8x128xf32>
    %cst_18 = arith.constant 1.000000e+00 : f32
    %49 = vector.broadcast %cst_18 : f32 to vector<8x128xf32>
    %50 = arith.addf %49, %48 : vector<8x128xf32>
    %51 = arith.divf %49, %50 : vector<8x128xf32>
    %52 = math.tanh %46 : vector<8x128xf32>
    %53 = vector.extract_strided_slice %51 {offsets = [0, 0], sizes = [8, 32], strides = [1, 1]} : vector<8x128xf32> to vector<8x32xf32>
    %54 = vector.extract_strided_slice %51 {offsets = [0, 32], sizes = [8, 32], strides = [1, 1]} : vector<8x128xf32> to vector<8x32xf32>
    %55 = vector.extract_strided_slice %52 {offsets = [0, 64], sizes = [8, 32], strides = [1, 1]} : vector<8x128xf32> to vector<8x32xf32>
    %56 = vector.extract_strided_slice %51 {offsets = [0, 96], sizes = [8, 32], strides = [1, 1]} : vector<8x128xf32> to vector<8x32xf32>
    %57 = arith.mulf %54, %42 : vector<8x32xf32>
    %58 = arith.mulf %53, %55 : vector<8x32xf32>
    %59 = arith.addf %57, %58 : vector<8x32xf32>
    %60 = math.tanh %59 : vector<8x32xf32>
    %61 = arith.mulf %56, %60 : vector<8x32xf32>
    %c0_19 = arith.constant 0 : index
    %c0_20 = arith.constant 0 : index
    %62 = vector.load %arg1[%c0_19, %c0_20] : memref<64x32xf32, #tpu.memory_space<vmem>>, vector<8x32xf32>
    %cst_21 = arith.constant 0.000000e+00 : f32
    %63 = vector.broadcast %cst_21 : f32 to vector<8x32xf32>
    %64 = arith.cmpf ogt, %62, %63 : vector<8x32xf32>
    %65 = arith.select %64, %61, %41 : vector<8x32xi1>, vector<8x32xf32>
    %66 = arith.select %64, %59, %42 : vector<8x32xi1>, vector<8x32xf32>
    %cst_22 = arith.constant 0.000000e+00 : f32
    %67 = vector.broadcast %cst_22 : f32 to vector<8x32xf32>
    %68 = arith.select %64, %61, %67 : vector<8x32xi1>, vector<8x32xf32>
    %c8 = arith.constant 8 : index
    %c0_23 = arith.constant 0 : index
    %69 = vector.load %arg12[%c8, %c0_23] : memref<64x128xf32, #tpu.memory_space<vmem>>, vector<8x128xf32>
    %70 = arith.truncf %65 : vector<8x32xf32> to vector<8x32xbf16>
    %cst_24 = arith.constant dense<0.000000e+00> : vector<8x128xf32>
    %71 = tpu.matmul %70, %40, %cst_24 {dimension_numbers = #tpu.dot_dimension_numbers<[1], [0], [0], [1], [0, 0, 1, 1], [], []>} : vector<8x32xbf16>, vector<32x128xbf16>, vector<8x128xf32> -> vector<8x128xf32>
    %72 = arith.addf %69, %71 : vector<8x128xf32>
    %73 = arith.negf %72 : vector<8x128xf32>
    %74 = math.exp %73 : vector<8x128xf32>
    %cst_25 = arith.constant 1.000000e+00 : f32
    %75 = vector.broadcast %cst_25 : f32 to vector<8x128xf32>
    %76 = arith.addf %75, %74 : vector<8x128xf32>
    %77 = arith.divf %75, %76 : vector<8x128xf32>
    %78 = math.tanh %72 : vector<8x128xf32>
    %79 = vector.extract_strided_slice %77 {offsets = [0, 0], sizes = [8, 32], strides = [1, 1]} : vector<8x128xf32> to vector<8x32xf32>
    %80 = vector.extract_strided_slice %77 {offsets = [0, 32], sizes = [8, 32], strides = [1, 1]} : vector<8x128xf32> to vector<8x32xf32>
    %81 = vector.extract_strided_slice %78 {offsets = [0, 64], sizes = [8, 32], strides = [1, 1]} : vector<8x128xf32> to vector<8x32xf32>
    %82 = vector.extract_strided_slice %77 {offsets = [0, 96], sizes = [8, 32], strides = [1, 1]} : vector<8x128xf32> to vector<8x32xf32>
    %83 = arith.mulf %80, %66 : vector<8x32xf32>
    %84 = arith.mulf %79, %81 : vector<8x32xf32>
    %85 = arith.addf %83, %84 : vector<8x32xf32>
    %86 = math.tanh %85 : vector<8x32xf32>
    %87 = arith.mulf %82, %86 : vector<8x32xf32>
    %c8_26 = arith.constant 8 : index
    %c0_27 = arith.constant 0 : index
    %88 = vector.load %arg1[%c8_26, %c0_27] : memref<64x32xf32, #tpu.memory_space<vmem>>, vector<8x32xf32>
    %cst_28 = arith.constant 0.000000e+00 : f32
    %89 = vector.broadcast %cst_28 : f32 to vector<8x32xf32>
    %90 = arith.cmpf ogt, %88, %89 : vector<8x32xf32>
    %91 = arith.select %90, %87, %65 : vector<8x32xi1>, vector<8x32xf32>
    %92 = arith.select %90, %85, %66 : vector<8x32xi1>, vector<8x32xf32>
    %cst_29 = arith.constant 0.000000e+00 : f32
    %93 = vector.broadcast %cst_29 : f32 to vector<8x32xf32>
    %94 = arith.select %90, %87, %93 : vector<8x32xi1>, vector<8x32xf32>
    %c16 = arith.constant 16 : index
    %c0_30 = arith.constant 0 : index
    %95 = vector.load %arg12[%c16, %c0_30] : memref<64x128xf32, #tpu.memory_space<vmem>>, vector<8x128xf32>
    %96 = arith.truncf %91 : vector<8x32xf32> to vector<8x32xbf16>
    %cst_31 = arith.constant dense<0.000000e+00> : vector<8x128xf32>
    %97 = tpu.matmul %96, %40, %cst_31 {dimension_numbers = #tpu.dot_dimension_numbers<[1], [0], [0], [1], [0, 0, 1, 1], [], []>} : vector<8x32xbf16>, vector<32x128xbf16>, vector<8x128xf32> -> vector<8x128xf32>
    %98 = arith.addf %95, %97 : vector<8x128xf32>
    %99 = arith.negf %98 : vector<8x128xf32>
    %100 = math.exp %99 : vector<8x128xf32>
    %cst_32 = arith.constant 1.000000e+00 : f32
    %101 = vector.broadcast %cst_32 : f32 to vector<8x128xf32>
    %102 = arith.addf %101, %100 : vector<8x128xf32>
    %103 = arith.divf %101, %102 : vector<8x128xf32>
    %104 = math.tanh %98 : vector<8x128xf32>
    %105 = vector.extract_strided_slice %103 {offsets = [0, 0], sizes = [8, 32], strides = [1, 1]} : vector<8x128xf32> to vector<8x32xf32>
    %106 = vector.extract_strided_slice %103 {offsets = [0, 32], sizes = [8, 32], strides = [1, 1]} : vector<8x128xf32> to vector<8x32xf32>
    %107 = vector.extract_strided_slice %104 {offsets = [0, 64], sizes = [8, 32], strides = [1, 1]} : vector<8x128xf32> to vector<8x32xf32>
    %108 = vector.extract_strided_slice %103 {offsets = [0, 96], sizes = [8, 32], strides = [1, 1]} : vector<8x128xf32> to vector<8x32xf32>
    %109 = arith.mulf %106, %92 : vector<8x32xf32>
    %110 = arith.mulf %105, %107 : vector<8x32xf32>
    %111 = arith.addf %109, %110 : vector<8x32xf32>
    %112 = math.tanh %111 : vector<8x32xf32>
    %113 = arith.mulf %108, %112 : vector<8x32xf32>
    %c16_33 = arith.constant 16 : index
    %c0_34 = arith.constant 0 : index
    %114 = vector.load %arg1[%c16_33, %c0_34] : memref<64x32xf32, #tpu.memory_space<vmem>>, vector<8x32xf32>
    %cst_35 = arith.constant 0.000000e+00 : f32
    %115 = vector.broadcast %cst_35 : f32 to vector<8x32xf32>
    %116 = arith.cmpf ogt, %114, %115 : vector<8x32xf32>
    %117 = arith.select %116, %113, %91 : vector<8x32xi1>, vector<8x32xf32>
    %118 = arith.select %116, %111, %92 : vector<8x32xi1>, vector<8x32xf32>
    %cst_36 = arith.constant 0.000000e+00 : f32
    %119 = vector.broadcast %cst_36 : f32 to vector<8x32xf32>
    %120 = arith.select %116, %113, %119 : vector<8x32xi1>, vector<8x32xf32>
    %c24 = arith.constant 24 : index
    %c0_37 = arith.constant 0 : index
    %121 = vector.load %arg12[%c24, %c0_37] : memref<64x128xf32, #tpu.memory_space<vmem>>, vector<8x128xf32>
    %122 = arith.truncf %117 : vector<8x32xf32> to vector<8x32xbf16>
    %cst_38 = arith.constant dense<0.000000e+00> : vector<8x128xf32>
    %123 = tpu.matmul %122, %40, %cst_38 {dimension_numbers = #tpu.dot_dimension_numbers<[1], [0], [0], [1], [0, 0, 1, 1], [], []>} : vector<8x32xbf16>, vector<32x128xbf16>, vector<8x128xf32> -> vector<8x128xf32>
    %124 = arith.addf %121, %123 : vector<8x128xf32>
    %125 = arith.negf %124 : vector<8x128xf32>
    %126 = math.exp %125 : vector<8x128xf32>
    %cst_39 = arith.constant 1.000000e+00 : f32
    %127 = vector.broadcast %cst_39 : f32 to vector<8x128xf32>
    %128 = arith.addf %127, %126 : vector<8x128xf32>
    %129 = arith.divf %127, %128 : vector<8x128xf32>
    %130 = math.tanh %124 : vector<8x128xf32>
    %131 = vector.extract_strided_slice %129 {offsets = [0, 0], sizes = [8, 32], strides = [1, 1]} : vector<8x128xf32> to vector<8x32xf32>
    %132 = vector.extract_strided_slice %129 {offsets = [0, 32], sizes = [8, 32], strides = [1, 1]} : vector<8x128xf32> to vector<8x32xf32>
    %133 = vector.extract_strided_slice %130 {offsets = [0, 64], sizes = [8, 32], strides = [1, 1]} : vector<8x128xf32> to vector<8x32xf32>
    %134 = vector.extract_strided_slice %129 {offsets = [0, 96], sizes = [8, 32], strides = [1, 1]} : vector<8x128xf32> to vector<8x32xf32>
    %135 = arith.mulf %132, %118 : vector<8x32xf32>
    %136 = arith.mulf %131, %133 : vector<8x32xf32>
    %137 = arith.addf %135, %136 : vector<8x32xf32>
    %138 = math.tanh %137 : vector<8x32xf32>
    %139 = arith.mulf %134, %138 : vector<8x32xf32>
    %c24_40 = arith.constant 24 : index
    %c0_41 = arith.constant 0 : index
    %140 = vector.load %arg1[%c24_40, %c0_41] : memref<64x32xf32, #tpu.memory_space<vmem>>, vector<8x32xf32>
    %cst_42 = arith.constant 0.000000e+00 : f32
    %141 = vector.broadcast %cst_42 : f32 to vector<8x32xf32>
    %142 = arith.cmpf ogt, %140, %141 : vector<8x32xf32>
    %143 = arith.select %142, %139, %117 : vector<8x32xi1>, vector<8x32xf32>
    %144 = arith.select %142, %137, %118 : vector<8x32xi1>, vector<8x32xf32>
    %cst_43 = arith.constant 0.000000e+00 : f32
    %145 = vector.broadcast %cst_43 : f32 to vector<8x32xf32>
    %146 = arith.select %142, %139, %145 : vector<8x32xi1>, vector<8x32xf32>
    %c32 = arith.constant 32 : index
    %c0_44 = arith.constant 0 : index
    %147 = vector.load %arg12[%c32, %c0_44] : memref<64x128xf32, #tpu.memory_space<vmem>>, vector<8x128xf32>
    %148 = arith.truncf %143 : vector<8x32xf32> to vector<8x32xbf16>
    %cst_45 = arith.constant dense<0.000000e+00> : vector<8x128xf32>
    %149 = tpu.matmul %148, %40, %cst_45 {dimension_numbers = #tpu.dot_dimension_numbers<[1], [0], [0], [1], [0, 0, 1, 1], [], []>} : vector<8x32xbf16>, vector<32x128xbf16>, vector<8x128xf32> -> vector<8x128xf32>
    %150 = arith.addf %147, %149 : vector<8x128xf32>
    %151 = arith.negf %150 : vector<8x128xf32>
    %152 = math.exp %151 : vector<8x128xf32>
    %cst_46 = arith.constant 1.000000e+00 : f32
    %153 = vector.broadcast %cst_46 : f32 to vector<8x128xf32>
    %154 = arith.addf %153, %152 : vector<8x128xf32>
    %155 = arith.divf %153, %154 : vector<8x128xf32>
    %156 = math.tanh %150 : vector<8x128xf32>
    %157 = vector.extract_strided_slice %155 {offsets = [0, 0], sizes = [8, 32], strides = [1, 1]} : vector<8x128xf32> to vector<8x32xf32>
    %158 = vector.extract_strided_slice %155 {offsets = [0, 32], sizes = [8, 32], strides = [1, 1]} : vector<8x128xf32> to vector<8x32xf32>
    %159 = vector.extract_strided_slice %156 {offsets = [0, 64], sizes = [8, 32], strides = [1, 1]} : vector<8x128xf32> to vector<8x32xf32>
    %160 = vector.extract_strided_slice %155 {offsets = [0, 96], sizes = [8, 32], strides = [1, 1]} : vector<8x128xf32> to vector<8x32xf32>
    %161 = arith.mulf %158, %144 : vector<8x32xf32>
    %162 = arith.mulf %157, %159 : vector<8x32xf32>
    %163 = arith.addf %161, %162 : vector<8x32xf32>
    %164 = math.tanh %163 : vector<8x32xf32>
    %165 = arith.mulf %160, %164 : vector<8x32xf32>
    %c32_47 = arith.constant 32 : index
    %c0_48 = arith.constant 0 : index
    %166 = vector.load %arg1[%c32_47, %c0_48] : memref<64x32xf32, #tpu.memory_space<vmem>>, vector<8x32xf32>
    %cst_49 = arith.constant 0.000000e+00 : f32
    %167 = vector.broadcast %cst_49 : f32 to vector<8x32xf32>
    %168 = arith.cmpf ogt, %166, %167 : vector<8x32xf32>
    %169 = arith.select %168, %165, %143 : vector<8x32xi1>, vector<8x32xf32>
    %170 = arith.select %168, %163, %144 : vector<8x32xi1>, vector<8x32xf32>
    %cst_50 = arith.constant 0.000000e+00 : f32
    %171 = vector.broadcast %cst_50 : f32 to vector<8x32xf32>
    %172 = arith.select %168, %165, %171 : vector<8x32xi1>, vector<8x32xf32>
    %c40 = arith.constant 40 : index
    %c0_51 = arith.constant 0 : index
    %173 = vector.load %arg12[%c40, %c0_51] : memref<64x128xf32, #tpu.memory_space<vmem>>, vector<8x128xf32>
    %174 = arith.truncf %169 : vector<8x32xf32> to vector<8x32xbf16>
    %cst_52 = arith.constant dense<0.000000e+00> : vector<8x128xf32>
    %175 = tpu.matmul %174, %40, %cst_52 {dimension_numbers = #tpu.dot_dimension_numbers<[1], [0], [0], [1], [0, 0, 1, 1], [], []>} : vector<8x32xbf16>, vector<32x128xbf16>, vector<8x128xf32> -> vector<8x128xf32>
    %176 = arith.addf %173, %175 : vector<8x128xf32>
    %177 = arith.negf %176 : vector<8x128xf32>
    %178 = math.exp %177 : vector<8x128xf32>
    %cst_53 = arith.constant 1.000000e+00 : f32
    %179 = vector.broadcast %cst_53 : f32 to vector<8x128xf32>
    %180 = arith.addf %179, %178 : vector<8x128xf32>
    %181 = arith.divf %179, %180 : vector<8x128xf32>
    %182 = math.tanh %176 : vector<8x128xf32>
    %183 = vector.extract_strided_slice %181 {offsets = [0, 0], sizes = [8, 32], strides = [1, 1]} : vector<8x128xf32> to vector<8x32xf32>
    %184 = vector.extract_strided_slice %181 {offsets = [0, 32], sizes = [8, 32], strides = [1, 1]} : vector<8x128xf32> to vector<8x32xf32>
    %185 = vector.extract_strided_slice %182 {offsets = [0, 64], sizes = [8, 32], strides = [1, 1]} : vector<8x128xf32> to vector<8x32xf32>
    %186 = vector.extract_strided_slice %181 {offsets = [0, 96], sizes = [8, 32], strides = [1, 1]} : vector<8x128xf32> to vector<8x32xf32>
    %187 = arith.mulf %184, %170 : vector<8x32xf32>
    %188 = arith.mulf %183, %185 : vector<8x32xf32>
    %189 = arith.addf %187, %188 : vector<8x32xf32>
    %190 = math.tanh %189 : vector<8x32xf32>
    %191 = arith.mulf %186, %190 : vector<8x32xf32>
    %c40_54 = arith.constant 40 : index
    %c0_55 = arith.constant 0 : index
    %192 = vector.load %arg1[%c40_54, %c0_55] : memref<64x32xf32, #tpu.memory_space<vmem>>, vector<8x32xf32>
    %cst_56 = arith.constant 0.000000e+00 : f32
    %193 = vector.broadcast %cst_56 : f32 to vector<8x32xf32>
    %194 = arith.cmpf ogt, %192, %193 : vector<8x32xf32>
    %195 = arith.select %194, %191, %169 : vector<8x32xi1>, vector<8x32xf32>
    %196 = arith.select %194, %189, %170 : vector<8x32xi1>, vector<8x32xf32>
    %cst_57 = arith.constant 0.000000e+00 : f32
    %197 = vector.broadcast %cst_57 : f32 to vector<8x32xf32>
    %198 = arith.select %194, %191, %197 : vector<8x32xi1>, vector<8x32xf32>
    %c48 = arith.constant 48 : index
    %c0_58 = arith.constant 0 : index
    %199 = vector.load %arg12[%c48, %c0_58] : memref<64x128xf32, #tpu.memory_space<vmem>>, vector<8x128xf32>
    %200 = arith.truncf %195 : vector<8x32xf32> to vector<8x32xbf16>
    %cst_59 = arith.constant dense<0.000000e+00> : vector<8x128xf32>
    %201 = tpu.matmul %200, %40, %cst_59 {dimension_numbers = #tpu.dot_dimension_numbers<[1], [0], [0], [1], [0, 0, 1, 1], [], []>} : vector<8x32xbf16>, vector<32x128xbf16>, vector<8x128xf32> -> vector<8x128xf32>
    %202 = arith.addf %199, %201 : vector<8x128xf32>
    %203 = arith.negf %202 : vector<8x128xf32>
    %204 = math.exp %203 : vector<8x128xf32>
    %cst_60 = arith.constant 1.000000e+00 : f32
    %205 = vector.broadcast %cst_60 : f32 to vector<8x128xf32>
    %206 = arith.addf %205, %204 : vector<8x128xf32>
    %207 = arith.divf %205, %206 : vector<8x128xf32>
    %208 = math.tanh %202 : vector<8x128xf32>
    %209 = vector.extract_strided_slice %207 {offsets = [0, 0], sizes = [8, 32], strides = [1, 1]} : vector<8x128xf32> to vector<8x32xf32>
    %210 = vector.extract_strided_slice %207 {offsets = [0, 32], sizes = [8, 32], strides = [1, 1]} : vector<8x128xf32> to vector<8x32xf32>
    %211 = vector.extract_strided_slice %208 {offsets = [0, 64], sizes = [8, 32], strides = [1, 1]} : vector<8x128xf32> to vector<8x32xf32>
    %212 = vector.extract_strided_slice %207 {offsets = [0, 96], sizes = [8, 32], strides = [1, 1]} : vector<8x128xf32> to vector<8x32xf32>
    %213 = arith.mulf %210, %196 : vector<8x32xf32>
    %214 = arith.mulf %209, %211 : vector<8x32xf32>
    %215 = arith.addf %213, %214 : vector<8x32xf32>
    %216 = math.tanh %215 : vector<8x32xf32>
    %217 = arith.mulf %212, %216 : vector<8x32xf32>
    %c48_61 = arith.constant 48 : index
    %c0_62 = arith.constant 0 : index
    %218 = vector.load %arg1[%c48_61, %c0_62] : memref<64x32xf32, #tpu.memory_space<vmem>>, vector<8x32xf32>
    %cst_63 = arith.constant 0.000000e+00 : f32
    %219 = vector.broadcast %cst_63 : f32 to vector<8x32xf32>
    %220 = arith.cmpf ogt, %218, %219 : vector<8x32xf32>
    %221 = arith.select %220, %217, %195 : vector<8x32xi1>, vector<8x32xf32>
    %222 = arith.select %220, %215, %196 : vector<8x32xi1>, vector<8x32xf32>
    %cst_64 = arith.constant 0.000000e+00 : f32
    %223 = vector.broadcast %cst_64 : f32 to vector<8x32xf32>
    %224 = arith.select %220, %217, %223 : vector<8x32xi1>, vector<8x32xf32>
    %c56 = arith.constant 56 : index
    %c0_65 = arith.constant 0 : index
    %225 = vector.load %arg12[%c56, %c0_65] : memref<64x128xf32, #tpu.memory_space<vmem>>, vector<8x128xf32>
    %226 = arith.truncf %221 : vector<8x32xf32> to vector<8x32xbf16>
    %cst_66 = arith.constant dense<0.000000e+00> : vector<8x128xf32>
    %227 = tpu.matmul %226, %40, %cst_66 {dimension_numbers = #tpu.dot_dimension_numbers<[1], [0], [0], [1], [0, 0, 1, 1], [], []>} : vector<8x32xbf16>, vector<32x128xbf16>, vector<8x128xf32> -> vector<8x128xf32>
    %228 = arith.addf %225, %227 : vector<8x128xf32>
    %229 = arith.negf %228 : vector<8x128xf32>
    %230 = math.exp %229 : vector<8x128xf32>
    %cst_67 = arith.constant 1.000000e+00 : f32
    %231 = vector.broadcast %cst_67 : f32 to vector<8x128xf32>
    %232 = arith.addf %231, %230 : vector<8x128xf32>
    %233 = arith.divf %231, %232 : vector<8x128xf32>
    %234 = math.tanh %228 : vector<8x128xf32>
    %235 = vector.extract_strided_slice %233 {offsets = [0, 0], sizes = [8, 32], strides = [1, 1]} : vector<8x128xf32> to vector<8x32xf32>
    %236 = vector.extract_strided_slice %233 {offsets = [0, 32], sizes = [8, 32], strides = [1, 1]} : vector<8x128xf32> to vector<8x32xf32>
    %237 = vector.extract_strided_slice %234 {offsets = [0, 64], sizes = [8, 32], strides = [1, 1]} : vector<8x128xf32> to vector<8x32xf32>
    %238 = vector.extract_strided_slice %233 {offsets = [0, 96], sizes = [8, 32], strides = [1, 1]} : vector<8x128xf32> to vector<8x32xf32>
    %239 = arith.mulf %236, %222 : vector<8x32xf32>
    %240 = arith.mulf %235, %237 : vector<8x32xf32>
    %241 = arith.addf %239, %240 : vector<8x32xf32>
    %242 = math.tanh %241 : vector<8x32xf32>
    %243 = arith.mulf %238, %242 : vector<8x32xf32>
    %c56_68 = arith.constant 56 : index
    %c0_69 = arith.constant 0 : index
    %244 = vector.load %arg1[%c56_68, %c0_69] : memref<64x32xf32, #tpu.memory_space<vmem>>, vector<8x32xf32>
    %cst_70 = arith.constant 0.000000e+00 : f32
    %245 = vector.broadcast %cst_70 : f32 to vector<8x32xf32>
    %246 = arith.cmpf ogt, %244, %245 : vector<8x32xf32>
    %cst_71 = arith.constant 0.000000e+00 : f32
    %247 = vector.broadcast %cst_71 : f32 to vector<8x32xf32>
    %248 = arith.select %246, %243, %247 : vector<8x32xi1>, vector<8x32xf32>
    %249 = tpu.concatenate %68, %94, %120, %146, %172, %198, %224, %248 in 0 : vector<8x32xf32>, vector<8x32xf32>, vector<8x32xf32>, vector<8x32xf32>, vector<8x32xf32>, vector<8x32xf32>, vector<8x32xf32>, vector<8x32xf32> -> vector<64x32xf32>
    %250 = tpu.concatenate %248, %224, %198, %172, %146, %120, %94, %68 in 0 : vector<8x32xf32>, vector<8x32xf32>, vector<8x32xf32>, vector<8x32xf32>, vector<8x32xf32>, vector<8x32xf32>, vector<8x32xf32>, vector<8x32xf32> -> vector<64x32xf32>
    %251 = arith.select %21, %249, %250 : vector<64x32xi1>, vector<64x32xf32>
    %c0_72 = arith.constant 0 : index
    %c0_73 = arith.constant 0 : index
    %252 = vector.load %arg13[%c0_72, %c0_73] : memref<64x32xf32, #tpu.memory_space<vmem>>, vector<64x32xf32>
    tpu.vector_store %arg13[%c0_72, %c0_73], %251 {strides = array<i32>} : memref<64x32xf32, #tpu.memory_space<vmem>>, vector<64x32xf32>,
    %c0_74 = arith.constant 0 : index
    %c0_75 = arith.constant 0 : index
    %253 = vector.load %arg13[%c0_74, %c0_75] : memref<64x32xf32, #tpu.memory_space<vmem>>, vector<64x32xf32>
    %254 = arith.truncf %253 : vector<64x32xf32> to vector<64x32xbf16>
    %c0_76 = arith.constant 0 : index
    %c0_77 = arith.constant 0 : index
    %255 = vector.load %arg5[%c0_76, %c0_77] : memref<32x128xbf16, #tpu.memory_space<vmem>>, vector<32x128xbf16>
    %cst_78 = arith.constant dense<0.000000e+00> : vector<64x128xf32>
    %256 = tpu.matmul %254, %255, %cst_78 {dimension_numbers = #tpu.dot_dimension_numbers<[1], [0], [0], [1], [0, 0, 1, 1], [], []>} : vector<64x32xbf16>, vector<32x128xbf16>, vector<64x128xf32> -> vector<64x128xf32>
    %c0_79 = arith.constant 0 : index
    %c0_80 = arith.constant 0 : index
    %257 = vector.load %arg7[%c0_79, %c0_80] : memref<1x128xf32, #tpu.memory_space<vmem>>, vector<1x128xf32>
    %258 = vector.broadcast %257 : vector<1x128xf32> to vector<64x128xf32>
    %259 = arith.addf %256, %258 : vector<64x128xf32>
    %260 = vector.extract_strided_slice %259 {offsets = [56, 0], sizes = [8, 128], strides = [1, 1]} : vector<64x128xf32> to vector<8x128xf32>
    %261 = vector.extract_strided_slice %259 {offsets = [48, 0], sizes = [8, 128], strides = [1, 1]} : vector<64x128xf32> to vector<8x128xf32>
    %262 = vector.extract_strided_slice %259 {offsets = [40, 0], sizes = [8, 128], strides = [1, 1]} : vector<64x128xf32> to vector<8x128xf32>
    %263 = vector.extract_strided_slice %259 {offsets = [32, 0], sizes = [8, 128], strides = [1, 1]} : vector<64x128xf32> to vector<8x128xf32>
    %264 = vector.extract_strided_slice %259 {offsets = [24, 0], sizes = [8, 128], strides = [1, 1]} : vector<64x128xf32> to vector<8x128xf32>
    %265 = vector.extract_strided_slice %259 {offsets = [16, 0], sizes = [8, 128], strides = [1, 1]} : vector<64x128xf32> to vector<8x128xf32>
    %266 = vector.extract_strided_slice %259 {offsets = [8, 0], sizes = [8, 128], strides = [1, 1]} : vector<64x128xf32> to vector<8x128xf32>
    %267 = vector.extract_strided_slice %259 {offsets = [0, 0], sizes = [8, 128], strides = [1, 1]} : vector<64x128xf32> to vector<8x128xf32>
    %268 = tpu.concatenate %260, %261, %262, %263, %264, %265, %266, %267 in 0 : vector<8x128xf32>, vector<8x128xf32>, vector<8x128xf32>, vector<8x128xf32>, vector<8x128xf32>, vector<8x128xf32>, vector<8x128xf32>, vector<8x128xf32> -> vector<64x128xf32>
    %269 = arith.select %18, %259, %268 : vector<64x128xi1>, vector<64x128xf32>
    %c0_81 = arith.constant 0 : index
    %c0_82 = arith.constant 0 : index
    %270 = vector.load %arg12[%c0_81, %c0_82] : memref<64x128xf32, #tpu.memory_space<vmem>>, vector<64x128xf32>
    tpu.vector_store %arg12[%c0_81, %c0_82], %269 {strides = array<i32>} : memref<64x128xf32, #tpu.memory_space<vmem>>, vector<64x128xf32>,
    %c0_83 = arith.constant 0 : index
    %c0_84 = arith.constant 0 : index
    %271 = vector.load %arg6[%c0_83, %c0_84] : memref<32x128xbf16, #tpu.memory_space<vmem>>, vector<32x128xbf16>
    %cst_85 = arith.constant 0.000000e+00 : f32
    %272 = vector.broadcast %cst_85 : f32 to vector<8x32xf32>
    %cst_86 = arith.constant 0.000000e+00 : f32
    %273 = vector.broadcast %cst_86 : f32 to vector<8x32xf32>
    %c0_87 = arith.constant 0 : index
    %c0_88 = arith.constant 0 : index
    %274 = vector.load %arg12[%c0_87, %c0_88] : memref<64x128xf32, #tpu.memory_space<vmem>>, vector<8x128xf32>
    %275 = arith.truncf %272 : vector<8x32xf32> to vector<8x32xbf16>
    %cst_89 = arith.constant dense<0.000000e+00> : vector<8x128xf32>
    %276 = tpu.matmul %275, %271, %cst_89 {dimension_numbers = #tpu.dot_dimension_numbers<[1], [0], [0], [1], [0, 0, 1, 1], [], []>} : vector<8x32xbf16>, vector<32x128xbf16>, vector<8x128xf32> -> vector<8x128xf32>
    %277 = arith.addf %274, %276 : vector<8x128xf32>
    %278 = arith.negf %277 : vector<8x128xf32>
    %279 = math.exp %278 : vector<8x128xf32>
    %cst_90 = arith.constant 1.000000e+00 : f32
    %280 = vector.broadcast %cst_90 : f32 to vector<8x128xf32>
    %281 = arith.addf %280, %279 : vector<8x128xf32>
    %282 = arith.divf %280, %281 : vector<8x128xf32>
    %283 = math.tanh %277 : vector<8x128xf32>
    %284 = vector.extract_strided_slice %282 {offsets = [0, 0], sizes = [8, 32], strides = [1, 1]} : vector<8x128xf32> to vector<8x32xf32>
    %285 = vector.extract_strided_slice %282 {offsets = [0, 32], sizes = [8, 32], strides = [1, 1]} : vector<8x128xf32> to vector<8x32xf32>
    %286 = vector.extract_strided_slice %283 {offsets = [0, 64], sizes = [8, 32], strides = [1, 1]} : vector<8x128xf32> to vector<8x32xf32>
    %287 = vector.extract_strided_slice %282 {offsets = [0, 96], sizes = [8, 32], strides = [1, 1]} : vector<8x128xf32> to vector<8x32xf32>
    %288 = arith.mulf %285, %273 : vector<8x32xf32>
    %289 = arith.mulf %284, %286 : vector<8x32xf32>
    %290 = arith.addf %288, %289 : vector<8x32xf32>
    %291 = math.tanh %290 : vector<8x32xf32>
    %292 = arith.mulf %287, %291 : vector<8x32xf32>
    %c0_91 = arith.constant 0 : index
    %c0_92 = arith.constant 0 : index
    %293 = vector.load %arg1[%c0_91, %c0_92] : memref<64x32xf32, #tpu.memory_space<vmem>>, vector<8x32xf32>
    %cst_93 = arith.constant 0.000000e+00 : f32
    %294 = vector.broadcast %cst_93 : f32 to vector<8x32xf32>
    %295 = arith.cmpf ogt, %293, %294 : vector<8x32xf32>
    %296 = arith.select %295, %292, %272 : vector<8x32xi1>, vector<8x32xf32>
    %297 = arith.select %295, %290, %273 : vector<8x32xi1>, vector<8x32xf32>
    %cst_94 = arith.constant 0.000000e+00 : f32
    %298 = vector.broadcast %cst_94 : f32 to vector<8x32xf32>
    %299 = arith.select %295, %292, %298 : vector<8x32xi1>, vector<8x32xf32>
    %c8_95 = arith.constant 8 : index
    %c0_96 = arith.constant 0 : index
    %300 = vector.load %arg12[%c8_95, %c0_96] : memref<64x128xf32, #tpu.memory_space<vmem>>, vector<8x128xf32>
    %301 = arith.truncf %296 : vector<8x32xf32> to vector<8x32xbf16>
    %cst_97 = arith.constant dense<0.000000e+00> : vector<8x128xf32>
    %302 = tpu.matmul %301, %271, %cst_97 {dimension_numbers = #tpu.dot_dimension_numbers<[1], [0], [0], [1], [0, 0, 1, 1], [], []>} : vector<8x32xbf16>, vector<32x128xbf16>, vector<8x128xf32> -> vector<8x128xf32>
    %303 = arith.addf %300, %302 : vector<8x128xf32>
    %304 = arith.negf %303 : vector<8x128xf32>
    %305 = math.exp %304 : vector<8x128xf32>
    %cst_98 = arith.constant 1.000000e+00 : f32
    %306 = vector.broadcast %cst_98 : f32 to vector<8x128xf32>
    %307 = arith.addf %306, %305 : vector<8x128xf32>
    %308 = arith.divf %306, %307 : vector<8x128xf32>
    %309 = math.tanh %303 : vector<8x128xf32>
    %310 = vector.extract_strided_slice %308 {offsets = [0, 0], sizes = [8, 32], strides = [1, 1]} : vector<8x128xf32> to vector<8x32xf32>
    %311 = vector.extract_strided_slice %308 {offsets = [0, 32], sizes = [8, 32], strides = [1, 1]} : vector<8x128xf32> to vector<8x32xf32>
    %312 = vector.extract_strided_slice %309 {offsets = [0, 64], sizes = [8, 32], strides = [1, 1]} : vector<8x128xf32> to vector<8x32xf32>
    %313 = vector.extract_strided_slice %308 {offsets = [0, 96], sizes = [8, 32], strides = [1, 1]} : vector<8x128xf32> to vector<8x32xf32>
    %314 = arith.mulf %311, %297 : vector<8x32xf32>
    %315 = arith.mulf %310, %312 : vector<8x32xf32>
    %316 = arith.addf %314, %315 : vector<8x32xf32>
    %317 = math.tanh %316 : vector<8x32xf32>
    %318 = arith.mulf %313, %317 : vector<8x32xf32>
    %c8_99 = arith.constant 8 : index
    %c0_100 = arith.constant 0 : index
    %319 = vector.load %arg1[%c8_99, %c0_100] : memref<64x32xf32, #tpu.memory_space<vmem>>, vector<8x32xf32>
    %cst_101 = arith.constant 0.000000e+00 : f32
    %320 = vector.broadcast %cst_101 : f32 to vector<8x32xf32>
    %321 = arith.cmpf ogt, %319, %320 : vector<8x32xf32>
    %322 = arith.select %321, %318, %296 : vector<8x32xi1>, vector<8x32xf32>
    %323 = arith.select %321, %316, %297 : vector<8x32xi1>, vector<8x32xf32>
    %cst_102 = arith.constant 0.000000e+00 : f32
    %324 = vector.broadcast %cst_102 : f32 to vector<8x32xf32>
    %325 = arith.select %321, %318, %324 : vector<8x32xi1>, vector<8x32xf32>
    %c16_103 = arith.constant 16 : index
    %c0_104 = arith.constant 0 : index
    %326 = vector.load %arg12[%c16_103, %c0_104] : memref<64x128xf32, #tpu.memory_space<vmem>>, vector<8x128xf32>
    %327 = arith.truncf %322 : vector<8x32xf32> to vector<8x32xbf16>
    %cst_105 = arith.constant dense<0.000000e+00> : vector<8x128xf32>
    %328 = tpu.matmul %327, %271, %cst_105 {dimension_numbers = #tpu.dot_dimension_numbers<[1], [0], [0], [1], [0, 0, 1, 1], [], []>} : vector<8x32xbf16>, vector<32x128xbf16>, vector<8x128xf32> -> vector<8x128xf32>
    %329 = arith.addf %326, %328 : vector<8x128xf32>
    %330 = arith.negf %329 : vector<8x128xf32>
    %331 = math.exp %330 : vector<8x128xf32>
    %cst_106 = arith.constant 1.000000e+00 : f32
    %332 = vector.broadcast %cst_106 : f32 to vector<8x128xf32>
    %333 = arith.addf %332, %331 : vector<8x128xf32>
    %334 = arith.divf %332, %333 : vector<8x128xf32>
    %335 = math.tanh %329 : vector<8x128xf32>
    %336 = vector.extract_strided_slice %334 {offsets = [0, 0], sizes = [8, 32], strides = [1, 1]} : vector<8x128xf32> to vector<8x32xf32>
    %337 = vector.extract_strided_slice %334 {offsets = [0, 32], sizes = [8, 32], strides = [1, 1]} : vector<8x128xf32> to vector<8x32xf32>
    %338 = vector.extract_strided_slice %335 {offsets = [0, 64], sizes = [8, 32], strides = [1, 1]} : vector<8x128xf32> to vector<8x32xf32>
    %339 = vector.extract_strided_slice %334 {offsets = [0, 96], sizes = [8, 32], strides = [1, 1]} : vector<8x128xf32> to vector<8x32xf32>
    %340 = arith.mulf %337, %323 : vector<8x32xf32>
    %341 = arith.mulf %336, %338 : vector<8x32xf32>
    %342 = arith.addf %340, %341 : vector<8x32xf32>
    %343 = math.tanh %342 : vector<8x32xf32>
    %344 = arith.mulf %339, %343 : vector<8x32xf32>
    %c16_107 = arith.constant 16 : index
    %c0_108 = arith.constant 0 : index
    %345 = vector.load %arg1[%c16_107, %c0_108] : memref<64x32xf32, #tpu.memory_space<vmem>>, vector<8x32xf32>
    %cst_109 = arith.constant 0.000000e+00 : f32
    %346 = vector.broadcast %cst_109 : f32 to vector<8x32xf32>
    %347 = arith.cmpf ogt, %345, %346 : vector<8x32xf32>
    %348 = arith.select %347, %344, %322 : vector<8x32xi1>, vector<8x32xf32>
    %349 = arith.select %347, %342, %323 : vector<8x32xi1>, vector<8x32xf32>
    %cst_110 = arith.constant 0.000000e+00 : f32
    %350 = vector.broadcast %cst_110 : f32 to vector<8x32xf32>
    %351 = arith.select %347, %344, %350 : vector<8x32xi1>, vector<8x32xf32>
    %c24_111 = arith.constant 24 : index
    %c0_112 = arith.constant 0 : index
    %352 = vector.load %arg12[%c24_111, %c0_112] : memref<64x128xf32, #tpu.memory_space<vmem>>, vector<8x128xf32>
    %353 = arith.truncf %348 : vector<8x32xf32> to vector<8x32xbf16>
    %cst_113 = arith.constant dense<0.000000e+00> : vector<8x128xf32>
    %354 = tpu.matmul %353, %271, %cst_113 {dimension_numbers = #tpu.dot_dimension_numbers<[1], [0], [0], [1], [0, 0, 1, 1], [], []>} : vector<8x32xbf16>, vector<32x128xbf16>, vector<8x128xf32> -> vector<8x128xf32>
    %355 = arith.addf %352, %354 : vector<8x128xf32>
    %356 = arith.negf %355 : vector<8x128xf32>
    %357 = math.exp %356 : vector<8x128xf32>
    %cst_114 = arith.constant 1.000000e+00 : f32
    %358 = vector.broadcast %cst_114 : f32 to vector<8x128xf32>
    %359 = arith.addf %358, %357 : vector<8x128xf32>
    %360 = arith.divf %358, %359 : vector<8x128xf32>
    %361 = math.tanh %355 : vector<8x128xf32>
    %362 = vector.extract_strided_slice %360 {offsets = [0, 0], sizes = [8, 32], strides = [1, 1]} : vector<8x128xf32> to vector<8x32xf32>
    %363 = vector.extract_strided_slice %360 {offsets = [0, 32], sizes = [8, 32], strides = [1, 1]} : vector<8x128xf32> to vector<8x32xf32>
    %364 = vector.extract_strided_slice %361 {offsets = [0, 64], sizes = [8, 32], strides = [1, 1]} : vector<8x128xf32> to vector<8x32xf32>
    %365 = vector.extract_strided_slice %360 {offsets = [0, 96], sizes = [8, 32], strides = [1, 1]} : vector<8x128xf32> to vector<8x32xf32>
    %366 = arith.mulf %363, %349 : vector<8x32xf32>
    %367 = arith.mulf %362, %364 : vector<8x32xf32>
    %368 = arith.addf %366, %367 : vector<8x32xf32>
    %369 = math.tanh %368 : vector<8x32xf32>
    %370 = arith.mulf %365, %369 : vector<8x32xf32>
    %c24_115 = arith.constant 24 : index
    %c0_116 = arith.constant 0 : index
    %371 = vector.load %arg1[%c24_115, %c0_116] : memref<64x32xf32, #tpu.memory_space<vmem>>, vector<8x32xf32>
    %cst_117 = arith.constant 0.000000e+00 : f32
    %372 = vector.broadcast %cst_117 : f32 to vector<8x32xf32>
    %373 = arith.cmpf ogt, %371, %372 : vector<8x32xf32>
    %374 = arith.select %373, %370, %348 : vector<8x32xi1>, vector<8x32xf32>
    %375 = arith.select %373, %368, %349 : vector<8x32xi1>, vector<8x32xf32>
    %cst_118 = arith.constant 0.000000e+00 : f32
    %376 = vector.broadcast %cst_118 : f32 to vector<8x32xf32>
    %377 = arith.select %373, %370, %376 : vector<8x32xi1>, vector<8x32xf32>
    %c32_119 = arith.constant 32 : index
    %c0_120 = arith.constant 0 : index
    %378 = vector.load %arg12[%c32_119, %c0_120] : memref<64x128xf32, #tpu.memory_space<vmem>>, vector<8x128xf32>
    %379 = arith.truncf %374 : vector<8x32xf32> to vector<8x32xbf16>
    %cst_121 = arith.constant dense<0.000000e+00> : vector<8x128xf32>
    %380 = tpu.matmul %379, %271, %cst_121 {dimension_numbers = #tpu.dot_dimension_numbers<[1], [0], [0], [1], [0, 0, 1, 1], [], []>} : vector<8x32xbf16>, vector<32x128xbf16>, vector<8x128xf32> -> vector<8x128xf32>
    %381 = arith.addf %378, %380 : vector<8x128xf32>
    %382 = arith.negf %381 : vector<8x128xf32>
    %383 = math.exp %382 : vector<8x128xf32>
    %cst_122 = arith.constant 1.000000e+00 : f32
    %384 = vector.broadcast %cst_122 : f32 to vector<8x128xf32>
    %385 = arith.addf %384, %383 : vector<8x128xf32>
    %386 = arith.divf %384, %385 : vector<8x128xf32>
    %387 = math.tanh %381 : vector<8x128xf32>
    %388 = vector.extract_strided_slice %386 {offsets = [0, 0], sizes = [8, 32], strides = [1, 1]} : vector<8x128xf32> to vector<8x32xf32>
    %389 = vector.extract_strided_slice %386 {offsets = [0, 32], sizes = [8, 32], strides = [1, 1]} : vector<8x128xf32> to vector<8x32xf32>
    %390 = vector.extract_strided_slice %387 {offsets = [0, 64], sizes = [8, 32], strides = [1, 1]} : vector<8x128xf32> to vector<8x32xf32>
    %391 = vector.extract_strided_slice %386 {offsets = [0, 96], sizes = [8, 32], strides = [1, 1]} : vector<8x128xf32> to vector<8x32xf32>
    %392 = arith.mulf %389, %375 : vector<8x32xf32>
    %393 = arith.mulf %388, %390 : vector<8x32xf32>
    %394 = arith.addf %392, %393 : vector<8x32xf32>
    %395 = math.tanh %394 : vector<8x32xf32>
    %396 = arith.mulf %391, %395 : vector<8x32xf32>
    %c32_123 = arith.constant 32 : index
    %c0_124 = arith.constant 0 : index
    %397 = vector.load %arg1[%c32_123, %c0_124] : memref<64x32xf32, #tpu.memory_space<vmem>>, vector<8x32xf32>
    %cst_125 = arith.constant 0.000000e+00 : f32
    %398 = vector.broadcast %cst_125 : f32 to vector<8x32xf32>
    %399 = arith.cmpf ogt, %397, %398 : vector<8x32xf32>
    %400 = arith.select %399, %396, %374 : vector<8x32xi1>, vector<8x32xf32>
    %401 = arith.select %399, %394, %375 : vector<8x32xi1>, vector<8x32xf32>
    %cst_126 = arith.constant 0.000000e+00 : f32
    %402 = vector.broadcast %cst_126 : f32 to vector<8x32xf32>
    %403 = arith.select %399, %396, %402 : vector<8x32xi1>, vector<8x32xf32>
    %c40_127 = arith.constant 40 : index
    %c0_128 = arith.constant 0 : index
    %404 = vector.load %arg12[%c40_127, %c0_128] : memref<64x128xf32, #tpu.memory_space<vmem>>, vector<8x128xf32>
    %405 = arith.truncf %400 : vector<8x32xf32> to vector<8x32xbf16>
    %cst_129 = arith.constant dense<0.000000e+00> : vector<8x128xf32>
    %406 = tpu.matmul %405, %271, %cst_129 {dimension_numbers = #tpu.dot_dimension_numbers<[1], [0], [0], [1], [0, 0, 1, 1], [], []>} : vector<8x32xbf16>, vector<32x128xbf16>, vector<8x128xf32> -> vector<8x128xf32>
    %407 = arith.addf %404, %406 : vector<8x128xf32>
    %408 = arith.negf %407 : vector<8x128xf32>
    %409 = math.exp %408 : vector<8x128xf32>
    %cst_130 = arith.constant 1.000000e+00 : f32
    %410 = vector.broadcast %cst_130 : f32 to vector<8x128xf32>
    %411 = arith.addf %410, %409 : vector<8x128xf32>
    %412 = arith.divf %410, %411 : vector<8x128xf32>
    %413 = math.tanh %407 : vector<8x128xf32>
    %414 = vector.extract_strided_slice %412 {offsets = [0, 0], sizes = [8, 32], strides = [1, 1]} : vector<8x128xf32> to vector<8x32xf32>
    %415 = vector.extract_strided_slice %412 {offsets = [0, 32], sizes = [8, 32], strides = [1, 1]} : vector<8x128xf32> to vector<8x32xf32>
    %416 = vector.extract_strided_slice %413 {offsets = [0, 64], sizes = [8, 32], strides = [1, 1]} : vector<8x128xf32> to vector<8x32xf32>
    %417 = vector.extract_strided_slice %412 {offsets = [0, 96], sizes = [8, 32], strides = [1, 1]} : vector<8x128xf32> to vector<8x32xf32>
    %418 = arith.mulf %415, %401 : vector<8x32xf32>
    %419 = arith.mulf %414, %416 : vector<8x32xf32>
    %420 = arith.addf %418, %419 : vector<8x32xf32>
    %421 = math.tanh %420 : vector<8x32xf32>
    %422 = arith.mulf %417, %421 : vector<8x32xf32>
    %c40_131 = arith.constant 40 : index
    %c0_132 = arith.constant 0 : index
    %423 = vector.load %arg1[%c40_131, %c0_132] : memref<64x32xf32, #tpu.memory_space<vmem>>, vector<8x32xf32>
    %cst_133 = arith.constant 0.000000e+00 : f32
    %424 = vector.broadcast %cst_133 : f32 to vector<8x32xf32>
    %425 = arith.cmpf ogt, %423, %424 : vector<8x32xf32>
    %426 = arith.select %425, %422, %400 : vector<8x32xi1>, vector<8x32xf32>
    %427 = arith.select %425, %420, %401 : vector<8x32xi1>, vector<8x32xf32>
    %cst_134 = arith.constant 0.000000e+00 : f32
    %428 = vector.broadcast %cst_134 : f32 to vector<8x32xf32>
    %429 = arith.select %425, %422, %428 : vector<8x32xi1>, vector<8x32xf32>
    %c48_135 = arith.constant 48 : index
    %c0_136 = arith.constant 0 : index
    %430 = vector.load %arg12[%c48_135, %c0_136] : memref<64x128xf32, #tpu.memory_space<vmem>>, vector<8x128xf32>
    %431 = arith.truncf %426 : vector<8x32xf32> to vector<8x32xbf16>
    %cst_137 = arith.constant dense<0.000000e+00> : vector<8x128xf32>
    %432 = tpu.matmul %431, %271, %cst_137 {dimension_numbers = #tpu.dot_dimension_numbers<[1], [0], [0], [1], [0, 0, 1, 1], [], []>} : vector<8x32xbf16>, vector<32x128xbf16>, vector<8x128xf32> -> vector<8x128xf32>
    %433 = arith.addf %430, %432 : vector<8x128xf32>
    %434 = arith.negf %433 : vector<8x128xf32>
    %435 = math.exp %434 : vector<8x128xf32>
    %cst_138 = arith.constant 1.000000e+00 : f32
    %436 = vector.broadcast %cst_138 : f32 to vector<8x128xf32>
    %437 = arith.addf %436, %435 : vector<8x128xf32>
    %438 = arith.divf %436, %437 : vector<8x128xf32>
    %439 = math.tanh %433 : vector<8x128xf32>
    %440 = vector.extract_strided_slice %438 {offsets = [0, 0], sizes = [8, 32], strides = [1, 1]} : vector<8x128xf32> to vector<8x32xf32>
    %441 = vector.extract_strided_slice %438 {offsets = [0, 32], sizes = [8, 32], strides = [1, 1]} : vector<8x128xf32> to vector<8x32xf32>
    %442 = vector.extract_strided_slice %439 {offsets = [0, 64], sizes = [8, 32], strides = [1, 1]} : vector<8x128xf32> to vector<8x32xf32>
    %443 = vector.extract_strided_slice %438 {offsets = [0, 96], sizes = [8, 32], strides = [1, 1]} : vector<8x128xf32> to vector<8x32xf32>
    %444 = arith.mulf %441, %427 : vector<8x32xf32>
    %445 = arith.mulf %440, %442 : vector<8x32xf32>
    %446 = arith.addf %444, %445 : vector<8x32xf32>
    %447 = math.tanh %446 : vector<8x32xf32>
    %448 = arith.mulf %443, %447 : vector<8x32xf32>
    %c48_139 = arith.constant 48 : index
    %c0_140 = arith.constant 0 : index
    %449 = vector.load %arg1[%c48_139, %c0_140] : memref<64x32xf32, #tpu.memory_space<vmem>>, vector<8x32xf32>
    %cst_141 = arith.constant 0.000000e+00 : f32
    %450 = vector.broadcast %cst_141 : f32 to vector<8x32xf32>
    %451 = arith.cmpf ogt, %449, %450 : vector<8x32xf32>
    %452 = arith.select %451, %448, %426 : vector<8x32xi1>, vector<8x32xf32>
    %453 = arith.select %451, %446, %427 : vector<8x32xi1>, vector<8x32xf32>
    %cst_142 = arith.constant 0.000000e+00 : f32
    %454 = vector.broadcast %cst_142 : f32 to vector<8x32xf32>
    %455 = arith.select %451, %448, %454 : vector<8x32xi1>, vector<8x32xf32>
    %c56_143 = arith.constant 56 : index
    %c0_144 = arith.constant 0 : index
    %456 = vector.load %arg12[%c56_143, %c0_144] : memref<64x128xf32, #tpu.memory_space<vmem>>, vector<8x128xf32>
    %457 = arith.truncf %452 : vector<8x32xf32> to vector<8x32xbf16>
    %cst_145 = arith.constant dense<0.000000e+00> : vector<8x128xf32>
    %458 = tpu.matmul %457, %271, %cst_145 {dimension_numbers = #tpu.dot_dimension_numbers<[1], [0], [0], [1], [0, 0, 1, 1], [], []>} : vector<8x32xbf16>, vector<32x128xbf16>, vector<8x128xf32> -> vector<8x128xf32>
    %459 = arith.addf %456, %458 : vector<8x128xf32>
    %460 = arith.negf %459 : vector<8x128xf32>
    %461 = math.exp %460 : vector<8x128xf32>
    %cst_146 = arith.constant 1.000000e+00 : f32
    %462 = vector.broadcast %cst_146 : f32 to vector<8x128xf32>
    %463 = arith.addf %462, %461 : vector<8x128xf32>
    %464 = arith.divf %462, %463 : vector<8x128xf32>
    %465 = math.tanh %459 : vector<8x128xf32>
    %466 = vector.extract_strided_slice %464 {offsets = [0, 0], sizes = [8, 32], strides = [1, 1]} : vector<8x128xf32> to vector<8x32xf32>
    %467 = vector.extract_strided_slice %464 {offsets = [0, 32], sizes = [8, 32], strides = [1, 1]} : vector<8x128xf32> to vector<8x32xf32>
    %468 = vector.extract_strided_slice %465 {offsets = [0, 64], sizes = [8, 32], strides = [1, 1]} : vector<8x128xf32> to vector<8x32xf32>
    %469 = vector.extract_strided_slice %464 {offsets = [0, 96], sizes = [8, 32], strides = [1, 1]} : vector<8x128xf32> to vector<8x32xf32>
    %470 = arith.mulf %467, %453 : vector<8x32xf32>
    %471 = arith.mulf %466, %468 : vector<8x32xf32>
    %472 = arith.addf %470, %471 : vector<8x32xf32>
    %473 = math.tanh %472 : vector<8x32xf32>
    %474 = arith.mulf %469, %473 : vector<8x32xf32>
    %c56_147 = arith.constant 56 : index
    %c0_148 = arith.constant 0 : index
    %475 = vector.load %arg1[%c56_147, %c0_148] : memref<64x32xf32, #tpu.memory_space<vmem>>, vector<8x32xf32>
    %cst_149 = arith.constant 0.000000e+00 : f32
    %476 = vector.broadcast %cst_149 : f32 to vector<8x32xf32>
    %477 = arith.cmpf ogt, %475, %476 : vector<8x32xf32>
    %cst_150 = arith.constant 0.000000e+00 : f32
    %478 = vector.broadcast %cst_150 : f32 to vector<8x32xf32>
    %479 = arith.select %477, %474, %478 : vector<8x32xi1>, vector<8x32xf32>
    %480 = tpu.concatenate %299, %325, %351, %377, %403, %429, %455, %479 in 0 : vector<8x32xf32>, vector<8x32xf32>, vector<8x32xf32>, vector<8x32xf32>, vector<8x32xf32>, vector<8x32xf32>, vector<8x32xf32>, vector<8x32xf32> -> vector<64x32xf32>
    %481 = tpu.concatenate %479, %455, %429, %403, %377, %351, %325, %299 in 0 : vector<8x32xf32>, vector<8x32xf32>, vector<8x32xf32>, vector<8x32xf32>, vector<8x32xf32>, vector<8x32xf32>, vector<8x32xf32>, vector<8x32xf32> -> vector<64x32xf32>
    %482 = arith.select %21, %480, %481 : vector<64x32xi1>, vector<64x32xf32>
    %c0_151 = arith.constant 0 : index
    %c0_152 = arith.constant 0 : index
    %483 = vector.load %arg13[%c0_151, %c0_152] : memref<64x32xf32, #tpu.memory_space<vmem>>, vector<64x32xf32>
    tpu.vector_store %arg13[%c0_151, %c0_152], %482 {strides = array<i32>} : memref<64x32xf32, #tpu.memory_space<vmem>>, vector<64x32xf32>,
    %c0_153 = arith.constant 0 : index
    %c0_154 = arith.constant 0 : index
    %484 = vector.load %arg13[%c0_153, %c0_154] : memref<64x32xf32, #tpu.memory_space<vmem>>, vector<64x32xf32>
    %485 = arith.truncf %484 : vector<64x32xf32> to vector<64x32xbf16>
    %c0_155 = arith.constant 0 : index
    %c0_156 = arith.constant 0 : index
    %486 = vector.load %arg8[%c0_155, %c0_156] : memref<32x128xbf16, #tpu.memory_space<vmem>>, vector<32x128xbf16>
    %cst_157 = arith.constant dense<0.000000e+00> : vector<64x128xf32>
    %487 = tpu.matmul %485, %486, %cst_157 {dimension_numbers = #tpu.dot_dimension_numbers<[1], [0], [0], [1], [0, 0, 1, 1], [], []>} : vector<64x32xbf16>, vector<32x128xbf16>, vector<64x128xf32> -> vector<64x128xf32>
    %c0_158 = arith.constant 0 : index
    %c0_159 = arith.constant 0 : index
    %488 = vector.load %arg10[%c0_158, %c0_159] : memref<1x128xf32, #tpu.memory_space<vmem>>, vector<1x128xf32>
    %489 = vector.broadcast %488 : vector<1x128xf32> to vector<64x128xf32>
    %490 = arith.addf %487, %489 : vector<64x128xf32>
    %491 = vector.extract_strided_slice %490 {offsets = [56, 0], sizes = [8, 128], strides = [1, 1]} : vector<64x128xf32> to vector<8x128xf32>
    %492 = vector.extract_strided_slice %490 {offsets = [48, 0], sizes = [8, 128], strides = [1, 1]} : vector<64x128xf32> to vector<8x128xf32>
    %493 = vector.extract_strided_slice %490 {offsets = [40, 0], sizes = [8, 128], strides = [1, 1]} : vector<64x128xf32> to vector<8x128xf32>
    %494 = vector.extract_strided_slice %490 {offsets = [32, 0], sizes = [8, 128], strides = [1, 1]} : vector<64x128xf32> to vector<8x128xf32>
    %495 = vector.extract_strided_slice %490 {offsets = [24, 0], sizes = [8, 128], strides = [1, 1]} : vector<64x128xf32> to vector<8x128xf32>
    %496 = vector.extract_strided_slice %490 {offsets = [16, 0], sizes = [8, 128], strides = [1, 1]} : vector<64x128xf32> to vector<8x128xf32>
    %497 = vector.extract_strided_slice %490 {offsets = [8, 0], sizes = [8, 128], strides = [1, 1]} : vector<64x128xf32> to vector<8x128xf32>
    %498 = vector.extract_strided_slice %490 {offsets = [0, 0], sizes = [8, 128], strides = [1, 1]} : vector<64x128xf32> to vector<8x128xf32>
    %499 = tpu.concatenate %491, %492, %493, %494, %495, %496, %497, %498 in 0 : vector<8x128xf32>, vector<8x128xf32>, vector<8x128xf32>, vector<8x128xf32>, vector<8x128xf32>, vector<8x128xf32>, vector<8x128xf32>, vector<8x128xf32> -> vector<64x128xf32>
    %500 = arith.select %18, %490, %499 : vector<64x128xi1>, vector<64x128xf32>
    %c0_160 = arith.constant 0 : index
    %c0_161 = arith.constant 0 : index
    %501 = vector.load %arg12[%c0_160, %c0_161] : memref<64x128xf32, #tpu.memory_space<vmem>>, vector<64x128xf32>
    tpu.vector_store %arg12[%c0_160, %c0_161], %500 {strides = array<i32>} : memref<64x128xf32, #tpu.memory_space<vmem>>, vector<64x128xf32>,
    %c0_162 = arith.constant 0 : index
    %c0_163 = arith.constant 0 : index
    %502 = vector.load %arg9[%c0_162, %c0_163] : memref<32x128xbf16, #tpu.memory_space<vmem>>, vector<32x128xbf16>
    %cst_164 = arith.constant 0.000000e+00 : f32
    %503 = vector.broadcast %cst_164 : f32 to vector<8x32xf32>
    %cst_165 = arith.constant 0.000000e+00 : f32
    %504 = vector.broadcast %cst_165 : f32 to vector<8x32xf32>
    %c0_166 = arith.constant 0 : index
    %c0_167 = arith.constant 0 : index
    %505 = vector.load %arg12[%c0_166, %c0_167] : memref<64x128xf32, #tpu.memory_space<vmem>>, vector<8x128xf32>
    %506 = arith.truncf %503 : vector<8x32xf32> to vector<8x32xbf16>
    %cst_168 = arith.constant dense<0.000000e+00> : vector<8x128xf32>
    %507 = tpu.matmul %506, %502, %cst_168 {dimension_numbers = #tpu.dot_dimension_numbers<[1], [0], [0], [1], [0, 0, 1, 1], [], []>} : vector<8x32xbf16>, vector<32x128xbf16>, vector<8x128xf32> -> vector<8x128xf32>
    %508 = arith.addf %505, %507 : vector<8x128xf32>
    %509 = arith.negf %508 : vector<8x128xf32>
    %510 = math.exp %509 : vector<8x128xf32>
    %cst_169 = arith.constant 1.000000e+00 : f32
    %511 = vector.broadcast %cst_169 : f32 to vector<8x128xf32>
    %512 = arith.addf %511, %510 : vector<8x128xf32>
    %513 = arith.divf %511, %512 : vector<8x128xf32>
    %514 = math.tanh %508 : vector<8x128xf32>
    %515 = vector.extract_strided_slice %513 {offsets = [0, 0], sizes = [8, 32], strides = [1, 1]} : vector<8x128xf32> to vector<8x32xf32>
    %516 = vector.extract_strided_slice %513 {offsets = [0, 32], sizes = [8, 32], strides = [1, 1]} : vector<8x128xf32> to vector<8x32xf32>
    %517 = vector.extract_strided_slice %514 {offsets = [0, 64], sizes = [8, 32], strides = [1, 1]} : vector<8x128xf32> to vector<8x32xf32>
    %518 = vector.extract_strided_slice %513 {offsets = [0, 96], sizes = [8, 32], strides = [1, 1]} : vector<8x128xf32> to vector<8x32xf32>
    %519 = arith.mulf %516, %504 : vector<8x32xf32>
    %520 = arith.mulf %515, %517 : vector<8x32xf32>
    %521 = arith.addf %519, %520 : vector<8x32xf32>
    %522 = math.tanh %521 : vector<8x32xf32>
    %523 = arith.mulf %518, %522 : vector<8x32xf32>
    %c0_170 = arith.constant 0 : index
    %c0_171 = arith.constant 0 : index
    %524 = vector.load %arg1[%c0_170, %c0_171] : memref<64x32xf32, #tpu.memory_space<vmem>>, vector<8x32xf32>
    %cst_172 = arith.constant 0.000000e+00 : f32
    %525 = vector.broadcast %cst_172 : f32 to vector<8x32xf32>
    %526 = arith.cmpf ogt, %524, %525 : vector<8x32xf32>
    %527 = arith.select %526, %523, %503 : vector<8x32xi1>, vector<8x32xf32>
    %528 = arith.select %526, %521, %504 : vector<8x32xi1>, vector<8x32xf32>
    %cst_173 = arith.constant 0.000000e+00 : f32
    %529 = vector.broadcast %cst_173 : f32 to vector<8x32xf32>
    %530 = arith.select %526, %523, %529 : vector<8x32xi1>, vector<8x32xf32>
    %c8_174 = arith.constant 8 : index
    %c0_175 = arith.constant 0 : index
    %531 = vector.load %arg12[%c8_174, %c0_175] : memref<64x128xf32, #tpu.memory_space<vmem>>, vector<8x128xf32>
    %532 = arith.truncf %527 : vector<8x32xf32> to vector<8x32xbf16>
    %cst_176 = arith.constant dense<0.000000e+00> : vector<8x128xf32>
    %533 = tpu.matmul %532, %502, %cst_176 {dimension_numbers = #tpu.dot_dimension_numbers<[1], [0], [0], [1], [0, 0, 1, 1], [], []>} : vector<8x32xbf16>, vector<32x128xbf16>, vector<8x128xf32> -> vector<8x128xf32>
    %534 = arith.addf %531, %533 : vector<8x128xf32>
    %535 = arith.negf %534 : vector<8x128xf32>
    %536 = math.exp %535 : vector<8x128xf32>
    %cst_177 = arith.constant 1.000000e+00 : f32
    %537 = vector.broadcast %cst_177 : f32 to vector<8x128xf32>
    %538 = arith.addf %537, %536 : vector<8x128xf32>
    %539 = arith.divf %537, %538 : vector<8x128xf32>
    %540 = math.tanh %534 : vector<8x128xf32>
    %541 = vector.extract_strided_slice %539 {offsets = [0, 0], sizes = [8, 32], strides = [1, 1]} : vector<8x128xf32> to vector<8x32xf32>
    %542 = vector.extract_strided_slice %539 {offsets = [0, 32], sizes = [8, 32], strides = [1, 1]} : vector<8x128xf32> to vector<8x32xf32>
    %543 = vector.extract_strided_slice %540 {offsets = [0, 64], sizes = [8, 32], strides = [1, 1]} : vector<8x128xf32> to vector<8x32xf32>
    %544 = vector.extract_strided_slice %539 {offsets = [0, 96], sizes = [8, 32], strides = [1, 1]} : vector<8x128xf32> to vector<8x32xf32>
    %545 = arith.mulf %542, %528 : vector<8x32xf32>
    %546 = arith.mulf %541, %543 : vector<8x32xf32>
    %547 = arith.addf %545, %546 : vector<8x32xf32>
    %548 = math.tanh %547 : vector<8x32xf32>
    %549 = arith.mulf %544, %548 : vector<8x32xf32>
    %c8_178 = arith.constant 8 : index
    %c0_179 = arith.constant 0 : index
    %550 = vector.load %arg1[%c8_178, %c0_179] : memref<64x32xf32, #tpu.memory_space<vmem>>, vector<8x32xf32>
    %cst_180 = arith.constant 0.000000e+00 : f32
    %551 = vector.broadcast %cst_180 : f32 to vector<8x32xf32>
    %552 = arith.cmpf ogt, %550, %551 : vector<8x32xf32>
    %553 = arith.select %552, %549, %527 : vector<8x32xi1>, vector<8x32xf32>
    %554 = arith.select %552, %547, %528 : vector<8x32xi1>, vector<8x32xf32>
    %cst_181 = arith.constant 0.000000e+00 : f32
    %555 = vector.broadcast %cst_181 : f32 to vector<8x32xf32>
    %556 = arith.select %552, %549, %555 : vector<8x32xi1>, vector<8x32xf32>
    %c16_182 = arith.constant 16 : index
    %c0_183 = arith.constant 0 : index
    %557 = vector.load %arg12[%c16_182, %c0_183] : memref<64x128xf32, #tpu.memory_space<vmem>>, vector<8x128xf32>
    %558 = arith.truncf %553 : vector<8x32xf32> to vector<8x32xbf16>
    %cst_184 = arith.constant dense<0.000000e+00> : vector<8x128xf32>
    %559 = tpu.matmul %558, %502, %cst_184 {dimension_numbers = #tpu.dot_dimension_numbers<[1], [0], [0], [1], [0, 0, 1, 1], [], []>} : vector<8x32xbf16>, vector<32x128xbf16>, vector<8x128xf32> -> vector<8x128xf32>
    %560 = arith.addf %557, %559 : vector<8x128xf32>
    %561 = arith.negf %560 : vector<8x128xf32>
    %562 = math.exp %561 : vector<8x128xf32>
    %cst_185 = arith.constant 1.000000e+00 : f32
    %563 = vector.broadcast %cst_185 : f32 to vector<8x128xf32>
    %564 = arith.addf %563, %562 : vector<8x128xf32>
    %565 = arith.divf %563, %564 : vector<8x128xf32>
    %566 = math.tanh %560 : vector<8x128xf32>
    %567 = vector.extract_strided_slice %565 {offsets = [0, 0], sizes = [8, 32], strides = [1, 1]} : vector<8x128xf32> to vector<8x32xf32>
    %568 = vector.extract_strided_slice %565 {offsets = [0, 32], sizes = [8, 32], strides = [1, 1]} : vector<8x128xf32> to vector<8x32xf32>
    %569 = vector.extract_strided_slice %566 {offsets = [0, 64], sizes = [8, 32], strides = [1, 1]} : vector<8x128xf32> to vector<8x32xf32>
    %570 = vector.extract_strided_slice %565 {offsets = [0, 96], sizes = [8, 32], strides = [1, 1]} : vector<8x128xf32> to vector<8x32xf32>
    %571 = arith.mulf %568, %554 : vector<8x32xf32>
    %572 = arith.mulf %567, %569 : vector<8x32xf32>
    %573 = arith.addf %571, %572 : vector<8x32xf32>
    %574 = math.tanh %573 : vector<8x32xf32>
    %575 = arith.mulf %570, %574 : vector<8x32xf32>
    %c16_186 = arith.constant 16 : index
    %c0_187 = arith.constant 0 : index
    %576 = vector.load %arg1[%c16_186, %c0_187] : memref<64x32xf32, #tpu.memory_space<vmem>>, vector<8x32xf32>
    %cst_188 = arith.constant 0.000000e+00 : f32
    %577 = vector.broadcast %cst_188 : f32 to vector<8x32xf32>
    %578 = arith.cmpf ogt, %576, %577 : vector<8x32xf32>
    %579 = arith.select %578, %575, %553 : vector<8x32xi1>, vector<8x32xf32>
    %580 = arith.select %578, %573, %554 : vector<8x32xi1>, vector<8x32xf32>
    %cst_189 = arith.constant 0.000000e+00 : f32
    %581 = vector.broadcast %cst_189 : f32 to vector<8x32xf32>
    %582 = arith.select %578, %575, %581 : vector<8x32xi1>, vector<8x32xf32>
    %c24_190 = arith.constant 24 : index
    %c0_191 = arith.constant 0 : index
    %583 = vector.load %arg12[%c24_190, %c0_191] : memref<64x128xf32, #tpu.memory_space<vmem>>, vector<8x128xf32>
    %584 = arith.truncf %579 : vector<8x32xf32> to vector<8x32xbf16>
    %cst_192 = arith.constant dense<0.000000e+00> : vector<8x128xf32>
    %585 = tpu.matmul %584, %502, %cst_192 {dimension_numbers = #tpu.dot_dimension_numbers<[1], [0], [0], [1], [0, 0, 1, 1], [], []>} : vector<8x32xbf16>, vector<32x128xbf16>, vector<8x128xf32> -> vector<8x128xf32>
    %586 = arith.addf %583, %585 : vector<8x128xf32>
    %587 = arith.negf %586 : vector<8x128xf32>
    %588 = math.exp %587 : vector<8x128xf32>
    %cst_193 = arith.constant 1.000000e+00 : f32
    %589 = vector.broadcast %cst_193 : f32 to vector<8x128xf32>
    %590 = arith.addf %589, %588 : vector<8x128xf32>
    %591 = arith.divf %589, %590 : vector<8x128xf32>
    %592 = math.tanh %586 : vector<8x128xf32>
    %593 = vector.extract_strided_slice %591 {offsets = [0, 0], sizes = [8, 32], strides = [1, 1]} : vector<8x128xf32> to vector<8x32xf32>
    %594 = vector.extract_strided_slice %591 {offsets = [0, 32], sizes = [8, 32], strides = [1, 1]} : vector<8x128xf32> to vector<8x32xf32>
    %595 = vector.extract_strided_slice %592 {offsets = [0, 64], sizes = [8, 32], strides = [1, 1]} : vector<8x128xf32> to vector<8x32xf32>
    %596 = vector.extract_strided_slice %591 {offsets = [0, 96], sizes = [8, 32], strides = [1, 1]} : vector<8x128xf32> to vector<8x32xf32>
    %597 = arith.mulf %594, %580 : vector<8x32xf32>
    %598 = arith.mulf %593, %595 : vector<8x32xf32>
    %599 = arith.addf %597, %598 : vector<8x32xf32>
    %600 = math.tanh %599 : vector<8x32xf32>
    %601 = arith.mulf %596, %600 : vector<8x32xf32>
    %c24_194 = arith.constant 24 : index
    %c0_195 = arith.constant 0 : index
    %602 = vector.load %arg1[%c24_194, %c0_195] : memref<64x32xf32, #tpu.memory_space<vmem>>, vector<8x32xf32>
    %cst_196 = arith.constant 0.000000e+00 : f32
    %603 = vector.broadcast %cst_196 : f32 to vector<8x32xf32>
    %604 = arith.cmpf ogt, %602, %603 : vector<8x32xf32>
    %605 = arith.select %604, %601, %579 : vector<8x32xi1>, vector<8x32xf32>
    %606 = arith.select %604, %599, %580 : vector<8x32xi1>, vector<8x32xf32>
    %cst_197 = arith.constant 0.000000e+00 : f32
    %607 = vector.broadcast %cst_197 : f32 to vector<8x32xf32>
    %608 = arith.select %604, %601, %607 : vector<8x32xi1>, vector<8x32xf32>
    %c32_198 = arith.constant 32 : index
    %c0_199 = arith.constant 0 : index
    %609 = vector.load %arg12[%c32_198, %c0_199] : memref<64x128xf32, #tpu.memory_space<vmem>>, vector<8x128xf32>
    %610 = arith.truncf %605 : vector<8x32xf32> to vector<8x32xbf16>
    %cst_200 = arith.constant dense<0.000000e+00> : vector<8x128xf32>
    %611 = tpu.matmul %610, %502, %cst_200 {dimension_numbers = #tpu.dot_dimension_numbers<[1], [0], [0], [1], [0, 0, 1, 1], [], []>} : vector<8x32xbf16>, vector<32x128xbf16>, vector<8x128xf32> -> vector<8x128xf32>
    %612 = arith.addf %609, %611 : vector<8x128xf32>
    %613 = arith.negf %612 : vector<8x128xf32>
    %614 = math.exp %613 : vector<8x128xf32>
    %cst_201 = arith.constant 1.000000e+00 : f32
    %615 = vector.broadcast %cst_201 : f32 to vector<8x128xf32>
    %616 = arith.addf %615, %614 : vector<8x128xf32>
    %617 = arith.divf %615, %616 : vector<8x128xf32>
    %618 = math.tanh %612 : vector<8x128xf32>
    %619 = vector.extract_strided_slice %617 {offsets = [0, 0], sizes = [8, 32], strides = [1, 1]} : vector<8x128xf32> to vector<8x32xf32>
    %620 = vector.extract_strided_slice %617 {offsets = [0, 32], sizes = [8, 32], strides = [1, 1]} : vector<8x128xf32> to vector<8x32xf32>
    %621 = vector.extract_strided_slice %618 {offsets = [0, 64], sizes = [8, 32], strides = [1, 1]} : vector<8x128xf32> to vector<8x32xf32>
    %622 = vector.extract_strided_slice %617 {offsets = [0, 96], sizes = [8, 32], strides = [1, 1]} : vector<8x128xf32> to vector<8x32xf32>
    %623 = arith.mulf %620, %606 : vector<8x32xf32>
    %624 = arith.mulf %619, %621 : vector<8x32xf32>
    %625 = arith.addf %623, %624 : vector<8x32xf32>
    %626 = math.tanh %625 : vector<8x32xf32>
    %627 = arith.mulf %622, %626 : vector<8x32xf32>
    %c32_202 = arith.constant 32 : index
    %c0_203 = arith.constant 0 : index
    %628 = vector.load %arg1[%c32_202, %c0_203] : memref<64x32xf32, #tpu.memory_space<vmem>>, vector<8x32xf32>
    %cst_204 = arith.constant 0.000000e+00 : f32
    %629 = vector.broadcast %cst_204 : f32 to vector<8x32xf32>
    %630 = arith.cmpf ogt, %628, %629 : vector<8x32xf32>
    %631 = arith.select %630, %627, %605 : vector<8x32xi1>, vector<8x32xf32>
    %632 = arith.select %630, %625, %606 : vector<8x32xi1>, vector<8x32xf32>
    %cst_205 = arith.constant 0.000000e+00 : f32
    %633 = vector.broadcast %cst_205 : f32 to vector<8x32xf32>
    %634 = arith.select %630, %627, %633 : vector<8x32xi1>, vector<8x32xf32>
    %c40_206 = arith.constant 40 : index
    %c0_207 = arith.constant 0 : index
    %635 = vector.load %arg12[%c40_206, %c0_207] : memref<64x128xf32, #tpu.memory_space<vmem>>, vector<8x128xf32>
    %636 = arith.truncf %631 : vector<8x32xf32> to vector<8x32xbf16>
    %cst_208 = arith.constant dense<0.000000e+00> : vector<8x128xf32>
    %637 = tpu.matmul %636, %502, %cst_208 {dimension_numbers = #tpu.dot_dimension_numbers<[1], [0], [0], [1], [0, 0, 1, 1], [], []>} : vector<8x32xbf16>, vector<32x128xbf16>, vector<8x128xf32> -> vector<8x128xf32>
    %638 = arith.addf %635, %637 : vector<8x128xf32>
    %639 = arith.negf %638 : vector<8x128xf32>
    %640 = math.exp %639 : vector<8x128xf32>
    %cst_209 = arith.constant 1.000000e+00 : f32
    %641 = vector.broadcast %cst_209 : f32 to vector<8x128xf32>
    %642 = arith.addf %641, %640 : vector<8x128xf32>
    %643 = arith.divf %641, %642 : vector<8x128xf32>
    %644 = math.tanh %638 : vector<8x128xf32>
    %645 = vector.extract_strided_slice %643 {offsets = [0, 0], sizes = [8, 32], strides = [1, 1]} : vector<8x128xf32> to vector<8x32xf32>
    %646 = vector.extract_strided_slice %643 {offsets = [0, 32], sizes = [8, 32], strides = [1, 1]} : vector<8x128xf32> to vector<8x32xf32>
    %647 = vector.extract_strided_slice %644 {offsets = [0, 64], sizes = [8, 32], strides = [1, 1]} : vector<8x128xf32> to vector<8x32xf32>
    %648 = vector.extract_strided_slice %643 {offsets = [0, 96], sizes = [8, 32], strides = [1, 1]} : vector<8x128xf32> to vector<8x32xf32>
    %649 = arith.mulf %646, %632 : vector<8x32xf32>
    %650 = arith.mulf %645, %647 : vector<8x32xf32>
    %651 = arith.addf %649, %650 : vector<8x32xf32>
    %652 = math.tanh %651 : vector<8x32xf32>
    %653 = arith.mulf %648, %652 : vector<8x32xf32>
    %c40_210 = arith.constant 40 : index
    %c0_211 = arith.constant 0 : index
    %654 = vector.load %arg1[%c40_210, %c0_211] : memref<64x32xf32, #tpu.memory_space<vmem>>, vector<8x32xf32>
    %cst_212 = arith.constant 0.000000e+00 : f32
    %655 = vector.broadcast %cst_212 : f32 to vector<8x32xf32>
    %656 = arith.cmpf ogt, %654, %655 : vector<8x32xf32>
    %657 = arith.select %656, %653, %631 : vector<8x32xi1>, vector<8x32xf32>
    %658 = arith.select %656, %651, %632 : vector<8x32xi1>, vector<8x32xf32>
    %cst_213 = arith.constant 0.000000e+00 : f32
    %659 = vector.broadcast %cst_213 : f32 to vector<8x32xf32>
    %660 = arith.select %656, %653, %659 : vector<8x32xi1>, vector<8x32xf32>
    %c48_214 = arith.constant 48 : index
    %c0_215 = arith.constant 0 : index
    %661 = vector.load %arg12[%c48_214, %c0_215] : memref<64x128xf32, #tpu.memory_space<vmem>>, vector<8x128xf32>
    %662 = arith.truncf %657 : vector<8x32xf32> to vector<8x32xbf16>
    %cst_216 = arith.constant dense<0.000000e+00> : vector<8x128xf32>
    %663 = tpu.matmul %662, %502, %cst_216 {dimension_numbers = #tpu.dot_dimension_numbers<[1], [0], [0], [1], [0, 0, 1, 1], [], []>} : vector<8x32xbf16>, vector<32x128xbf16>, vector<8x128xf32> -> vector<8x128xf32>
    %664 = arith.addf %661, %663 : vector<8x128xf32>
    %665 = arith.negf %664 : vector<8x128xf32>
    %666 = math.exp %665 : vector<8x128xf32>
    %cst_217 = arith.constant 1.000000e+00 : f32
    %667 = vector.broadcast %cst_217 : f32 to vector<8x128xf32>
    %668 = arith.addf %667, %666 : vector<8x128xf32>
    %669 = arith.divf %667, %668 : vector<8x128xf32>
    %670 = math.tanh %664 : vector<8x128xf32>
    %671 = vector.extract_strided_slice %669 {offsets = [0, 0], sizes = [8, 32], strides = [1, 1]} : vector<8x128xf32> to vector<8x32xf32>
    %672 = vector.extract_strided_slice %669 {offsets = [0, 32], sizes = [8, 32], strides = [1, 1]} : vector<8x128xf32> to vector<8x32xf32>
    %673 = vector.extract_strided_slice %670 {offsets = [0, 64], sizes = [8, 32], strides = [1, 1]} : vector<8x128xf32> to vector<8x32xf32>
    %674 = vector.extract_strided_slice %669 {offsets = [0, 96], sizes = [8, 32], strides = [1, 1]} : vector<8x128xf32> to vector<8x32xf32>
    %675 = arith.mulf %672, %658 : vector<8x32xf32>
    %676 = arith.mulf %671, %673 : vector<8x32xf32>
    %677 = arith.addf %675, %676 : vector<8x32xf32>
    %678 = math.tanh %677 : vector<8x32xf32>
    %679 = arith.mulf %674, %678 : vector<8x32xf32>
    %c48_218 = arith.constant 48 : index
    %c0_219 = arith.constant 0 : index
    %680 = vector.load %arg1[%c48_218, %c0_219] : memref<64x32xf32, #tpu.memory_space<vmem>>, vector<8x32xf32>
    %cst_220 = arith.constant 0.000000e+00 : f32
    %681 = vector.broadcast %cst_220 : f32 to vector<8x32xf32>
    %682 = arith.cmpf ogt, %680, %681 : vector<8x32xf32>
    %683 = arith.select %682, %679, %657 : vector<8x32xi1>, vector<8x32xf32>
    %684 = arith.select %682, %677, %658 : vector<8x32xi1>, vector<8x32xf32>
    %cst_221 = arith.constant 0.000000e+00 : f32
    %685 = vector.broadcast %cst_221 : f32 to vector<8x32xf32>
    %686 = arith.select %682, %679, %685 : vector<8x32xi1>, vector<8x32xf32>
    %c56_222 = arith.constant 56 : index
    %c0_223 = arith.constant 0 : index
    %687 = vector.load %arg12[%c56_222, %c0_223] : memref<64x128xf32, #tpu.memory_space<vmem>>, vector<8x128xf32>
    %688 = arith.truncf %683 : vector<8x32xf32> to vector<8x32xbf16>
    %cst_224 = arith.constant dense<0.000000e+00> : vector<8x128xf32>
    %689 = tpu.matmul %688, %502, %cst_224 {dimension_numbers = #tpu.dot_dimension_numbers<[1], [0], [0], [1], [0, 0, 1, 1], [], []>} : vector<8x32xbf16>, vector<32x128xbf16>, vector<8x128xf32> -> vector<8x128xf32>
    %690 = arith.addf %687, %689 : vector<8x128xf32>
    %691 = arith.negf %690 : vector<8x128xf32>
    %692 = math.exp %691 : vector<8x128xf32>
    %cst_225 = arith.constant 1.000000e+00 : f32
    %693 = vector.broadcast %cst_225 : f32 to vector<8x128xf32>
    %694 = arith.addf %693, %692 : vector<8x128xf32>
    %695 = arith.divf %693, %694 : vector<8x128xf32>
    %696 = math.tanh %690 : vector<8x128xf32>
    %697 = vector.extract_strided_slice %695 {offsets = [0, 0], sizes = [8, 32], strides = [1, 1]} : vector<8x128xf32> to vector<8x32xf32>
    %698 = vector.extract_strided_slice %695 {offsets = [0, 32], sizes = [8, 32], strides = [1, 1]} : vector<8x128xf32> to vector<8x32xf32>
    %699 = vector.extract_strided_slice %696 {offsets = [0, 64], sizes = [8, 32], strides = [1, 1]} : vector<8x128xf32> to vector<8x32xf32>
    %700 = vector.extract_strided_slice %695 {offsets = [0, 96], sizes = [8, 32], strides = [1, 1]} : vector<8x128xf32> to vector<8x32xf32>
    %701 = arith.mulf %698, %684 : vector<8x32xf32>
    %702 = arith.mulf %697, %699 : vector<8x32xf32>
    %703 = arith.addf %701, %702 : vector<8x32xf32>
    %704 = math.tanh %703 : vector<8x32xf32>
    %705 = arith.mulf %700, %704 : vector<8x32xf32>
    %c56_226 = arith.constant 56 : index
    %c0_227 = arith.constant 0 : index
    %706 = vector.load %arg1[%c56_226, %c0_227] : memref<64x32xf32, #tpu.memory_space<vmem>>, vector<8x32xf32>
    %cst_228 = arith.constant 0.000000e+00 : f32
    %707 = vector.broadcast %cst_228 : f32 to vector<8x32xf32>
    %708 = arith.cmpf ogt, %706, %707 : vector<8x32xf32>
    %cst_229 = arith.constant 0.000000e+00 : f32
    %709 = vector.broadcast %cst_229 : f32 to vector<8x32xf32>
    %710 = arith.select %708, %705, %709 : vector<8x32xi1>, vector<8x32xf32>
    %711 = tpu.concatenate %530, %556, %582, %608, %634, %660, %686, %710 in 0 : vector<8x32xf32>, vector<8x32xf32>, vector<8x32xf32>, vector<8x32xf32>, vector<8x32xf32>, vector<8x32xf32>, vector<8x32xf32>, vector<8x32xf32> -> vector<64x32xf32>
    %712 = tpu.concatenate %710, %686, %660, %634, %608, %582, %556, %530 in 0 : vector<8x32xf32>, vector<8x32xf32>, vector<8x32xf32>, vector<8x32xf32>, vector<8x32xf32>, vector<8x32xf32>, vector<8x32xf32>, vector<8x32xf32> -> vector<64x32xf32>
    %713 = arith.select %21, %711, %712 : vector<64x32xi1>, vector<64x32xf32>
    %c0_230 = arith.constant 0 : index
    %c0_231 = arith.constant 0 : index
    %714 = vector.load %arg11[%c0_230, %c0_231] : memref<64x32xf32, #tpu.memory_space<vmem>>, vector<64x32xf32>
    tpu.vector_store %arg11[%c0_230, %c0_231], %713 {strides = array<i32>} : memref<64x32xf32, #tpu.memory_space<vmem>>, vector<64x32xf32>,
    return
  }
}

</mosaic_0001>

<bundles_post_ra>
// kernel: tpu_custom_call.1
= control target key start
LH: loop header
LB: loop body
LE: loop exit
PB: predicated region body
PF: predicated region fallthrough
CT: control target
= control target key end

     0   :  { %v3200_v1 = vmov 0.0   ;;  %vm3201_vm0 = vmmov 0   ;;  %vm98_vm1 = vcmask 392192   ;;  %v3202_v15 = vmov 0   ;;  %s3204_s23 = smov 32   ;;  %s3205_s24 = smov 96   ;;  %s4228_s2 = inlined_call_operand.vmem [shape: bf16[48,128], index: 2, kind: input, shape index: {}]   ;;  %s4229_s0 = inlined_call_operand.vmem [shape: f32[64,48], index: 0, kind: input, shape index: {}]   ;;  %s4230_s3 = inlined_call_operand.vmem [shape: bf16[32,128], index: 3, kind: input, shape index: {}]   ;;  %s4231_s4 = inlined_call_operand.vmem [shape: f32[1,128], index: 4, kind: input, shape index: {}]   ;;  %s4232_s1 = inlined_call_operand.vmem [shape: f32[64,32], index: 1, kind: input, shape index: {}]   ;;  %s4233_s5 = inlined_call_operand.vmem [shape: bf16[32,128], index: 5, kind: input, shape index: {}]   ;;  %s4234_s6 = inlined_call_operand.vmem [shape: bf16[32,128], index: 6, kind: input, shape index: {}]   ;;  %s4235_s7 = inlined_call_operand.vmem [shape: f32[1,128], index: 7, kind: input, shape index: {}]   ;;  %s4236_s8 = inlined_call_operand.vmem [shape: bf16[32,128], index: 8, kind: input, shape index: {}]   ;;  %s4237_s9 = inlined_call_operand.vmem [shape: bf16[32,128], index: 9, kind: input, shape index: {}]   ;;  %s4238_s10 = inlined_call_operand.vmem [shape: f32[1,128], index: 10, kind: input, shape index: {}]   ;;  %s4239_s11 = inlined_call_operand.vmem [shape: f32[64,32], index: 11, kind: output, shape index: {}]  }
   0x1   :  { %v2995_v0 = vld [vmem:[%s4228_s2 + $0x10] sm:$0xff]   ;;  %2773 = vmatprep.subr.bf16.mxu1 %v3200_v1  ;;  %2777 = vmatprep.mubr.msk.bf16.mxu1 %vm3201_vm0, %v3200_v1  ;;  %v2996_v2 = vld [vmem:[%s4228_s2 + $0x8] sm:$0xff]   ;;  %v55_v3 = vld [vmem:[%s4229_s0] sm:$0xff]  ;;  %v39_v19 = vlaneseq  ;;  %vm209_vm4 = vcmask 261120  }
   0x2   :  { %2759 = vmatprep.subr.bf16.mxu0 %v2995_v0  ;;  %v56_v4 = vld [vmem:[%s4229_s0 + $0x8] sm:$0xff]  ;;  %v2997_v5 = vld [vmem:[%s4228_s2] sm:$0xff]   ;;  %v57_v8 = vld [vmem:[%s4229_s0 + $0x10] sm:$0xff] }
   0x3   :  { %2760 = vmatpush3.bf16.msra.mxu0 %v2995_v0  ;;  %v63_v6 = vpack.c.bf16 %v56_v4, %v55_v3  ;;  %v3287_v7 = vld [vmem:[%s4230_s3 + $0x8] sm:$0xff]   ;;  %v58_v9 = vld [vmem:[%s4229_s0 + $0x18] sm:$0xff]  ;;  %v3300_v10 = vld [vmem:[%s4230_s3] sm:$0xff]   ;;  %v3337_v23 = vand.u32 127, %v39_v19 }
   0x4   :  { %2761 = vmatprep.subr.bf16.mxu0 %v2996_v2  ;;  %2774 = vmatpush3.bf16.msra.mxu1 %v3287_v7  ;;  %v59_v11 = vld [vmem:[%s4229_s0 + $0x20] sm:$0xff]  ;;  %v60_v12 = vld [vmem:[%s4229_s0 + $0x28] sm:$0xff]  ;;  %v64_v13 = vpack.c.bf16 %v58_v9, %v57_v8  ;;  %v61_v16 = vld [vmem:[%s4229_s0 + $0x30] sm:$0xff] }
   0x5   :  { %2765 = vmatprep.mubr.msk.bf16.mxu0 %vm98_vm1, %v63_v6  ;;  %2775 = vmatprep.subr.bf16.mxu1 %v3200_v1  ;;  %v65_v14 = vpack.c.bf16 %v60_v12, %v59_v11  ;;  %v62_v17 = vld [vmem:[%s4229_s0 + $0x38] sm:$0xff]  ;;  %v2595_v20 = vld [vmem:[%s4231_s4] ss:$0 sm:$0xff]  ;;  %v45_v28 = vand.u32 31, %v3337_v23  ;;  %s3203_s4 = smov 64   ;;  %vm54_vm9 = vcmp.lt.s32.totalorder %v3337_v23, 16 }
   0x6   :  { %v66_v18 = vpack.c.bf16 %v62_v17, %v61_v16  ;;  %v3399_v0 = vld [vmem:[%s4232_s1] sm:$0xff] }
   0x7   :  { %2762 = vmatpush3.bf16.msra.mxu0 %v2996_v2  ;;  %vm3346_vm2 = vcmp.lt.s32.totalorder %v45_v28, 16  ;;  %vm279_vm3 = vcmp.gt.f32.partialorder %v3399_v0, 0.0 }
   0x8   :  { %2763 = vmatprep.subr.bf16.mxu0 %v2997_v5  ;;  %2776 = vmatpush3.bf16.msra.mxu1 %v3300_v10 }
   0x9   :  { %2781 = vmatprep.subr.bf16.mxu1 %v3200_v1 }
   0xb   :  { %2764 = vmatpush3.bf16.msra.mxu0 %v2997_v5  ;;  %2778 = vmatmul.mubr.bf16.vlgmr.msra.gmra.mxu1 %v3202_v15 }
   0xc   :  { %2797 = vmatprep.subr.bf16.mxu0 %v3200_v1  ;;  %2782 = vmatpush3.bf16.msra.mxu1 %v3287_v7 }
   0xd   :  { %2783 = vmatprep.subr.bf16.mxu1 %v3200_v1  ;;  %2785 = vmatprep.mubr.msk.bf16.mxu1 %vm3201_vm0, %v3200_v1 }
   0xe   :  { %2766 = vmatmul.mubr.msk.bf16.vlgmr.msra.gmra.mxu0 %vm98_vm1, %v64_v13 }
   0xf   :  { %2769 = vmatprep.mubr.msk.bf16.mxu0 %vm98_vm1, %v65_v14  ;;  %2798 = vmatpush3.bf16.msra.mxu0 %v3287_v7 }
  0x10   :  { %2799 = vmatprep.subr.bf16.mxu0 %v3200_v1  ;;  %2784 = vmatpush3.bf16.msra.mxu1 %v3300_v10 }
  0x11   :  { %2789 = vmatprep.subr.bf16.mxu1 %v3200_v1 }
  0x13   :  { %2800 = vmatpush3.bf16.msra.mxu0 %v3300_v10 }
  0x14   :  { %2813 = vmatprep.subr.bf16.mxu0 %v3200_v1 }
  0x16   :  { %2770 = vmatmul.mubr.msk.bf16.gmra.mxu0 %vm98_vm1, %v66_v18 }
  0x17   :  { %2801 = vmatprep.mubr.msk.bf16.mxu0 %vm3201_vm0, %v3200_v1 }
  0xcb   :  { %v247_v22 = vpop.f32.mrf.mxu1 }
  0xcd   :  { %v2779_v26 = vpop.f32.mrf.mxu1 }
  0xce   :  { %v2767_v21 = vpop.f32.mrf.mxu0 }
  0xcf   :  { %v3339_v24 = vadd.f32 %v2767_v21, %v2595_v20  ;;  %v250_v29 = vpop.f32.mrf.mxu1 }
  0xd0   :  { %v145_v25 = vpop.f32.mrf.mxu0 }
  0xd1   :  { %v2780_v32 = vpop.f32.mrf.mxu1  ;;  %v3362_v42 = vadd.f32 %v2595_v20, %v145_v25 }
  0xd2   :  { %v2768_v27 = vpop.f32.mrf.mxu0  ;;  %v3426_v32 = vld [vmem:[%s4232_s1 + $0x8] sm:$0xff] }
  0xd3   :  { %v3342_v30 = vadd.f32 %v2768_v27, %v2595_v20  ;;  %vm365_vm5 = vcmp.gt.f32.partialorder %v3426_v32, 0.0 }
  0xd4   :  { %v148_v31 = vpop.f32.mrf.mxu0 }
  0xd5   :  { %v3344_v33 = vadd.f32 %v2595_v20, %v148_v31 }
  0xd6   :  { %v2771_v34 = vpop.f32.mrf.mxu0 }
  0xd7   :  { %v3350_v36 = vadd.f32 %v2771_v34, %v2595_v20 }
  0xd8   :  { %v161_v37 = vpop.f32.mrf.mxu0 }
  0xd9   :  { %v3352_v38 = vadd.f32 %v2595_v20, %v161_v37  ;;  %v177_v39 = vsel %vm3346_vm2, %v3344_v33, %v3350_v36  ;;  %v182_v40 = vsel %vm3346_vm2, %v3350_v36, %v3344_v33 }
  0xda   :  { %v2772_v41 = vpop.f32.mrf.mxu0 }
  0xdb   :  { %v3364_v43 = vadd.f32 %v2772_v41, %v2595_v20  ;;  %v179_v44 = vsel %vm3346_vm2, %v3342_v30, %v3352_v38  ;;  %v180_v45 = vsel %vm3346_vm2, %v3352_v38, %v3342_v30 }
  0xdc   :  { %v164_v46 = vpop.f32.mrf.mxu0 }
  0xdd   :  { %v176_v47 = vsel %vm3346_vm2, %v3362_v42, %v3364_v43  ;;  %v3378_v48 = vadd.f32 %v2595_v20, %v164_v46  ;;  %v183_v49 = vsel %vm3346_vm2, %v3364_v43, %v3362_v42 }
  0xde   :  { %v253_v50 = vadd.f32 %v247_v22, %v176_v47 }
  0xdf   :  { %v178_v51 = vsel %vm3346_vm2, %v3339_v24, %v3378_v48  ;;  %v181_v52 = vsel %vm3346_vm2, %v3378_v48, %v3339_v24 }
  0xe0   :  { %3008 = vtanh.f32 %v253_v50  ;;  %v2605_v54 = vmul.f32 -1.442695, %v253_v50 }
  0xe2   :  { %3010 = vpow2.f32 %v2605_v54 }
  0xed   :  { %v3009_v53 = vpop.eup %3008 }
  0xee   :  { %263 = vrot.lane.b32.xlu0 %v3009_v53, %s3203_s4 }
  0xef   :  { %v3011_v55 = vpop.eup %3010 }
  0xf0   :  { %v257_v56 = vadd.f32 1.0, %v3011_v55 }
  0xf2   :  { %3012 = vrcp.f32 %v257_v56 }
  0xff   :  { %v3013_v57 = vpop.eup %3012 }
 0x100   :  { %v261_v60 = vmul.f32 0.0, %v3013_v57 }
 0x160   :  { %v264_v58 = vpop.permute.xlu0 %263 }
 0x161   :  { %v266_v59 = vmul.f32 %v3013_v57, %v264_v58 }
 0x163   :  { %268 = vrot.lane.b32.xlu0 %v266_v59, %s3204_s23 }
 0x1d5   :  { %v269_v61 = vpop.permute.xlu0 %268 }
 0x1d6   :  { %v271_v62 = vadd.f32 %v269_v61, %v261_v60 }
 0x1d8   :  { %3014 = vtanh.f32 %v271_v62  ;;  %286 = vrot.lane.b32.xlu0 %v271_v62, %s3205_s24 }
 0x1e5   :  { %v3015_v63 = vpop.eup %3014 }
 0x1e6   :  { %274 = vrot.lane.b32.xlu1 %v3015_v63, %s3203_s4 }
 0x24a   :  { %v287_v2 = vpop.permute.xlu0 %286 }
 0x24b   :  { %v289_v3 = vsel %vm279_vm3, %v287_v2, 0.0 }
 0x24c   :  { %344 = vrot.lane.b32.xlu0 %v289_v3, %s3204_s23 }
 0x258   :  { %v275_v4 = vpop.permute.xlu1 %274 }
 0x259   :  { %v277_v5 = vmul.f32 %v3013_v57, %v275_v4 }
 0x25b   :  { %281 = vrot.lane.b32.xlu1 %v277_v5, %s3204_s23 }
 0x2be   :  { %v345_v26 = vpop.permute.xlu0 %344 }
 0x2cd   :  { %v282_v6 = vpop.permute.xlu1 %281 }
 0x2ce   :  { %v3408_v8 = vsel %vm279_vm3, %v282_v6, 0.0 }
 0x2cf   :  { %v291_v9 = vpack.c.bf16 %v3408_v8, %v3408_v8 }
 0x2d1   :  { %2786 = vmatmul.mubr.msk.bf16.vlgmr.msra.gmra.mxu1 %vm209_vm4, %v291_v9  ;;  %v3458_v9 = vld [vmem:[%s4232_s1 + $0x10] sm:$0xff] }
 0x2d2   :  { %2790 = vmatpush3.bf16.msra.mxu1 %v3287_v7  ;;  %2793 = vmatprep.mubr.msk.bf16.mxu1 %vm3201_vm0, %v3200_v1  ;;  %vm452_vm6 = vcmp.gt.f32.partialorder %v3458_v9, 0.0 }
 0x2d3   :  { %2791 = vmatprep.subr.bf16.mxu1 %v3200_v1 }
 0x2d6   :  { %2792 = vmatpush3.bf16.msra.mxu1 %v3300_v10 }
 0x2d7   :  { %2805 = vmatprep.subr.bf16.mxu1 %v3200_v1 }
 0x391   :  { %v329_v11 = vpop.f32.mrf.mxu1 }
 0x392   :  { %v335_v12 = vadd.f32 %v329_v11, %v177_v39 }
 0x393   :  { %v2787_v13 = vpop.f32.mrf.mxu1 }
 0x394   :  { %3016 = vtanh.f32 %v335_v12  ;;  %v2607_v18 = vmul.f32 -1.442695, %v335_v12 }
 0x395   :  { %v332_v14 = vpop.f32.mrf.mxu1 }
 0x396   :  { %3018 = vpow2.f32 %v2607_v18 }
 0x397   :  { %v2788_v16 = vpop.f32.mrf.mxu1 }
 0x3a1   :  { %v3017_v17 = vpop.eup %3016 }
 0x3a2   :  { %349 = vrot.lane.b32.xlu1 %v3017_v17, %s3203_s4 }
 0x3a3   :  { %v3019_v19 = vpop.eup %3018 }
 0x3a4   :  { %v339_v20 = vadd.f32 1.0, %v3019_v19 }
 0x3a6   :  { %3020 = vrcp.f32 %v339_v20 }
 0x3b3   :  { %v3021_v21 = vpop.eup %3020 }
 0x3b4   :  { %v347_v27 = vmul.f32 %v3021_v21, %v345_v26 }
 0x414   :  { %v350_v22 = vpop.permute.xlu1 %349 }
 0x415   :  { %v352_v25 = vmul.f32 %v3021_v21, %v350_v22 }
 0x417   :  { %354 = vrot.lane.b32.xlu1 %v352_v25, %s3204_s23 }
 0x489   :  { %v355_v28 = vpop.permute.xlu1 %354 }
 0x48a   :  { %v357_v29 = vadd.f32 %v355_v28, %v347_v27 }
 0x48c   :  { %3022 = vtanh.f32 %v357_v29 }
 0x499   :  { %v3023_v31 = vpop.eup %3022 }
 0x49a   :  { %360 = vrot.lane.b32.xlu0 %v3023_v31, %s3203_s4 }
 0x49e   :  { %372 = vrot.lane.b32.xlu0 %v357_v29, %s3205_s24 }
 0x50c   :  { %v361_v34 = vpop.permute.xlu0 %360 }
 0x50d   :  { %v363_v37 = vmul.f32 %v3021_v21, %v361_v34 }
 0x50f   :  { %367 = vrot.lane.b32.xlu1 %v363_v37, %s3204_s23 }
 0x510   :  { %v373_v39 = vpop.permute.xlu0 %372 }
 0x511   :  { %v375_v41 = vsel %vm365_vm5, %v373_v39, %v289_v3 }
 0x512   :  { %431 = vrot.lane.b32.xlu0 %v375_v41, %s3204_s23 }
 0x581   :  { %v3433_v46 = vpop.permute.xlu1 %367 }
 0x582   :  { %v370_v47 = vsel %vm365_vm5, %v3433_v46, %v3408_v8 }
 0x583   :  { %v378_v50 = vpack.c.bf16 %v370_v47, %v370_v47 }
 0x584   :  { %v432_v3 = vpop.permute.xlu0 %431 }
 0x585   :  { %2794 = vmatmul.mubr.msk.bf16.vlgmr.msra.gmra.mxu1 %vm209_vm4, %v378_v50 }
 0x586   :  { %2806 = vmatpush3.bf16.msra.mxu1 %v3287_v7  ;;  %2809 = vmatprep.mubr.msk.bf16.mxu1 %vm3201_vm0, %v3200_v1 }
 0x587   :  { %2807 = vmatprep.subr.bf16.mxu1 %v3200_v1 }
 0x58a   :  { %2808 = vmatpush3.bf16.msra.mxu1 %v3300_v10 }
 0x58b   :  { %2821 = vmatprep.subr.bf16.mxu1 %v3200_v1 }
 0x645   :  { %v416_v53 = vpop.f32.mrf.mxu1 }
 0x646   :  { %v422_v54 = vadd.f32 %v416_v53, %v178_v51  ;;  %v3489_v53 = vld [vmem:[%s4232_s1 + $0x18] sm:$0xff] }
 0x647   :  { %v2795_v55 = vpop.f32.mrf.mxu1  ;;  %vm539_vm7 = vcmp.gt.f32.partialorder %v3489_v53, 0.0 }
 0x648   :  { %3024 = vtanh.f32 %v422_v54  ;;  %v2609_v59 = vmul.f32 -1.442695, %v422_v54 }
 0x649   :  { %v419_v56 = vpop.f32.mrf.mxu1 }
 0x64a   :  { %3026 = vpow2.f32 %v2609_v59 }
 0x64b   :  { %v2796_v57 = vpop.f32.mrf.mxu1 }
 0x655   :  { %v3025_v58 = vpop.eup %3024 }
 0x656   :  { %436 = vrot.lane.b32.xlu1 %v3025_v58, %s3203_s4 }
 0x657   :  { %v3027_v60 = vpop.eup %3026 }
 0x658   :  { %v426_v61 = vadd.f32 1.0, %v3027_v60 }
 0x65a   :  { %3028 = vrcp.f32 %v426_v61 }
 0x667   :  { %v3029_v62 = vpop.eup %3028 }
 0x668   :  { %v434_v4 = vmul.f32 %v3029_v62, %v432_v3 }
 0x6c8   :  { %v437_v63 = vpop.permute.xlu1 %436 }
 0x6c9   :  { %v439_v2 = vmul.f32 %v3029_v62, %v437_v63 }
 0x6cb   :  { %441 = vrot.lane.b32.xlu1 %v439_v2, %s3204_s23 }
 0x73d   :  { %v442_v51 = vpop.permute.xlu1 %441 }
 0x73e   :  { %v444_v5 = vadd.f32 %v442_v51, %v434_v4 }
 0x740   :  { %3030 = vtanh.f32 %v444_v5 }
 0x74d   :  { %v3031_v6 = vpop.eup %3030 }
 0x74e   :  { %447 = vrot.lane.b32.xlu0 %v3031_v6, %s3203_s4 }
 0x752   :  { %459 = vrot.lane.b32.xlu0 %v444_v5, %s3205_s24 }
 0x7c0   :  { %v448_v11 = vpop.permute.xlu0 %447 }
 0x7c1   :  { %v450_v12 = vmul.f32 %v3029_v62, %v448_v11 }
 0x7c3   :  { %454 = vrot.lane.b32.xlu1 %v450_v12, %s3204_s23 }
 0x7c4   :  { %v460_v13 = vpop.permute.xlu0 %459 }
 0x7c5   :  { %v462_v14 = vsel %vm452_vm6, %v460_v13, %v375_v41 }
 0x7c6   :  { %518 = vrot.lane.b32.xlu0 %v462_v14, %s3204_s23 }
 0x835   :  { %v3465_v16 = vpop.permute.xlu1 %454 }
 0x836   :  { %v457_v17 = vsel %vm452_vm6, %v3465_v16, %v370_v47 }
 0x837   :  { %v465_v18 = vpack.c.bf16 %v457_v17, %v457_v17 }
 0x838   :  { %v519_v39 = vpop.permute.xlu0 %518 }
 0x839   :  { %2802 = vmatmul.mubr.msk.bf16.vlgmr.msra.gmra.mxu0 %vm209_vm4, %v465_v18  ;;  %v3516_v18 = vld [vmem:[%s4232_s1 + $0x20] sm:$0xff] }
 0x83a   :  { %2814 = vmatpush3.bf16.msra.mxu0 %v3287_v7  ;;  %2817 = vmatprep.mubr.msk.bf16.mxu0 %vm3201_vm0, %v3200_v1  ;;  %vm626_vm8 = vcmp.gt.f32.partialorder %v3516_v18, 0.0 }
 0x83b   :  { %2815 = vmatprep.subr.bf16.mxu0 %v3200_v1 }
 0x83e   :  { %2816 = vmatpush3.bf16.msra.mxu0 %v3300_v10 }
 0x83f   :  { %2829 = vmatprep.subr.bf16.mxu0 %v3200_v1 }
 0x8f9   :  { %v503_v19 = vpop.f32.mrf.mxu0 }
 0x8fa   :  { %v509_v20 = vadd.f32 %v503_v19, %v179_v44 }
 0x8fb   :  { %v2803_v21 = vpop.f32.mrf.mxu0 }
 0x8fc   :  { %3032 = vtanh.f32 %v509_v20  ;;  %v2611_v27 = vmul.f32 -1.442695, %v509_v20 }
 0x8fd   :  { %v506_v22 = vpop.f32.mrf.mxu0 }
 0x8fe   :  { %3034 = vpow2.f32 %v2611_v27 }
 0x8ff   :  { %v2804_v25 = vpop.f32.mrf.mxu0 }
 0x909   :  { %v3033_v26 = vpop.eup %3032 }
 0x90a   :  { %523 = vrot.lane.b32.xlu1 %v3033_v26, %s3203_s4 }
 0x90b   :  { %v3035_v28 = vpop.eup %3034 }
 0x90c   :  { %v513_v29 = vadd.f32 1.0, %v3035_v28 }
 0x90e   :  { %3036 = vrcp.f32 %v513_v29 }
 0x91b   :  { %v3037_v31 = vpop.eup %3036 }
 0x91c   :  { %v521_v41 = vmul.f32 %v3037_v31, %v519_v39 }
 0x97c   :  { %v524_v34 = vpop.permute.xlu1 %523 }
 0x97d   :  { %v526_v37 = vmul.f32 %v3037_v31, %v524_v34 }
 0x97f   :  { %528 = vrot.lane.b32.xlu1 %v526_v37, %s3204_s23 }
 0x9f1   :  { %v529_v44 = vpop.permute.xlu1 %528 }
 0x9f2   :  { %v531_v47 = vadd.f32 %v529_v44, %v521_v41 }
 0x9f4   :  { %3038 = vtanh.f32 %v531_v47 }
 0xa01   :  { %v3039_v50 = vpop.eup %3038 }
 0xa02   :  { %534 = vrot.lane.b32.xlu0 %v3039_v50, %s3203_s4 }
 0xa06   :  { %546 = vrot.lane.b32.xlu0 %v531_v47, %s3205_s24 }
 0xa74   :  { %v535_v54 = vpop.permute.xlu0 %534 }
 0xa75   :  { %v537_v55 = vmul.f32 %v3037_v31, %v535_v54 }
 0xa77   :  { %541 = vrot.lane.b32.xlu1 %v537_v55, %s3204_s23 }
 0xa78   :  { %v547_v56 = vpop.permute.xlu0 %546 }
 0xa79   :  { %v549_v57 = vsel %vm539_vm7, %v547_v56, %v462_v14 }
 0xa7a   :  { %605 = vrot.lane.b32.xlu0 %v549_v57, %s3204_s23 }
 0xae9   :  { %v542_v58 = vpop.permute.xlu1 %541 }
 0xaea   :  { %v544_v59 = vsel %vm539_vm7, %v542_v58, %v457_v17  ;;  %v550_v26 = vsel %vm539_vm7, %v542_v58, 0.0 }
 0xaeb   :  { %v552_v60 = vpack.c.bf16 %v544_v59, %v544_v59 }
 0xaec   :  { %v606_v14 = vpop.permute.xlu0 %605 }
 0xaed   :  { %2810 = vmatmul.mubr.msk.bf16.vlgmr.msra.gmra.mxu1 %vm209_vm4, %v552_v60  ;;  %v3555_v60 = vld [vmem:[%s4232_s1 + $0x28] sm:$0xff] }
 0xaee   :  { %2822 = vmatpush3.bf16.msra.mxu1 %v3287_v7  ;;  %2825 = vmatprep.mubr.msk.bf16.mxu1 %vm3201_vm0, %v3200_v1  ;;  %vm713_vm10 = vcmp.gt.f32.partialorder %v3555_v60, 0.0 }
 0xaef   :  { %2823 = vmatprep.subr.bf16.mxu1 %v3200_v1 }
 0xaf2   :  { %2824 = vmatpush3.bf16.msra.mxu1 %v3300_v10 }
 0xbad   :  { %v590_v61 = vpop.f32.mrf.mxu1 }
 0xbae   :  { %v596_v62 = vadd.f32 %v590_v61, %v180_v45 }
 0xbaf   :  { %v2811_v63 = vpop.f32.mrf.mxu1 }
 0xbb0   :  { %3040 = vtanh.f32 %v596_v62  ;;  %v2613_v51 = vmul.f32 -1.442695, %v596_v62 }
 0xbb1   :  { %v593_v2 = vpop.f32.mrf.mxu1 }
 0xbb2   :  { %3042 = vpow2.f32 %v2613_v51 }
 0xbb3   :  { %v2812_v3 = vpop.f32.mrf.mxu1 }
 0xbbd   :  { %v3041_v4 = vpop.eup %3040 }
 0xbbe   :  { %610 = vrot.lane.b32.xlu1 %v3041_v4, %s3203_s4  ;;  %v463_v4 = vsel %vm452_vm6, %v3465_v16, 0.0 }
 0xbbf   :  { %v3043_v5 = vpop.eup %3042 }
 0xbc0   :  { %v600_v6 = vadd.f32 1.0, %v3043_v5 }
 0xbc2   :  { %3044 = vrcp.f32 %v600_v6 }
 0xbcf   :  { %v3045_v11 = vpop.eup %3044 }
 0xbd0   :  { %v608_v30 = vmul.f32 %v3045_v11, %v606_v14 }
 0xc30   :  { %v611_v12 = vpop.permute.xlu1 %610 }
 0xc31   :  { %v613_v13 = vmul.f32 %v3045_v11, %v611_v12 }
 0xc33   :  { %615 = vrot.lane.b32.xlu1 %v613_v13, %s3204_s23 }
 0xca5   :  { %v616_v38 = vpop.permute.xlu1 %615 }
 0xca6   :  { %v618_v45 = vadd.f32 %v616_v38, %v608_v30 }
 0xca8   :  { %3046 = vtanh.f32 %v618_v45 }
 0xcb5   :  { %v3047_v17 = vpop.eup %3046 }
 0xcb6   :  { %621 = vrot.lane.b32.xlu0 %v3047_v17, %s3203_s4 }
 0xcba   :  { %633 = vrot.lane.b32.xlu0 %v618_v45, %s3205_s24 }
 0xd28   :  { %v622_v19 = vpop.permute.xlu0 %621 }
 0xd29   :  { %v624_v20 = vmul.f32 %v3045_v11, %v622_v19 }
 0xd2b   :  { %628 = vrot.lane.b32.xlu1 %v624_v20, %s3204_s23 }
 0xd2c   :  { %v634_v21 = vpop.permute.xlu0 %633 }
 0xd2d   :  { %v636_v22 = vsel %vm626_vm8, %v634_v21, %v549_v57 }
 0xd2e   :  { %692 = vrot.lane.b32.xlu0 %v636_v22, %s3204_s23 }
 0xd9d   :  { %v629_v25 = vpop.permute.xlu1 %628 }
 0xd9e   :  { %v631_v27 = vsel %vm626_vm8, %v629_v25, %v544_v59  ;;  %v637_v28 = vsel %vm626_vm8, %v629_v25, 0.0 }
 0xd9f   :  { %v639_v29 = vpack.c.bf16 %v631_v27, %v631_v27  ;;  %v896_v31 = vsel %vm54_vm9, %v550_v26, %v637_v28  ;;  %v897_v34 = vsel %vm54_vm9, %v637_v28, %v550_v26  ;;  %v3588_v28 = vld [vmem:[%s4232_s1 + $0x30] sm:$0xff] }
 0xda0   :  { %904 = vst.msk [vmem:[#allocation3 + $0x18] sm:$0xff] %vm209_vm4, %v896_v31  ;;  %905 = vst.msk [vmem:[#allocation3 + $0x20] sm:$0xff] %vm209_vm4, %v897_v34  ;;  %v693_v58 = vpop.permute.xlu0 %692  ;;  %vm800_vm11 = vcmp.gt.f32.partialorder %v3588_v28, 0.0 }
 0xda1   :  { %2818 = vmatmul.mubr.msk.bf16.vlgmr.msra.gmra.mxu0 %vm209_vm4, %v639_v29 }
 0xda2   :  { %2830 = vmatpush3.bf16.msra.mxu0 %v3287_v7  ;;  %2833 = vmatprep.mubr.msk.bf16.mxu0 %vm3201_vm0, %v3200_v1 }
 0xda3   :  { %2831 = vmatprep.subr.bf16.mxu0 %v3200_v1 }
 0xda6   :  { %2832 = vmatpush3.bf16.msra.mxu0 %v3300_v10 }
 0xda7   :  { %2849 = vmatprep.subr.bf16.mxu0 %v3200_v1 }
 0xe61   :  { %v677_v37 = vpop.f32.mrf.mxu0 }
 0xe62   :  { %v683_v39 = vadd.f32 %v677_v37, %v181_v52 }
 0xe63   :  { %v2819_v41 = vpop.f32.mrf.mxu0 }
 0xe64   :  { %3048 = vtanh.f32 %v683_v39  ;;  %v2615_v50 = vmul.f32 -1.442695, %v683_v39  ;;  %v376_v41 = vsel %vm365_vm5, %v3433_v46, 0.0 }
 0xe65   :  { %v680_v44 = vpop.f32.mrf.mxu0 }
 0xe66   :  { %3050 = vpow2.f32 %v2615_v50 }
 0xe67   :  { %v2820_v7 = vpop.f32.mrf.mxu0 }
 0xe71   :  { %v3049_v47 = vpop.eup %3048 }
 0xe72   :  { %697 = vrot.lane.b32.xlu1 %v3049_v47, %s3203_s4 }
 0xe73   :  { %v3051_v54 = vpop.eup %3050 }
 0xe74   :  { %v687_v10 = vadd.f32 1.0, %v3051_v54 }
 0xe76   :  { %3052 = vrcp.f32 %v687_v10 }
 0xe83   :  { %v3053_v55 = vpop.eup %3052 }
 0xe84   :  { %v695_v24 = vmul.f32 %v3053_v55, %v693_v58 }
 0xee4   :  { %v698_v56 = vpop.permute.xlu1 %697 }
 0xee5   :  { %v700_v57 = vmul.f32 %v3053_v55, %v698_v56 }
 0xee7   :  { %702 = vrot.lane.b32.xlu1 %v700_v57, %s3204_s23 }
 0xf59   :  { %v703_v48 = vpop.permute.xlu1 %702 }
 0xf5a   :  { %v705_v52 = vadd.f32 %v703_v48, %v695_v24 }
 0xf5c   :  { %3054 = vtanh.f32 %v705_v52 }
 0xf69   :  { %v3055_v59 = vpop.eup %3054 }
 0xf6a   :  { %708 = vrot.lane.b32.xlu0 %v3055_v59, %s3203_s4 }
 0xf6e   :  { %720 = vrot.lane.b32.xlu0 %v705_v52, %s3205_s24 }
 0xfdc   :  { %v709_v61 = vpop.permute.xlu0 %708 }
 0xfdd   :  { %v711_v62 = vmul.f32 %v3053_v55, %v709_v61 }
 0xfdf   :  { %715 = vrot.lane.b32.xlu1 %v711_v62, %s3204_s23 }
 0xfe0   :  { %v721_v63 = vpop.permute.xlu0 %720 }
 0xfe1   :  { %v723_v2 = vsel %vm713_vm10, %v721_v63, %v636_v22 }
 0xfe2   :  { %779 = vrot.lane.b32.xlu0 %v723_v2, %s3204_s23 }
0x1051   :  { %v716_v3 = vpop.permute.xlu1 %715 }
0x1052   :  { %v718_v51 = vsel %vm713_vm10, %v716_v3, %v631_v27  ;;  %v724_v5 = vsel %vm713_vm10, %v716_v3, 0.0  ;;  %v3000_v3 = vld [vmem:[%s4233_s5 + $0x8] sm:$0xff]  }
0x1053   :  { %v726_v6 = vpack.c.bf16 %v718_v51, %v718_v51  ;;  %v895_v11 = vsel %vm54_vm9, %v463_v4, %v724_v5  ;;  %v898_v12 = vsel %vm54_vm9, %v724_v5, %v463_v4  ;;  %v3001_v4 = vld [vmem:[%s4233_s5] sm:$0xff]   ;;  %2837 = vmatprep.subr.bf16.mxu1 %v3000_v3 }
0x1054   :  { %903 = vst.msk [vmem:[#allocation3 + $0x10] sm:$0xff] %vm209_vm4, %v895_v11  ;;  %906 = vst.msk [vmem:[#allocation3 + $0x28] sm:$0xff] %vm209_vm4, %v898_v12  ;;  %v780_v26 = vpop.permute.xlu0 %779  ;;  %v3636_v11 = vld [vmem:[%s4234_s6] sm:$0xff]   ;;  %v3651_v12 = vld [vmem:[%s4232_s1 + $0x38] sm:$0xff] }
0x1055   :  { %2826 = vmatmul.mubr.msk.bf16.vlgmr.msra.gmra.mxu1 %vm209_vm4, %v726_v6  ;;  %v3630_v6 = vld [vmem:[%s4234_s6 + $0x8] sm:$0xff]   ;;  %vm887_vm12 = vcmp.gt.f32.partialorder %v3651_v12, 0.0 }
0x1056   :  { %2838 = vmatpush3.bf16.msra.mxu1 %v3000_v3 }
0x1057   :  { %2839 = vmatprep.subr.bf16.mxu1 %v3001_v4 }
0x105a   :  { %2840 = vmatpush3.bf16.msra.mxu1 %v3001_v4 }
0x105b   :  { %2865 = vmatprep.subr.bf16.mxu1 %v3200_v1 }
0x1115   :  { %v764_v16 = vpop.f32.mrf.mxu1 }
0x1116   :  { %v770_v13 = vadd.f32 %v764_v16, %v182_v40 }
0x1117   :  { %v2827_v14 = vpop.f32.mrf.mxu1 }
0x1118   :  { %3056 = vtanh.f32 %v770_v13  ;;  %v2617_v17 = vmul.f32 -1.442695, %v770_v13 }
0x1119   :  { %v767_v30 = vpop.f32.mrf.mxu1 }
0x111a   :  { %3058 = vpow2.f32 %v2617_v17 }
0x111b   :  { %v2828_v38 = vpop.f32.mrf.mxu1 }
0x111c   :  { %v911_v38 = vld [vmem:[#allocation3 + $0x10] sm:$0xff] }
0x1125   :  { %v3057_v45 = vpop.eup %3056 }
0x1126   :  { %784 = vrot.lane.b32.xlu1 %v3057_v45, %s3203_s4 }
0x1127   :  { %v3059_v19 = vpop.eup %3058 }
0x1128   :  { %v774_v20 = vadd.f32 1.0, %v3059_v19  ;;  %v914_v19 = vld [vmem:[#allocation3 + $0x28] sm:$0xff] }
0x112a   :  { %3060 = vrcp.f32 %v774_v20 }
0x1137   :  { %v3061_v21 = vpop.eup %3060 }
0x1138   :  { %v782_v33 = vmul.f32 %v3061_v21, %v780_v26 }
0x1198   :  { %v785_v22 = vpop.permute.xlu1 %784 }
0x1199   :  { %v787_v25 = vmul.f32 %v3061_v21, %v785_v22 }
0x119b   :  { %789 = vrot.lane.b32.xlu1 %v787_v25, %s3204_s23  ;;  %v913_v25 = vld [vmem:[#allocation3 + $0x20] sm:$0xff] }
0x119c   :  { %v919_v26 = vpack.c.bf16 %v914_v19, %v913_v25 }
0x120d   :  { %v790_v36 = vpop.permute.xlu1 %789 }
0x120e   :  { %v792_v40 = vadd.f32 %v790_v36, %v782_v33 }
0x1210   :  { %3062 = vtanh.f32 %v792_v40 }
0x121d   :  { %v3063_v27 = vpop.eup %3062 }
0x121e   :  { %795 = vrot.lane.b32.xlu0 %v3063_v27, %s3203_s4 }
0x1222   :  { %807 = vrot.lane.b32.xlu0 %v792_v40, %s3205_s24 }
0x1290   :  { %v796_v29 = vpop.permute.xlu0 %795 }
0x1291   :  { %v798_v31 = vmul.f32 %v3061_v21, %v796_v29  ;;  %v912_v21 = vld [vmem:[#allocation3 + $0x18] sm:$0xff] }
0x1292   :  { %v918_v22 = vpack.c.bf16 %v912_v21, %v911_v38 }
0x1293   :  { %802 = vrot.lane.b32.xlu1 %v798_v31, %s3204_s23 }
0x1294   :  { %v808_v34 = vpop.permute.xlu0 %807 }
0x1295   :  { %v810_v37 = vsel %vm800_vm11, %v808_v34, %v723_v2  ;;  %v2620_v34 = vld [vmem:[%s4235_s7] ss:$0 sm:$0xff] }
0x1296   :  { %866 = vrot.lane.b32.xlu0 %v810_v37, %s3204_s23 }
0x1305   :  { %v803_v39 = vpop.permute.xlu1 %802 }
0x1306   :  { %v805_v44 = vsel %vm800_vm11, %v803_v39, %v718_v51  ;;  %v811_v7 = vsel %vm800_vm11, %v803_v39, 0.0 }
0x1307   :  { %v813_v47 = vpack.c.bf16 %v805_v44, %v805_v44  ;;  %v894_v50 = vsel %vm54_vm9, %v376_v41, %v811_v7  ;;  %v899_v54 = vsel %vm54_vm9, %v811_v7, %v376_v41 }
0x1308   :  { %902 = vst.msk [vmem:[#allocation3 + $0x8] sm:$0xff] %vm209_vm4, %v894_v50  ;;  %907 = vst.msk [vmem:[#allocation3 + $0x30] sm:$0xff] %vm209_vm4, %v899_v54  ;;  %v867_v63 = vpop.permute.xlu0 %866 }
0x1309   :  { %2834 = vmatmul.mubr.msk.bf16.vlgmr.msra.gmra.mxu0 %vm209_vm4, %v813_v47 }
0x130a   :  { %2853 = vmatprep.mubr.msk.bf16.mxu0 %vm3201_vm0, %v3200_v1  ;;  %2850 = vmatpush3.bf16.msra.mxu0 %v3630_v6 }
0x130b   :  { %2851 = vmatprep.subr.bf16.mxu0 %v3200_v1 }
0x130e   :  { %2852 = vmatpush3.bf16.msra.mxu0 %v3636_v11 }
0x130f   :  { %2857 = vmatprep.subr.bf16.mxu0 %v3200_v1  ;;  %v910_v17 = vld [vmem:[#allocation3 + $0x8] sm:$0xff]  ;;  %v915_v33 = vld [vmem:[#allocation3 + $0x30] sm:$0xff] }
0x1311   :  { %2854 = vmatmul.mubr.bf16.vlgmr.msra.gmra.mxu0 %v3202_v15 }
0x1312   :  { %2858 = vmatpush3.bf16.msra.mxu0 %v3630_v6  ;;  %2861 = vmatprep.mubr.msk.bf16.mxu0 %vm3201_vm0, %v3200_v1 }
0x1313   :  { %2859 = vmatprep.subr.bf16.mxu0 %v3200_v1 }
0x1316   :  { %2860 = vmatpush3.bf16.msra.mxu0 %v3636_v11 }
0x1317   :  { %2873 = vmatprep.subr.bf16.mxu0 %v3200_v1 }
0x13c9   :  { %v851_v46 = vpop.f32.mrf.mxu0 }
0x13ca   :  { %v857_v10 = vadd.f32 %v851_v46, %v183_v49 }
0x13cb   :  { %v2835_v55 = vpop.f32.mrf.mxu0 }
0x13cc   :  { %3064 = vtanh.f32 %v857_v10  ;;  %v2619_v24 = vmul.f32 -1.442695, %v857_v10 }
0x13cd   :  { %v854_v56 = vpop.f32.mrf.mxu0 }
0x13ce   :  { %3066 = vpow2.f32 %v2619_v24 }
0x13cf   :  { %v2836_v57 = vpop.f32.mrf.mxu0 }
0x13d1   :  { %v1088_v40 = vpop.f32.mrf.mxu0 }
0x13d3   :  { %v2855_v27 = vpop.f32.mrf.mxu0 }
0x13d5   :  { %v1091_v29 = vpop.f32.mrf.mxu0 }
0x13d7   :  { %v2856_v31 = vpop.f32.mrf.mxu0 }
0x13d9   :  { %v3065_v58 = vpop.eup %3064 }
0x13da   :  { %871 = vrot.lane.b32.xlu1 %v3065_v58, %s3203_s4 }
0x13db   :  { %v3067_v48 = vpop.eup %3066 }
0x13dc   :  { %v861_v52 = vadd.f32 1.0, %v3067_v48 }
0x13de   :  { %3068 = vrcp.f32 %v861_v52 }
0x13eb   :  { %v3069_v59 = vpop.eup %3068 }
0x13ec   :  { %v869_v42 = vmul.f32 %v3069_v59, %v867_v63 }
0x144c   :  { %v872_v61 = vpop.permute.xlu1 %871 }
0x144d   :  { %v874_v62 = vmul.f32 %v3069_v59, %v872_v61 }
0x144f   :  { %876 = vrot.lane.b32.xlu1 %v874_v62, %s3204_s23 }
0x14c1   :  { %v877_v43 = vpop.permute.xlu1 %876 }
0x14c2   :  { %v879_v49 = vadd.f32 %v877_v43, %v869_v42 }
0x14c4   :  { %3070 = vtanh.f32 %v879_v49 }
0x14d1   :  { %v3071_v2 = vpop.eup %3070 }
0x14d2   :  { %882 = vrot.lane.b32.xlu0 %v3071_v2, %s3203_s4 }
0x1544   :  { %v883_v51 = vpop.permute.xlu0 %882 }
0x1545   :  { %v885_v5 = vmul.f32 %v3069_v59, %v883_v51 }
0x1547   :  { %889 = vrot.lane.b32.xlu1 %v885_v5, %s3204_s23 }
0x15b9   :  { %v890_v16 = vpop.permute.xlu1 %889 }
0x15ba   :  { %v892_v13 = vsel %vm887_vm12, %v890_v16, 0.0 }
0x15bb   :  { %v893_v14 = vsel %vm54_vm9, %v3408_v8, %v892_v13  ;;  %v900_v30 = vsel %vm54_vm9, %v892_v13, %v3408_v8 }
0x15bc   :  { %901 = vst.msk [vmem:[#allocation3] sm:$0xff] %vm209_vm4, %v893_v14  ;;  %908 = vst.msk [vmem:[#allocation3 + $0x38] sm:$0xff] %vm209_vm4, %v900_v30 }
0x15c3   :  { %v909_v45 = vld [vmem:[#allocation3] sm:$0xff]  ;;  %v916_v8 = vld [vmem:[#allocation3 + $0x38] sm:$0xff] }
0x15c4   :  { %v917_v20 = vpack.c.bf16 %v910_v17, %v909_v45  ;;  %v920_v36 = vpack.c.bf16 %v916_v8, %v915_v33 }
0x15c6   :  { %2841 = vmatprep.mubr.msk.bf16.mxu1 %vm209_vm4, %v917_v20 }
0x15c7   :  { %2842 = vmatmul.mubr.msk.bf16.vlgmr.msra.gmra.mxu1 %vm209_vm4, %v918_v22 }
0x15c8   :  { %2845 = vmatprep.mubr.msk.bf16.mxu1 %vm209_vm4, %v919_v26  ;;  %2866 = vmatpush3.bf16.msra.mxu1 %v3630_v6 }
0x15c9   :  { %2867 = vmatprep.subr.bf16.mxu1 %v3200_v1 }
0x15cc   :  { %2868 = vmatpush3.bf16.msra.mxu1 %v3636_v11 }
0x15cd   :  { %2881 = vmatprep.subr.bf16.mxu1 %v3200_v1 }
0x15cf   :  { %2846 = vmatmul.mubr.msk.bf16.gmra.mxu1 %vm209_vm4, %v920_v36 }
0x15d0   :  { %2869 = vmatprep.mubr.msk.bf16.mxu1 %vm3201_vm0, %v3200_v1 }
0x1687   :  { %v2843_v37 = vpop.f32.mrf.mxu1 }
0x1688   :  { %v3677_v39 = vadd.f32 %v2843_v37, %v2620_v34 }
0x1689   :  { %v990_v41 = vpop.f32.mrf.mxu1 }
0x168a   :  { %v3695_v24 = vadd.f32 %v2620_v34, %v990_v41 }
0x168b   :  { %v2844_v44 = vpop.f32.mrf.mxu1 }
0x168c   :  { %v3679_v7 = vadd.f32 %v2844_v44, %v2620_v34 }
0x168d   :  { %v993_v47 = vpop.f32.mrf.mxu1 }
0x168e   :  { %v3681_v50 = vadd.f32 %v2620_v34, %v993_v47 }
0x168f   :  { %v2847_v54 = vpop.f32.mrf.mxu1 }
0x1690   :  { %v3683_v46 = vadd.f32 %v2847_v54, %v2620_v34 }
0x1691   :  { %v1006_v10 = vpop.f32.mrf.mxu1 }
0x1692   :  { %v3685_v55 = vadd.f32 %v2620_v34, %v1006_v10  ;;  %v1022_v56 = vsel %vm3346_vm2, %v3681_v50, %v3683_v46  ;;  %v1027_v57 = vsel %vm3346_vm2, %v3683_v46, %v3681_v50 }
0x1693   :  { %v2848_v58 = vpop.f32.mrf.mxu1 }
0x1694   :  { %v3697_v48 = vadd.f32 %v2848_v58, %v2620_v34  ;;  %v1024_v52 = vsel %vm3346_vm2, %v3679_v7, %v3685_v55  ;;  %v1025_v59 = vsel %vm3346_vm2, %v3685_v55, %v3679_v7 }
0x1695   :  { %v1009_v61 = vpop.f32.mrf.mxu1 }
0x1696   :  { %v1021_v62 = vsel %vm3346_vm2, %v3695_v24, %v3697_v48  ;;  %v3711_v63 = vadd.f32 %v2620_v34, %v1009_v61  ;;  %v1028_v42 = vsel %vm3346_vm2, %v3697_v48, %v3695_v24 }
0x1697   :  { %v1094_v43 = vadd.f32 %v1088_v40, %v1021_v62 }
0x1698   :  { %v1023_v49 = vsel %vm3346_vm2, %v3677_v39, %v3711_v63  ;;  %v1026_v2 = vsel %vm3346_vm2, %v3711_v63, %v3677_v39 }
0x1699   :  { %3072 = vtanh.f32 %v1094_v43  ;;  %v2629_v4 = vmul.f32 -1.442695, %v1094_v43 }
0x169b   :  { %3074 = vpow2.f32 %v2629_v4 }
0x16a6   :  { %v3073_v3 = vpop.eup %3072 }
0x16a7   :  { %1104 = vrot.lane.b32.xlu0 %v3073_v3, %s3203_s4 }
0x16a8   :  { %v3075_v51 = vpop.eup %3074 }
0x16a9   :  { %v1098_v5 = vadd.f32 1.0, %v3075_v51 }
0x16ab   :  { %3076 = vrcp.f32 %v1098_v5 }
0x16b8   :  { %v3077_v16 = vpop.eup %3076 }
0x16b9   :  { %v1102_v30 = vmul.f32 0.0, %v3077_v16 }
0x1719   :  { %v1105_v13 = vpop.permute.xlu0 %1104 }
0x171a   :  { %v1107_v14 = vmul.f32 %v3077_v16, %v1105_v13 }
0x171c   :  { %1109 = vrot.lane.b32.xlu1 %v1107_v14, %s3204_s23 }
0x178e   :  { %v1110_v38 = vpop.permute.xlu1 %1109 }
0x178f   :  { %v1112_v45 = vadd.f32 %v1110_v38, %v1102_v30 }
0x1791   :  { %3078 = vtanh.f32 %v1112_v45 }
0x179e   :  { %v3079_v17 = vpop.eup %3078 }
0x179f   :  { %1115 = vrot.lane.b32.xlu0 %v3079_v17, %s3203_s4 }
0x17a3   :  { %1127 = vrot.lane.b32.xlu0 %v1112_v45, %s3205_s24 }
0x1811   :  { %v1116_v19 = vpop.permute.xlu0 %1115 }
0x1812   :  { %v1118_v20 = vmul.f32 %v3077_v16, %v1116_v19 }
0x1814   :  { %1122 = vrot.lane.b32.xlu1 %v1118_v20, %s3204_s23 }
0x1815   :  { %v1128_v21 = vpop.permute.xlu0 %1127 }
0x1816   :  { %v1130_v22 = vsel %vm279_vm3, %v1128_v21, 0.0 }
0x1817   :  { %1185 = vrot.lane.b32.xlu0 %v1130_v22, %s3204_s23 }
0x1886   :  { %v1123_v25 = vpop.permute.xlu1 %1122 }
0x1887   :  { %v3735_v26 = vsel %vm279_vm3, %v1123_v25, 0.0 }
0x1888   :  { %v1132_v8 = vpack.c.bf16 %v3735_v26, %v3735_v26 }
0x1889   :  { %v1186_v54 = vpop.permute.xlu0 %1185 }
0x188a   :  { %2862 = vmatmul.mubr.msk.bf16.vlgmr.msra.gmra.mxu0 %vm209_vm4, %v1132_v8 }
0x188b   :  { %2874 = vmatpush3.bf16.msra.mxu0 %v3630_v6  ;;  %2877 = vmatprep.mubr.msk.bf16.mxu0 %vm3201_vm0, %v3200_v1 }
0x188c   :  { %2875 = vmatprep.subr.bf16.mxu0 %v3200_v1 }
0x188f   :  { %2876 = vmatpush3.bf16.msra.mxu0 %v3636_v11 }
0x1890   :  { %2889 = vmatprep.subr.bf16.mxu0 %v3200_v1 }
0x194a   :  { %v1170_v33 = vpop.f32.mrf.mxu0 }
0x194b   :  { %v1176_v0 = vadd.f32 %v1170_v33, %v1022_v56 }
0x194c   :  { %v2863_v36 = vpop.f32.mrf.mxu0 }
0x194d   :  { %3080 = vtanh.f32 %v1176_v0  ;;  %v2631_v31 = vmul.f32 -1.442695, %v1176_v0 }
0x194e   :  { %v1173_v40 = vpop.f32.mrf.mxu0 }
0x194f   :  { %3082 = vpow2.f32 %v2631_v31 }
0x1950   :  { %v2864_v27 = vpop.f32.mrf.mxu0 }
0x195a   :  { %v3081_v29 = vpop.eup %3080 }
0x195b   :  { %1190 = vrot.lane.b32.xlu1 %v3081_v29, %s3203_s4 }
0x195c   :  { %v3083_v34 = vpop.eup %3082 }
0x195d   :  { %v1180_v37 = vadd.f32 1.0, %v3083_v34 }
0x195f   :  { %3084 = vrcp.f32 %v1180_v37 }
0x196c   :  { %v3085_v41 = vpop.eup %3084 }
0x196d   :  { %v1188_v10 = vmul.f32 %v3085_v41, %v1186_v54 }
0x19cd   :  { %v1191_v44 = vpop.permute.xlu1 %1190 }
0x19ce   :  { %v1193_v47 = vmul.f32 %v3085_v41, %v1191_v44 }
0x19d0   :  { %1195 = vrot.lane.b32.xlu1 %v1193_v47, %s3204_s23 }
0x1a42   :  { %v1196_v56 = vpop.permute.xlu1 %1195 }
0x1a43   :  { %v1198_v58 = vadd.f32 %v1196_v56, %v1188_v10 }
0x1a45   :  { %3086 = vtanh.f32 %v1198_v58 }
0x1a52   :  { %v3087_v61 = vpop.eup %3086 }
0x1a53   :  { %1201 = vrot.lane.b32.xlu0 %v3087_v61, %s3203_s4 }
0x1a57   :  { %1213 = vrot.lane.b32.xlu0 %v1198_v58, %s3205_s24 }
0x1ac5   :  { %v1202_v62 = vpop.permute.xlu0 %1201 }
0x1ac6   :  { %v1204_v43 = vmul.f32 %v3085_v41, %v1202_v62 }
0x1ac8   :  { %1208 = vrot.lane.b32.xlu1 %v1204_v43, %s3204_s23 }
0x1ac9   :  { %v1214_v3 = vpop.permute.xlu0 %1213 }
0x1aca   :  { %v1216_v4 = vsel %vm365_vm5, %v1214_v3, %v1130_v22 }
0x1acb   :  { %1272 = vrot.lane.b32.xlu0 %v1216_v4, %s3204_s23 }
0x1b3a   :  { %v3754_v51 = vpop.permute.xlu1 %1208 }
0x1b3b   :  { %v1211_v5 = vsel %vm365_vm5, %v3754_v51, %v3735_v26 }
0x1b3c   :  { %v1219_v16 = vpack.c.bf16 %v1211_v5, %v1211_v5 }
0x1b3d   :  { %v1273_v33 = vpop.permute.xlu0 %1272 }
0x1b3e   :  { %2870 = vmatmul.mubr.msk.bf16.vlgmr.msra.gmra.mxu1 %vm209_vm4, %v1219_v16 }
0x1b3f   :  { %2882 = vmatpush3.bf16.msra.mxu1 %v3630_v6  ;;  %2885 = vmatprep.mubr.msk.bf16.mxu1 %vm3201_vm0, %v3200_v1 }
0x1b40   :  { %2883 = vmatprep.subr.bf16.mxu1 %v3200_v1 }
0x1b43   :  { %2884 = vmatpush3.bf16.msra.mxu1 %v3636_v11 }
0x1b44   :  { %2897 = vmatprep.subr.bf16.mxu1 %v3200_v1 }
0x1bfe   :  { %v1257_v13 = vpop.f32.mrf.mxu1 }
0x1bff   :  { %v1263_v14 = vadd.f32 %v1257_v13, %v1023_v49 }
0x1c00   :  { %v2871_v30 = vpop.f32.mrf.mxu1 }
0x1c01   :  { %3088 = vtanh.f32 %v1263_v14  ;;  %v2633_v19 = vmul.f32 -1.442695, %v1263_v14 }
0x1c02   :  { %v1260_v38 = vpop.f32.mrf.mxu1 }
0x1c03   :  { %3090 = vpow2.f32 %v2633_v19 }
0x1c04   :  { %v2872_v45 = vpop.f32.mrf.mxu1 }
0x1c0e   :  { %v3089_v17 = vpop.eup %3088 }
0x1c0f   :  { %1277 = vrot.lane.b32.xlu1 %v3089_v17, %s3203_s4 }
0x1c10   :  { %v3091_v20 = vpop.eup %3090 }
0x1c11   :  { %v1267_v21 = vadd.f32 1.0, %v3091_v20 }
0x1c13   :  { %3092 = vrcp.f32 %v1267_v21 }
0x1c20   :  { %v3093_v22 = vpop.eup %3092 }
0x1c21   :  { %v1275_v0 = vmul.f32 %v3093_v22, %v1273_v33 }
0x1c81   :  { %v1278_v25 = vpop.permute.xlu1 %1277 }
0x1c82   :  { %v1280_v8 = vmul.f32 %v3093_v22, %v1278_v25 }
0x1c84   :  { %1282 = vrot.lane.b32.xlu1 %v1280_v8, %s3204_s23 }
0x1cf6   :  { %v1283_v49 = vpop.permute.xlu1 %1282 }
0x1cf7   :  { %v1285_v36 = vadd.f32 %v1283_v49, %v1275_v0 }
0x1cf9   :  { %3094 = vtanh.f32 %v1285_v36 }
0x1d06   :  { %v3095_v40 = vpop.eup %3094 }
0x1d07   :  { %1288 = vrot.lane.b32.xlu0 %v3095_v40, %s3203_s4 }
0x1d0b   :  { %1300 = vrot.lane.b32.xlu0 %v1285_v36, %s3205_s24 }
0x1d79   :  { %v1289_v27 = vpop.permute.xlu0 %1288 }
0x1d7a   :  { %v1291_v29 = vmul.f32 %v3093_v22, %v1289_v27 }
0x1d7c   :  { %1295 = vrot.lane.b32.xlu1 %v1291_v29, %s3204_s23 }
0x1d7d   :  { %v1301_v31 = vpop.permute.xlu0 %1300 }
0x1d7e   :  { %v1303_v34 = vsel %vm452_vm6, %v1301_v31, %v1216_v4 }
0x1d7f   :  { %1359 = vrot.lane.b32.xlu0 %v1303_v34, %s3204_s23 }
0x1dee   :  { %v3780_v37 = vpop.permute.xlu1 %1295 }
0x1def   :  { %v1298_v41 = vsel %vm452_vm6, %v3780_v37, %v1211_v5 }
0x1df0   :  { %v1306_v44 = vpack.c.bf16 %v1298_v41, %v1298_v41 }
0x1df1   :  { %v1360_v13 = vpop.permute.xlu0 %1359 }
0x1df2   :  { %2878 = vmatmul.mubr.msk.bf16.vlgmr.msra.gmra.mxu0 %vm209_vm4, %v1306_v44 }
0x1df3   :  { %2890 = vmatpush3.bf16.msra.mxu0 %v3630_v6  ;;  %2893 = vmatprep.mubr.msk.bf16.mxu0 %vm3201_vm0, %v3200_v1 }
0x1df4   :  { %2891 = vmatprep.subr.bf16.mxu0 %v3200_v1 }
0x1df7   :  { %2892 = vmatpush3.bf16.msra.mxu0 %v3636_v11 }
0x1df8   :  { %2905 = vmatprep.subr.bf16.mxu0 %v3200_v1 }
0x1eb2   :  { %v1344_v47 = vpop.f32.mrf.mxu0 }
0x1eb3   :  { %v1350_v54 = vadd.f32 %v1344_v47, %v1024_v52 }
0x1eb4   :  { %v2879_v10 = vpop.f32.mrf.mxu0 }
0x1eb5   :  { %3096 = vtanh.f32 %v1350_v54  ;;  %v2635_v62 = vmul.f32 -1.442695, %v1350_v54 }
0x1eb6   :  { %v1347_v56 = vpop.f32.mrf.mxu0 }
0x1eb7   :  { %3098 = vpow2.f32 %v2635_v62 }
0x1eb8   :  { %v2880_v58 = vpop.f32.mrf.mxu0 }
0x1ec2   :  { %v3097_v61 = vpop.eup %3096 }
0x1ec3   :  { %1364 = vrot.lane.b32.xlu1 %v3097_v61, %s3203_s4 }
0x1ec4   :  { %v3099_v43 = vpop.eup %3098 }
0x1ec5   :  { %v1354_v3 = vadd.f32 1.0, %v3099_v43 }
0x1ec7   :  { %3100 = vrcp.f32 %v1354_v3 }
0x1ed4   :  { %v3101_v4 = vpop.eup %3100 }
0x1ed5   :  { %v1362_v14 = vmul.f32 %v3101_v4, %v1360_v13 }
0x1f35   :  { %v1365_v5 = vpop.permute.xlu1 %1364 }
0x1f36   :  { %v1367_v16 = vmul.f32 %v3101_v4, %v1365_v5 }
0x1f38   :  { %1369 = vrot.lane.b32.xlu1 %v1367_v16, %s3204_s23 }
0x1faa   :  { %v1370_v52 = vpop.permute.xlu1 %1369 }
0x1fab   :  { %v1372_v30 = vadd.f32 %v1370_v52, %v1362_v14 }
0x1fad   :  { %3102 = vtanh.f32 %v1372_v30 }
0x1fba   :  { %v3103_v38 = vpop.eup %3102 }
0x1fbb   :  { %1375 = vrot.lane.b32.xlu0 %v3103_v38, %s3203_s4 }
0x1fbf   :  { %1387 = vrot.lane.b32.xlu0 %v1372_v30, %s3205_s24 }
0x202d   :  { %v1376_v45 = vpop.permute.xlu0 %1375 }
0x202e   :  { %v1378_v17 = vmul.f32 %v3101_v4, %v1376_v45 }
0x2030   :  { %1382 = vrot.lane.b32.xlu1 %v1378_v17, %s3204_s23 }
0x2031   :  { %v1388_v19 = vpop.permute.xlu0 %1387 }
0x2032   :  { %v1390_v20 = vsel %vm539_vm7, %v1388_v19, %v1303_v34 }
0x2033   :  { %1446 = vrot.lane.b32.xlu0 %v1390_v20, %s3204_s23 }
0x20a2   :  { %v1383_v21 = vpop.permute.xlu1 %1382 }
0x20a3   :  { %v1385_v22 = vsel %vm539_vm7, %v1383_v21, %v1298_v41  ;;  %v1391_v43 = vsel %vm539_vm7, %v1383_v21, 0.0 }
0x20a4   :  { %v1393_v25 = vpack.c.bf16 %v1385_v22, %v1385_v22 }
0x20a5   :  { %v1447_v47 = vpop.permute.xlu0 %1446 }
0x20a6   :  { %2886 = vmatmul.mubr.msk.bf16.vlgmr.msra.gmra.mxu1 %vm209_vm4, %v1393_v25 }
0x20a7   :  { %2898 = vmatpush3.bf16.msra.mxu1 %v3630_v6  ;;  %2901 = vmatprep.mubr.msk.bf16.mxu1 %vm3201_vm0, %v3200_v1 }
0x20a8   :  { %2899 = vmatprep.subr.bf16.mxu1 %v3200_v1 }
0x20ab   :  { %2900 = vmatpush3.bf16.msra.mxu1 %v3636_v11 }
0x2166   :  { %v1431_v8 = vpop.f32.mrf.mxu1 }
0x2167   :  { %v1437_v33 = vadd.f32 %v1431_v8, %v1025_v59 }
0x2168   :  { %v2887_v0 = vpop.f32.mrf.mxu1 }
0x2169   :  { %3104 = vtanh.f32 %v1437_v33  ;;  %v2637_v27 = vmul.f32 -1.442695, %v1437_v33 }
0x216a   :  { %v1434_v49 = vpop.f32.mrf.mxu1 }
0x216b   :  { %3106 = vpow2.f32 %v2637_v27 }
0x216c   :  { %v2888_v36 = vpop.f32.mrf.mxu1 }
0x216d   :  { %v1304_v36 = vsel %vm452_vm6, %v3780_v37, 0.0 }
0x2176   :  { %v3105_v40 = vpop.eup %3104 }
0x2177   :  { %1451 = vrot.lane.b32.xlu1 %v3105_v40, %s3203_s4 }
0x2178   :  { %v3107_v29 = vpop.eup %3106 }
0x2179   :  { %v1441_v31 = vadd.f32 1.0, %v3107_v29 }
0x217b   :  { %3108 = vrcp.f32 %v1441_v31 }
0x2188   :  { %v3109_v34 = vpop.eup %3108 }
0x2189   :  { %v1449_v7 = vmul.f32 %v3109_v34, %v1447_v47 }
0x21e9   :  { %v1452_v41 = vpop.permute.xlu1 %1451 }
0x21ea   :  { %v1454_v44 = vmul.f32 %v3109_v34, %v1452_v41 }
0x21ec   :  { %1456 = vrot.lane.b32.xlu1 %v1454_v44, %s3204_s23 }
0x225e   :  { %v1457_v55 = vpop.permute.xlu1 %1456 }
0x225f   :  { %v1459_v59 = vadd.f32 %v1457_v55, %v1449_v7 }
0x2261   :  { %3110 = vtanh.f32 %v1459_v59 }
0x226e   :  { %v3111_v54 = vpop.eup %3110 }
0x226f   :  { %1462 = vrot.lane.b32.xlu0 %v3111_v54, %s3203_s4 }
0x2273   :  { %1474 = vrot.lane.b32.xlu0 %v1459_v59, %s3205_s24 }
0x22e1   :  { %v1463_v10 = vpop.permute.xlu0 %1462 }
0x22e2   :  { %v1465_v56 = vmul.f32 %v3109_v34, %v1463_v10 }
0x22e4   :  { %1469 = vrot.lane.b32.xlu1 %v1465_v56, %s3204_s23 }
0x22e5   :  { %v1475_v58 = vpop.permute.xlu0 %1474 }
0x22e6   :  { %v1477_v61 = vsel %vm626_vm8, %v1475_v58, %v1390_v20 }
0x22e7   :  { %1533 = vrot.lane.b32.xlu0 %v1477_v61, %s3204_s23 }
0x2356   :  { %v1470_v62 = vpop.permute.xlu1 %1469 }
0x2357   :  { %v1472_v3 = vsel %vm626_vm8, %v1470_v62, %v1385_v22  ;;  %v1478_v4 = vsel %vm626_vm8, %v1470_v62, 0.0 }
0x2358   :  { %v1480_v5 = vpack.c.bf16 %v1472_v3, %v1472_v3  ;;  %v1737_v16 = vsel %vm54_vm9, %v1391_v43, %v1478_v4  ;;  %v1738_v13 = vsel %vm54_vm9, %v1478_v4, %v1391_v43 }
0x2359   :  { %1745 = vst.msk [vmem:[#allocation3 + $0x18] sm:$0xff] %vm209_vm4, %v1737_v16  ;;  %1746 = vst.msk [vmem:[#allocation3 + $0x20] sm:$0xff] %vm209_vm4, %v1738_v13  ;;  %v1534_v21 = vpop.permute.xlu0 %1533  ;;  %v1217_v16 = vsel %vm365_vm5, %v3754_v51, 0.0 }
0x235a   :  { %2894 = vmatmul.mubr.msk.bf16.vlgmr.msra.gmra.mxu0 %vm209_vm4, %v1480_v5 }
0x235b   :  { %2906 = vmatpush3.bf16.msra.mxu0 %v3630_v6  ;;  %2909 = vmatprep.mubr.msk.bf16.mxu0 %vm3201_vm0, %v3200_v1 }
0x235c   :  { %2907 = vmatprep.subr.bf16.mxu0 %v3200_v1 }
0x235f   :  { %2908 = vmatpush3.bf16.msra.mxu0 %v3636_v11 }
0x2360   :  { %2925 = vmatprep.subr.bf16.mxu0 %v3200_v1 }
0x241a   :  { %v1518_v53 = vpop.f32.mrf.mxu0 }
0x241b   :  { %v1524_v18 = vadd.f32 %v1518_v53, %v1026_v2 }
0x241c   :  { %v2895_v14 = vpop.f32.mrf.mxu0 }
0x241d   :  { %3112 = vtanh.f32 %v1524_v18  ;;  %v2639_v38 = vmul.f32 -1.442695, %v1524_v18 }
0x241e   :  { %v1521_v52 = vpop.f32.mrf.mxu0 }
0x241f   :  { %3114 = vpow2.f32 %v2639_v38 }
0x2420   :  { %v2896_v6 = vpop.f32.mrf.mxu0 }
0x242a   :  { %v3113_v30 = vpop.eup %3112 }
0x242b   :  { %1538 = vrot.lane.b32.xlu1 %v3113_v30, %s3203_s4 }
0x242c   :  { %v3115_v45 = vpop.eup %3114 }
0x242d   :  { %v1528_v11 = vadd.f32 1.0, %v3115_v45 }
0x242f   :  { %3116 = vrcp.f32 %v1528_v11 }
0x243c   :  { %v3117_v17 = vpop.eup %3116 }
0x243d   :  { %v1536_v39 = vmul.f32 %v3117_v17, %v1534_v21 }
0x249d   :  { %v1539_v19 = vpop.permute.xlu1 %1538 }
0x249e   :  { %v1541_v20 = vmul.f32 %v3117_v17, %v1539_v19 }
0x24a0   :  { %1543 = vrot.lane.b32.xlu1 %v1541_v20, %s3204_s23 }
0x2512   :  { %v1544_v63 = vpop.permute.xlu1 %1543 }
0x2513   :  { %v1546_v2 = vadd.f32 %v1544_v63, %v1536_v39 }
0x2515   :  { %3118 = vtanh.f32 %v1546_v2 }
0x2522   :  { %v3119_v22 = vpop.eup %3118 }
0x2523   :  { %1549 = vrot.lane.b32.xlu0 %v3119_v22, %s3203_s4  ;;  %v3005_v22 = vld [vmem:[%s4236_s8] sm:$0xff]  }
0x2527   :  { %1561 = vrot.lane.b32.xlu0 %v1546_v2, %s3205_s24  ;;  %v3004_v2 = vld [vmem:[%s4236_s8 + $0x8] sm:$0xff]  }
0x2528   :  { %2913 = vmatprep.subr.bf16.mxu1 %v3004_v2 }
0x2595   :  { %v1550_v25 = vpop.permute.xlu0 %1549 }
0x2596   :  { %v1552_v8 = vmul.f32 %v3117_v17, %v1550_v25 }
0x2598   :  { %1556 = vrot.lane.b32.xlu1 %v1552_v8, %s3204_s23 }
0x2599   :  { %v1562_v33 = vpop.permute.xlu0 %1561 }
0x259a   :  { %v1564_v0 = vsel %vm713_vm10, %v1562_v33, %v1477_v61  ;;  %v3920_v33 = vld [vmem:[%s4237_s9 + $0x8] sm:$0xff]  }
0x259b   :  { %1620 = vrot.lane.b32.xlu0 %v1564_v0, %s3204_s23 }
0x260a   :  { %v1557_v49 = vpop.permute.xlu1 %1556 }
0x260b   :  { %v1559_v40 = vsel %vm713_vm10, %v1557_v49, %v1472_v3  ;;  %v1565_v27 = vsel %vm713_vm10, %v1557_v49, 0.0 }
0x260c   :  { %v1567_v29 = vpack.c.bf16 %v1559_v40, %v1559_v40  ;;  %v1736_v31 = vsel %vm54_vm9, %v1304_v36, %v1565_v27  ;;  %v1739_v34 = vsel %vm54_vm9, %v1565_v27, %v1304_v36 }
0x260d   :  { %1744 = vst.msk [vmem:[#allocation3 + $0x10] sm:$0xff] %vm209_vm4, %v1736_v31  ;;  %1747 = vst.msk [vmem:[#allocation3 + $0x28] sm:$0xff] %vm209_vm4, %v1739_v34  ;;  %v1621_v58 = vpop.permute.xlu0 %1620 }
0x260e   :  { %2902 = vmatmul.mubr.msk.bf16.vlgmr.msra.gmra.mxu1 %vm209_vm4, %v1567_v29 }
0x260f   :  { %2914 = vmatpush3.bf16.msra.mxu1 %v3004_v2 }
0x2610   :  { %2915 = vmatprep.subr.bf16.mxu1 %v3005_v22 }
0x2613   :  { %2916 = vmatpush3.bf16.msra.mxu1 %v3005_v22 }
0x2614   :  { %2941 = vmatprep.subr.bf16.mxu1 %v3200_v1  ;;  %v1752_v27 = vld [vmem:[#allocation3 + $0x10] sm:$0xff]  ;;  %v1755_v34 = vld [vmem:[#allocation3 + $0x28] sm:$0xff] }
0x26ce   :  { %v1605_v9 = vpop.f32.mrf.mxu1 }
0x26cf   :  { %v1611_v60 = vadd.f32 %v1605_v9, %v1027_v57 }
0x26d0   :  { %v2903_v37 = vpop.f32.mrf.mxu1 }
0x26d1   :  { %3120 = vtanh.f32 %v1611_v60  ;;  %v2641_v7 = vmul.f32 -1.442695, %v1611_v60  ;;  %v1753_v60 = vld [vmem:[#allocation3 + $0x18] sm:$0xff]  ;;  %v1754_v37 = vld [vmem:[#allocation3 + $0x20] sm:$0xff] }
0x26d2   :  { %v1608_v41 = vpop.f32.mrf.mxu1  ;;  %v1759_v12 = vpack.c.bf16 %v1753_v60, %v1752_v27 }
0x26d3   :  { %3122 = vpow2.f32 %v2641_v7  ;;  %v1760_v41 = vpack.c.bf16 %v1755_v34, %v1754_v37 }
0x26d4   :  { %v2904_v44 = vpop.f32.mrf.mxu1 }
0x26de   :  { %v3121_v47 = vpop.eup %3120 }
0x26df   :  { %1625 = vrot.lane.b32.xlu1 %v3121_v47, %s3203_s4 }
0x26e0   :  { %v3123_v55 = vpop.eup %3122 }
0x26e1   :  { %v1615_v59 = vadd.f32 1.0, %v3123_v55 }
0x26e3   :  { %3124 = vrcp.f32 %v1615_v59 }
0x26f0   :  { %v3125_v54 = vpop.eup %3124 }
0x26f1   :  { %v1623_v50 = vmul.f32 %v3125_v54, %v1621_v58 }
0x2751   :  { %v1626_v10 = vpop.permute.xlu1 %1625 }
0x2752   :  { %v1628_v56 = vmul.f32 %v3125_v54, %v1626_v10  ;;  %v2644_v10 = vld [vmem:[%s4238_s10] ss:$0 sm:$0xff] }
0x2754   :  { %1630 = vrot.lane.b32.xlu1 %v1628_v56, %s3204_s23 }
0x27c6   :  { %v1631_v46 = vpop.permute.xlu1 %1630 }
0x27c7   :  { %v1633_v57 = vadd.f32 %v1631_v46, %v1623_v50 }
0x27c9   :  { %3126 = vtanh.f32 %v1633_v57 }
0x27d6   :  { %v3127_v61 = vpop.eup %3126 }
0x27d7   :  { %1636 = vrot.lane.b32.xlu0 %v3127_v61, %s3203_s4 }
0x27db   :  { %1648 = vrot.lane.b32.xlu0 %v1633_v57, %s3205_s24 }
0x2849   :  { %v1637_v62 = vpop.permute.xlu0 %1636 }
0x284a   :  { %v1639_v43 = vmul.f32 %v3125_v54, %v1637_v62 }
0x284c   :  { %1643 = vrot.lane.b32.xlu1 %v1639_v43, %s3204_s23 }
0x284d   :  { %v1649_v3 = vpop.permute.xlu0 %1648 }
0x284e   :  { %v1651_v4 = vsel %vm800_vm11, %v1649_v3, %v1564_v0  ;;  %v3926_v0 = vld [vmem:[%s4237_s9] sm:$0xff]  }
0x284f   :  { %1707 = vrot.lane.b32.xlu0 %v1651_v4, %s3204_s23 }
0x28be   :  { %v1644_v5 = vpop.permute.xlu1 %1643 }
0x28bf   :  { %v1646_v13 = vsel %vm800_vm11, %v1644_v5, %v1559_v40  ;;  %v1652_v53 = vsel %vm800_vm11, %v1644_v5, 0.0 }
0x28c0   :  { %v1654_v18 = vpack.c.bf16 %v1646_v13, %v1646_v13  ;;  %v1735_v14 = vsel %vm54_vm9, %v1217_v16, %v1652_v53  ;;  %v1740_v52 = vsel %vm54_vm9, %v1652_v53, %v1217_v16 }
0x28c1   :  { %1743 = vst.msk [vmem:[#allocation3 + $0x8] sm:$0xff] %vm209_vm4, %v1735_v14  ;;  %1748 = vst.msk [vmem:[#allocation3 + $0x30] sm:$0xff] %vm209_vm4, %v1740_v52  ;;  %v1708_v39 = vpop.permute.xlu0 %1707 }
0x28c2   :  { %2910 = vmatmul.mubr.msk.bf16.vlgmr.msra.gmra.mxu0 %vm209_vm4, %v1654_v18 }
0x28c3   :  { %2929 = vmatprep.mubr.msk.bf16.mxu0 %vm3201_vm0, %v3200_v1  ;;  %2926 = vmatpush3.bf16.msra.mxu0 %v3920_v33 }
0x28c4   :  { %2927 = vmatprep.subr.bf16.mxu0 %v3200_v1 }
0x28c7   :  { %2928 = vmatpush3.bf16.msra.mxu0 %v3926_v0 }
0x28c8   :  { %2933 = vmatprep.subr.bf16.mxu0 %v3200_v1  ;;  %v1751_v31 = vld [vmem:[#allocation3 + $0x8] sm:$0xff]  ;;  %v1756_v44 = vld [vmem:[#allocation3 + $0x30] sm:$0xff] }
0x28ca   :  { %2930 = vmatmul.mubr.bf16.vlgmr.msra.gmra.mxu0 %v3202_v15 }
0x28cb   :  { %2934 = vmatpush3.bf16.msra.mxu0 %v3920_v33  ;;  %2937 = vmatprep.mubr.msk.bf16.mxu0 %vm3201_vm0, %v3200_v1 }
0x28cc   :  { %2935 = vmatprep.subr.bf16.mxu0 %v3200_v1 }
0x28cf   :  { %2936 = vmatpush3.bf16.msra.mxu0 %v3926_v0 }
0x28d0   :  { %2949 = vmatprep.subr.bf16.mxu0 %v3200_v1 }
0x2982   :  { %v1692_v32 = vpop.f32.mrf.mxu0 }
0x2983   :  { %v1698_v28 = vadd.f32 %v1692_v32, %v1028_v42 }
0x2984   :  { %v2911_v51 = vpop.f32.mrf.mxu0 }
0x2985   :  { %3128 = vtanh.f32 %v1698_v28  ;;  %v2643_v45 = vmul.f32 -1.442695, %v1698_v28 }
0x2986   :  { %v1695_v6 = vpop.f32.mrf.mxu0 }
0x2987   :  { %3130 = vpow2.f32 %v2643_v45 }
0x2988   :  { %v2912_v30 = vpop.f32.mrf.mxu0 }
0x298a   :  { %v1929_v7 = vpop.f32.mrf.mxu0 }
0x298c   :  { %v2931_v55 = vpop.f32.mrf.mxu0 }
0x298e   :  { %v1932_v59 = vpop.f32.mrf.mxu0 }
0x2990   :  { %v2932_v54 = vpop.f32.mrf.mxu0 }
0x2992   :  { %v3129_v38 = vpop.eup %3128 }
0x2993   :  { %1712 = vrot.lane.b32.xlu1 %v3129_v38, %s3203_s4 }
0x2994   :  { %v3131_v11 = vpop.eup %3130 }
0x2995   :  { %v1702_v17 = vadd.f32 1.0, %v3131_v11 }
0x2997   :  { %3132 = vrcp.f32 %v1702_v17 }
0x29a4   :  { %v3133_v19 = vpop.eup %3132 }
0x29a5   :  { %v1710_v24 = vmul.f32 %v3133_v19, %v1708_v39 }
0x2a05   :  { %v1713_v20 = vpop.permute.xlu1 %1712 }
0x2a06   :  { %v1715_v21 = vmul.f32 %v3133_v19, %v1713_v20 }
0x2a08   :  { %1717 = vrot.lane.b32.xlu1 %v1715_v21, %s3204_s23 }
0x2a7a   :  { %v1718_v48 = vpop.permute.xlu1 %1717 }
0x2a7b   :  { %v1720_v42 = vadd.f32 %v1718_v48, %v1710_v24 }
0x2a7d   :  { %3134 = vtanh.f32 %v1720_v42 }
0x2a8a   :  { %v3135_v63 = vpop.eup %3134 }
0x2a8b   :  { %1723 = vrot.lane.b32.xlu0 %v3135_v63, %s3203_s4 }
0x2afd   :  { %v1724_v25 = vpop.permute.xlu0 %1723 }
0x2afe   :  { %v1726_v8 = vmul.f32 %v3133_v19, %v1724_v25  ;;  %v1960_v25 = vld [vmem:[%s4232_s1] sm:$0xff] }
0x2aff   :  { %vm1961_vm13 = vcmp.gt.f32.partialorder %v1960_v25, 0.0 }
0x2b00   :  { %1730 = vrot.lane.b32.xlu1 %v1726_v8, %s3204_s23 }
0x2b72   :  { %v1731_v49 = vpop.permute.xlu1 %1730 }
0x2b73   :  { %v1733_v36 = vsel %vm887_vm12, %v1731_v49, 0.0 }
0x2b74   :  { %v1734_v40 = vsel %vm54_vm9, %v3735_v26, %v1733_v36  ;;  %v1741_v15 = vsel %vm54_vm9, %v1733_v36, %v3735_v26 }
0x2b75   :  { %1742 = vst.msk [vmem:[#allocation3] sm:$0xff] %vm209_vm4, %v1734_v40  ;;  %1749 = vst.msk [vmem:[#allocation3 + $0x38] sm:$0xff] %vm209_vm4, %v1741_v15 }
0x2b7c   :  { %v1750_v29 = vld [vmem:[#allocation3] sm:$0xff]  ;;  %v1757_v26 = vld [vmem:[#allocation3 + $0x38] sm:$0xff] }
0x2b7d   :  { %v1758_v9 = vpack.c.bf16 %v1751_v31, %v1750_v29  ;;  %v1761_v47 = vpack.c.bf16 %v1757_v26, %v1756_v44 }
0x2b7f   :  { %2917 = vmatprep.mubr.msk.bf16.mxu1 %vm209_vm4, %v1758_v9 }
0x2b80   :  { %2918 = vmatmul.mubr.msk.bf16.vlgmr.msra.gmra.mxu1 %vm209_vm4, %v1759_v12 }
0x2b81   :  { %2921 = vmatprep.mubr.msk.bf16.mxu1 %vm209_vm4, %v1760_v41  ;;  %2942 = vmatpush3.bf16.msra.mxu1 %v3920_v33 }
0x2b82   :  { %2943 = vmatprep.subr.bf16.mxu1 %v3200_v1 }
0x2b85   :  { %2944 = vmatpush3.bf16.msra.mxu1 %v3926_v0 }
0x2b86   :  { %2957 = vmatprep.subr.bf16.mxu1 %v3200_v1 }
0x2b88   :  { %2922 = vmatmul.mubr.msk.bf16.gmra.mxu1 %vm209_vm4, %v1761_v47 }
0x2b89   :  { %2945 = vmatprep.mubr.msk.bf16.mxu1 %vm3201_vm0, %v3200_v1 }
0x2c40   :  { %v2919_v56 = vpop.f32.mrf.mxu1 }
0x2c41   :  { %v3961_v58 = vadd.f32 %v2919_v56, %v2644_v10 }
0x2c42   :  { %v1831_v50 = vpop.f32.mrf.mxu1 }
0x2c43   :  { %v3979_v18 = vadd.f32 %v2644_v10, %v1831_v50 }
0x2c44   :  { %v2920_v46 = vpop.f32.mrf.mxu1 }
0x2c45   :  { %v3963_v57 = vadd.f32 %v2920_v46, %v2644_v10  ;;  %v4036_v46 = vld [vmem:[%s4232_s1 + $0x8] sm:$0xff] }
0x2c46   :  { %v1834_v61 = vpop.f32.mrf.mxu1  ;;  %vm2047_vm14 = vcmp.gt.f32.partialorder %v4036_v46, 0.0 }
0x2c47   :  { %v3965_v62 = vadd.f32 %v2644_v10, %v1834_v61 }
0x2c48   :  { %v2923_v43 = vpop.f32.mrf.mxu1 }
0x2c49   :  { %v3967_v3 = vadd.f32 %v2923_v43, %v2644_v10 }
0x2c4a   :  { %v1847_v4 = vpop.f32.mrf.mxu1 }
0x2c4b   :  { %v3969_v5 = vadd.f32 %v2644_v10, %v1847_v4  ;;  %v1863_v16 = vsel %vm3346_vm2, %v3965_v62, %v3967_v3  ;;  %v1868_v13 = vsel %vm3346_vm2, %v3967_v3, %v3965_v62 }
0x2c4c   :  { %v2924_v53 = vpop.f32.mrf.mxu1 }
0x2c4d   :  { %v3981_v14 = vadd.f32 %v2924_v53, %v2644_v10  ;;  %v1865_v52 = vsel %vm3346_vm2, %v3963_v57, %v3969_v5  ;;  %v1866_v32 = vsel %vm3346_vm2, %v3969_v5, %v3963_v57 }
0x2c4e   :  { %v1850_v28 = vpop.f32.mrf.mxu1 }
0x2c4f   :  { %v1862_v51 = vsel %vm3346_vm2, %v3979_v18, %v3981_v14  ;;  %v3995_v6 = vadd.f32 %v2644_v10, %v1850_v28  ;;  %v1869_v30 = vsel %vm3346_vm2, %v3981_v14, %v3979_v18 }
0x2c50   :  { %v1935_v38 = vadd.f32 %v1929_v7, %v1862_v51 }
0x2c51   :  { %v1864_v45 = vsel %vm3346_vm2, %v3961_v58, %v3995_v6  ;;  %v1867_v11 = vsel %vm3346_vm2, %v3995_v6, %v3961_v58 }
0x2c52   :  { %3136 = vtanh.f32 %v1935_v38  ;;  %v2653_v19 = vmul.f32 -1.442695, %v1935_v38 }
0x2c54   :  { %3138 = vpow2.f32 %v2653_v19 }
0x2c5f   :  { %v3137_v17 = vpop.eup %3136 }
0x2c60   :  { %1945 = vrot.lane.b32.xlu0 %v3137_v17, %s3203_s4 }
0x2c61   :  { %v3139_v20 = vpop.eup %3138 }
0x2c62   :  { %v1939_v21 = vadd.f32 1.0, %v3139_v20 }
0x2c64   :  { %3140 = vrcp.f32 %v1939_v21 }
0x2c71   :  { %v3141_v39 = vpop.eup %3140 }
0x2c72   :  { %v1943_v42 = vmul.f32 0.0, %v3141_v39 }
0x2cd2   :  { %v1946_v24 = vpop.permute.xlu0 %1945 }
0x2cd3   :  { %v1948_v48 = vmul.f32 %v3141_v39, %v1946_v24 }
0x2cd5   :  { %1950 = vrot.lane.b32.xlu1 %v1948_v48, %s3204_s23 }
0x2d47   :  { %v1951_v63 = vpop.permute.xlu1 %1950 }
0x2d48   :  { %v1953_v2 = vadd.f32 %v1951_v63, %v1943_v42 }
0x2d4a   :  { %3142 = vtanh.f32 %v1953_v2 }
0x2d57   :  { %v3143_v22 = vpop.eup %3142 }
0x2d58   :  { %1956 = vrot.lane.b32.xlu0 %v3143_v22, %s3203_s4 }
0x2d5c   :  { %1968 = vrot.lane.b32.xlu0 %v1953_v2, %s3205_s24 }
0x2dca   :  { %v1957_v8 = vpop.permute.xlu0 %1956 }
0x2dcb   :  { %v1959_v49 = vmul.f32 %v3141_v39, %v1957_v8 }
0x2dcd   :  { %1963 = vrot.lane.b32.xlu1 %v1959_v49, %s3204_s23 }
0x2dce   :  { %v1969_v36 = vpop.permute.xlu0 %1968 }
0x2dcf   :  { %v1971_v40 = vsel %vm1961_vm13, %v1969_v36, 0.0 }
0x2dd0   :  { %2026 = vrot.lane.b32.xlu0 %v1971_v40, %s3204_s23 }
0x2e3f   :  { %v1964_v15 = vpop.permute.xlu1 %1963 }
0x2e40   :  { %v4018_v27 = vsel %vm1961_vm13, %v1964_v15, 0.0 }
0x2e41   :  { %v1973_v29 = vpack.c.bf16 %v4018_v27, %v4018_v27 }
0x2e42   :  { %v2027_v59 = vpop.permute.xlu0 %2026 }
0x2e43   :  { %2938 = vmatmul.mubr.msk.bf16.vlgmr.msra.gmra.mxu0 %vm209_vm4, %v1973_v29 }
0x2e44   :  { %2950 = vmatpush3.bf16.msra.mxu0 %v3920_v33  ;;  %2953 = vmatprep.mubr.msk.bf16.mxu0 %vm3201_vm0, %v3200_v1 }
0x2e45   :  { %2951 = vmatprep.subr.bf16.mxu0 %v3200_v1 }
0x2e48   :  { %2952 = vmatpush3.bf16.msra.mxu0 %v3926_v0 }
0x2e49   :  { %2965 = vmatprep.subr.bf16.mxu0 %v3200_v1 }
0x2f03   :  { %v2011_v31 = vpop.f32.mrf.mxu0 }
0x2f04   :  { %v2017_v34 = vadd.f32 %v2011_v31, %v1863_v16 }
0x2f05   :  { %v2939_v9 = vpop.f32.mrf.mxu0 }
0x2f06   :  { %3144 = vtanh.f32 %v2017_v34  ;;  %v2655_v41 = vmul.f32 -1.442695, %v2017_v34 }
0x2f07   :  { %v2014_v60 = vpop.f32.mrf.mxu0 }
0x2f08   :  { %3146 = vpow2.f32 %v2655_v41 }
0x2f09   :  { %v2940_v12 = vpop.f32.mrf.mxu0 }
0x2f13   :  { %v3145_v37 = vpop.eup %3144 }
0x2f14   :  { %2031 = vrot.lane.b32.xlu1 %v3145_v37, %s3203_s4 }
0x2f15   :  { %v3147_v26 = vpop.eup %3146 }
0x2f16   :  { %v2021_v44 = vadd.f32 1.0, %v3147_v26 }
0x2f18   :  { %3148 = vrcp.f32 %v2021_v44 }
0x2f25   :  { %v3149_v47 = vpop.eup %3148 }
0x2f26   :  { %v2029_v54 = vmul.f32 %v3149_v47, %v2027_v59 }
0x2f86   :  { %v2032_v7 = vpop.permute.xlu1 %2031 }
0x2f87   :  { %v2034_v55 = vmul.f32 %v3149_v47, %v2032_v7 }
0x2f89   :  { %2036 = vrot.lane.b32.xlu1 %v2034_v55, %s3204_s23 }
0x2ffb   :  { %v2037_v10 = vpop.permute.xlu1 %2036 }
0x2ffc   :  { %v2039_v56 = vadd.f32 %v2037_v10, %v2029_v54 }
0x2ffe   :  { %3150 = vtanh.f32 %v2039_v56 }
0x300b   :  { %v3151_v50 = vpop.eup %3150 }
0x300c   :  { %2042 = vrot.lane.b32.xlu0 %v3151_v50, %s3203_s4 }
0x3010   :  { %2054 = vrot.lane.b32.xlu0 %v2039_v56, %s3205_s24 }
0x307e   :  { %v2043_v61 = vpop.permute.xlu0 %2042 }
0x307f   :  { %v2045_v43 = vmul.f32 %v3149_v47, %v2043_v61 }
0x3081   :  { %2049 = vrot.lane.b32.xlu1 %v2045_v43, %s3204_s23 }
0x3082   :  { %v2055_v4 = vpop.permute.xlu0 %2054 }
0x3083   :  { %v2057_v16 = vsel %vm2047_vm14, %v2055_v4, %v1971_v40  ;;  %v4068_v40 = vld [vmem:[%s4232_s1 + $0x10] sm:$0xff] }
0x3084   :  { %2113 = vrot.lane.b32.xlu0 %v2057_v16, %s3204_s23  ;;  %vm2134_vm15 = vcmp.gt.f32.partialorder %v4068_v40, 0.0 }
0x30f3   :  { %v4043_v53 = vpop.permute.xlu1 %2049 }
0x30f4   :  { %v2052_v28 = vsel %vm2047_vm14, %v4043_v53, %v4018_v27 }
0x30f5   :  { %v2060_v51 = vpack.c.bf16 %v2052_v28, %v2052_v28 }
0x30f6   :  { %v2114_v25 = vpop.permute.xlu0 %2113 }
0x30f7   :  { %2946 = vmatmul.mubr.msk.bf16.vlgmr.msra.gmra.mxu1 %vm209_vm4, %v2060_v51 }
0x30f8   :  { %2958 = vmatpush3.bf16.msra.mxu1 %v3920_v33  ;;  %2961 = vmatprep.mubr.msk.bf16.mxu1 %vm3201_vm0, %v3200_v1 }
0x30f9   :  { %2959 = vmatprep.subr.bf16.mxu1 %v3200_v1 }
0x30fc   :  { %2960 = vmatpush3.bf16.msra.mxu1 %v3926_v0 }
0x30fd   :  { %2973 = vmatprep.subr.bf16.mxu1 %v3200_v1 }
0x31b7   :  { %v2098_v38 = vpop.f32.mrf.mxu1 }
0x31b8   :  { %v2104_v17 = vadd.f32 %v2098_v38, %v1864_v45 }
0x31b9   :  { %v2947_v19 = vpop.f32.mrf.mxu1 }
0x31ba   :  { %3152 = vtanh.f32 %v2104_v17  ;;  %v2657_v24 = vmul.f32 -1.442695, %v2104_v17 }
0x31bb   :  { %v2101_v20 = vpop.f32.mrf.mxu1 }
0x31bc   :  { %3154 = vpow2.f32 %v2657_v24 }
0x31bd   :  { %v2948_v21 = vpop.f32.mrf.mxu1 }
0x31c7   :  { %v3153_v39 = vpop.eup %3152 }
0x31c8   :  { %2118 = vrot.lane.b32.xlu1 %v3153_v39, %s3203_s4 }
0x31c9   :  { %v3155_v48 = vpop.eup %3154 }
0x31ca   :  { %v2108_v42 = vadd.f32 1.0, %v3155_v48 }
0x31cc   :  { %3156 = vrcp.f32 %v2108_v42 }
0x31d9   :  { %v3157_v63 = vpop.eup %3156 }
0x31da   :  { %v2116_v8 = vmul.f32 %v3157_v63, %v2114_v25 }
0x323a   :  { %v2119_v2 = vpop.permute.xlu1 %2118 }
0x323b   :  { %v2121_v22 = vmul.f32 %v3157_v63, %v2119_v2 }
0x323d   :  { %2123 = vrot.lane.b32.xlu1 %v2121_v22, %s3204_s23 }
0x32af   :  { %v2124_v45 = vpop.permute.xlu1 %2123 }
0x32b0   :  { %v2126_v49 = vadd.f32 %v2124_v45, %v2116_v8 }
0x32b2   :  { %3158 = vtanh.f32 %v2126_v49 }
0x32bf   :  { %v3159_v36 = vpop.eup %3158 }
0x32c0   :  { %2129 = vrot.lane.b32.xlu0 %v3159_v36, %s3203_s4 }
0x32c4   :  { %2141 = vrot.lane.b32.xlu0 %v2126_v49, %s3205_s24 }
0x3332   :  { %v2130_v15 = vpop.permute.xlu0 %2129 }
0x3333   :  { %v2132_v29 = vmul.f32 %v3157_v63, %v2130_v15 }
0x3335   :  { %2136 = vrot.lane.b32.xlu1 %v2132_v29, %s3204_s23 }
0x3336   :  { %v2142_v31 = vpop.permute.xlu0 %2141 }
0x3337   :  { %v2144_v34 = vsel %vm2134_vm15, %v2142_v31, %v2057_v16 }
0x3338   :  { %2200 = vrot.lane.b32.xlu0 %v2144_v34, %s3204_s23 }
0x33a7   :  { %v4075_v9 = vpop.permute.xlu1 %2136 }
0x33a8   :  { %v2139_v60 = vsel %vm2134_vm15, %v4075_v9, %v2052_v28  ;;  %v2220_v28 = vld [vmem:[%s4232_s1 + $0x18] sm:$0xff] }
0x33a9   :  { %v2147_v12 = vpack.c.bf16 %v2139_v60, %v2139_v60  ;;  %vm2221_vm1 = vcmp.gt.f32.partialorder %v2220_v28, 0.0 }
0x33aa   :  { %v2201_v61 = vpop.permute.xlu0 %2200 }
0x33ab   :  { %2954 = vmatmul.mubr.msk.bf16.vlgmr.msra.gmra.mxu0 %vm209_vm4, %v2147_v12 }
0x33ac   :  { %2966 = vmatpush3.bf16.msra.mxu0 %v3920_v33  ;;  %2969 = vmatprep.mubr.msk.bf16.mxu0 %vm3201_vm0, %v3200_v1 }
0x33ad   :  { %2967 = vmatprep.subr.bf16.mxu0 %v3200_v1 }
0x33b0   :  { %2968 = vmatpush3.bf16.msra.mxu0 %v3926_v0 }
0x33b1   :  { %2981 = vmatprep.subr.bf16.mxu0 %v3200_v1 }
0x346b   :  { %v2185_v37 = vpop.f32.mrf.mxu0 }
0x346c   :  { %v2191_v41 = vadd.f32 %v2185_v37, %v1865_v52 }
0x346d   :  { %v2955_v26 = vpop.f32.mrf.mxu0 }
0x346e   :  { %3160 = vtanh.f32 %v2191_v41  ;;  %v2659_v55 = vmul.f32 -1.442695, %v2191_v41 }
0x346f   :  { %v2188_v44 = vpop.f32.mrf.mxu0 }
0x3470   :  { %3162 = vpow2.f32 %v2659_v55 }
0x3471   :  { %v2956_v47 = vpop.f32.mrf.mxu0 }
0x347b   :  { %v3161_v7 = vpop.eup %3160 }
0x347c   :  { %2205 = vrot.lane.b32.xlu1 %v3161_v7, %s3203_s4 }
0x347d   :  { %v3163_v59 = vpop.eup %3162 }
0x347e   :  { %v2195_v54 = vadd.f32 1.0, %v3163_v59 }
0x3480   :  { %3164 = vrcp.f32 %v2195_v54 }
0x348d   :  { %v3165_v10 = vpop.eup %3164 }
0x348e   :  { %v2203_v43 = vmul.f32 %v3165_v10, %v2201_v61 }
0x34ee   :  { %v2206_v56 = vpop.permute.xlu1 %2205 }
0x34ef   :  { %v2208_v50 = vmul.f32 %v3165_v10, %v2206_v56 }
0x34f1   :  { %2210 = vrot.lane.b32.xlu1 %v2208_v50, %s3204_s23 }
0x3563   :  { %v2211_v52 = vpop.permute.xlu1 %2210 }
0x3564   :  { %v2213_v4 = vadd.f32 %v2211_v52, %v2203_v43 }
0x3566   :  { %3166 = vtanh.f32 %v2213_v4 }
0x3573   :  { %v3167_v16 = vpop.eup %3166 }
0x3574   :  { %2216 = vrot.lane.b32.xlu0 %v3167_v16, %s3203_s4 }
0x3578   :  { %2228 = vrot.lane.b32.xlu0 %v2213_v4, %s3205_s24 }
0x35e6   :  { %v2217_v51 = vpop.permute.xlu0 %2216 }
0x35e7   :  { %v2219_v38 = vmul.f32 %v3165_v10, %v2217_v51 }
0x35e9   :  { %2223 = vrot.lane.b32.xlu1 %v2219_v38, %s3204_s23 }
0x35ea   :  { %v2229_v17 = vpop.permute.xlu0 %2228 }
0x35eb   :  { %v2231_v19 = vsel %vm2221_vm1, %v2229_v17, %v2144_v34  ;;  %v2307_v34 = vld [vmem:[%s4232_s1 + $0x20] sm:$0xff]  ;;  %v2394_v17 = vld [vmem:[%s4232_s1 + $0x28] sm:$0xff] }
0x35ec   :  { %2287 = vrot.lane.b32.xlu0 %v2231_v19, %s3204_s23  ;;  %vm2308_vm3 = vcmp.gt.f32.partialorder %v2307_v34, 0.0 }
0x365b   :  { %v2224_v20 = vpop.permute.xlu1 %2223 }
0x365c   :  { %v2226_v21 = vsel %vm2221_vm1, %v2224_v20, %v2139_v60  ;;  %v2232_v44 = vsel %vm2221_vm1, %v2224_v20, 0.0 }
0x365d   :  { %v2234_v39 = vpack.c.bf16 %v2226_v21, %v2226_v21 }
0x365e   :  { %v2288_v29 = vpop.permute.xlu0 %2287 }
0x365f   :  { %2962 = vmatmul.mubr.msk.bf16.vlgmr.msra.gmra.mxu1 %vm209_vm4, %v2234_v39 }
0x3660   :  { %2974 = vmatpush3.bf16.msra.mxu1 %v3920_v33  ;;  %2977 = vmatprep.mubr.msk.bf16.mxu1 %vm3201_vm0, %v3200_v1 }
0x3661   :  { %2975 = vmatprep.subr.bf16.mxu1 %v3200_v1 }
0x3664   :  { %2976 = vmatpush3.bf16.msra.mxu1 %v3926_v0 }
0x371f   :  { %v2272_v24 = vpop.f32.mrf.mxu1 }
0x3720   :  { %v2278_v48 = vadd.f32 %v2272_v24, %v1866_v32 }
0x3721   :  { %v2963_v42 = vpop.f32.mrf.mxu1 }
0x3722   :  { %3168 = vtanh.f32 %v2278_v48  ;;  %v2661_v25 = vmul.f32 -1.442695, %v2278_v48  ;;  %v2145_v48 = vsel %vm2134_vm15, %v4075_v9, 0.0 }
0x3723   :  { %v2275_v63 = vpop.f32.mrf.mxu1 }
0x3724   :  { %3170 = vpow2.f32 %v2661_v25 }
0x3725   :  { %v2964_v2 = vpop.f32.mrf.mxu1 }
0x372f   :  { %v3169_v22 = vpop.eup %3168 }
0x3730   :  { %2292 = vrot.lane.b32.xlu1 %v3169_v22, %s3203_s4 }
0x3731   :  { %v3171_v8 = vpop.eup %3170 }
0x3732   :  { %v2282_v45 = vadd.f32 1.0, %v3171_v8 }
0x3734   :  { %3172 = vrcp.f32 %v2282_v45 }
0x3741   :  { %v3173_v49 = vpop.eup %3172 }
0x3742   :  { %v2290_v57 = vmul.f32 %v3173_v49, %v2288_v29 }
0x37a2   :  { %v2293_v36 = vpop.permute.xlu1 %2292 }
0x37a3   :  { %v2295_v15 = vmul.f32 %v3173_v49, %v2293_v36 }
0x37a5   :  { %2297 = vrot.lane.b32.xlu1 %v2295_v15, %s3204_s23 }
0x3817   :  { %v2298_v5 = vpop.permute.xlu1 %2297 }
0x3818   :  { %v2300_v32 = vadd.f32 %v2298_v5, %v2290_v57 }
0x381a   :  { %3174 = vtanh.f32 %v2300_v32 }
0x3827   :  { %v3175_v31 = vpop.eup %3174 }
0x3828   :  { %2303 = vrot.lane.b32.xlu0 %v3175_v31, %s3203_s4 }
0x382c   :  { %2315 = vrot.lane.b32.xlu0 %v2300_v32, %s3205_s24 }
0x389a   :  { %v2304_v60 = vpop.permute.xlu0 %2303 }
0x389b   :  { %v2306_v12 = vmul.f32 %v3173_v49, %v2304_v60 }
0x389d   :  { %2310 = vrot.lane.b32.xlu1 %v2306_v12, %s3204_s23  ;;  %v2481_v12 = vld [vmem:[%s4232_s1 + $0x30] sm:$0xff] }
0x389e   :  { %v2316_v37 = vpop.permute.xlu0 %2315  ;;  %vm2482_vm5 = vcmp.gt.f32.partialorder %v2481_v12, 0.0 }
0x389f   :  { %v2318_v41 = vsel %vm2308_vm3, %v2316_v37, %v2231_v19 }
0x38a0   :  { %2374 = vrot.lane.b32.xlu0 %v2318_v41, %s3204_s23 }
0x390f   :  { %v2311_v26 = vpop.permute.xlu1 %2310 }
0x3910   :  { %v2313_v47 = vsel %vm2308_vm3, %v2311_v26, %v2226_v21  ;;  %v2319_v7 = vsel %vm2308_vm3, %v2311_v26, 0.0 }
0x3911   :  { %v2321_v55 = vpack.c.bf16 %v2313_v47, %v2313_v47  ;;  %v2578_v59 = vsel %vm54_vm9, %v2232_v44, %v2319_v7  ;;  %v2579_v54 = vsel %vm54_vm9, %v2319_v7, %v2232_v44  ;;  %v2058_v7 = vsel %vm2047_vm14, %v4043_v53, 0.0 }
0x3912   :  { %2586 = vst.msk [vmem:[%s4239_s11 + $0x18] sm:$0xff] %vm209_vm4, %v2578_v59  ;;  %2587 = vst.msk [vmem:[%s4239_s11 + $0x20] sm:$0xff] %vm209_vm4, %v2579_v54  ;;  %v2375_v51 = vpop.permute.xlu0 %2374 }
0x3913   :  { %2970 = vmatmul.mubr.msk.bf16.vlgmr.msra.gmra.mxu0 %vm209_vm4, %v2321_v55 }
0x3914   :  { %2982 = vmatpush3.bf16.msra.mxu0 %v3920_v33  ;;  %2985 = vmatprep.mubr.msk.bf16.mxu0 %vm3201_vm0, %v3200_v1  ;;  %vm2395_vm0 = vcmp.gt.f32.partialorder %v2394_v17, 0.0 }
0x3915   :  { %2983 = vmatprep.subr.bf16.mxu0 %v3200_v1 }
0x3918   :  { %2984 = vmatpush3.bf16.msra.mxu0 %v3926_v0 }
0x39d3   :  { %v2359_v10 = vpop.f32.mrf.mxu0 }
0x39d4   :  { %v2365_v56 = vadd.f32 %v2359_v10, %v1867_v11 }
0x39d5   :  { %v2971_v50 = vpop.f32.mrf.mxu0 }
0x39d6   :  { %3176 = vtanh.f32 %v2365_v56  ;;  %v2663_v33 = vmul.f32 -1.442695, %v2365_v56 }
0x39d7   :  { %v2362_v61 = vpop.f32.mrf.mxu0 }
0x39d8   :  { %3178 = vpow2.f32 %v2663_v33 }
0x39d9   :  { %v2972_v43 = vpop.f32.mrf.mxu0 }
0x39e3   :  { %v3177_v52 = vpop.eup %3176 }
0x39e4   :  { %2379 = vrot.lane.b32.xlu1 %v3177_v52, %s3203_s4 }
0x39e5   :  { %v3179_v4 = vpop.eup %3178 }
0x39e6   :  { %v2369_v1 = vadd.f32 1.0, %v3179_v4 }
0x39e8   :  { %3180 = vrcp.f32 %v2369_v1 }
0x39f5   :  { %v3181_v0 = vpop.eup %3180 }
0x39f6   :  { %v2377_v58 = vmul.f32 %v3181_v0, %v2375_v51 }
0x3a56   :  { %v2380_v16 = vpop.permute.xlu1 %2379 }
0x3a57   :  { %v2382_v28 = vmul.f32 %v3181_v0, %v2380_v16 }
0x3a59   :  { %2384 = vrot.lane.b32.xlu1 %v2382_v28, %s3204_s23 }
0x3acb   :  { %v2385_v6 = vpop.permute.xlu1 %2384 }
0x3acc   :  { %v2387_v11 = vadd.f32 %v2385_v6, %v2377_v58 }
0x3ace   :  { %3182 = vtanh.f32 %v2387_v11 }
0x3adb   :  { %v3183_v38 = vpop.eup %3182 }
0x3adc   :  { %2390 = vrot.lane.b32.xlu0 %v3183_v38, %s3203_s4 }
0x3ae0   :  { %2402 = vrot.lane.b32.xlu0 %v2387_v11, %s3205_s24  ;;  %v2568_v11 = vld [vmem:[%s4232_s1 + $0x38] sm:$0xff] }
0x3ae1   :  { %vm2569_vm2 = vcmp.gt.f32.partialorder %v2568_v11, 0.0 }
0x3b4e   :  { %v2391_v19 = vpop.permute.xlu0 %2390 }
0x3b4f   :  { %v2393_v20 = vmul.f32 %v3181_v0, %v2391_v19 }
0x3b51   :  { %2397 = vrot.lane.b32.xlu1 %v2393_v20, %s3204_s23 }
0x3b52   :  { %v2403_v21 = vpop.permute.xlu0 %2402 }
0x3b53   :  { %v2405_v39 = vsel %vm2395_vm0, %v2403_v21, %v2318_v41 }
0x3b54   :  { %2461 = vrot.lane.b32.xlu0 %v2405_v39, %s3204_s23 }
0x3bc3   :  { %v2398_v24 = vpop.permute.xlu1 %2397 }
0x3bc4   :  { %v2400_v42 = vsel %vm2395_vm0, %v2398_v24, %v2313_v47  ;;  %v2406_v63 = vsel %vm2395_vm0, %v2398_v24, 0.0 }
0x3bc5   :  { %v2408_v2 = vpack.c.bf16 %v2400_v42, %v2400_v42  ;;  %v2577_v22 = vsel %vm54_vm9, %v2145_v48, %v2406_v63  ;;  %v2580_v25 = vsel %vm54_vm9, %v2406_v63, %v2145_v48 }
0x3bc6   :  { %2585 = vst.msk [vmem:[%s4239_s11 + $0x10] sm:$0xff] %vm209_vm4, %v2577_v22  ;;  %2588 = vst.msk [vmem:[%s4239_s11 + $0x28] sm:$0xff] %vm209_vm4, %v2580_v25  ;;  %v2462_v34 = vpop.permute.xlu0 %2461 }
0x3bc7   :  { %2978 = vmatmul.mubr.msk.bf16.vlgmr.msra.gmra.mxu1 %vm209_vm4, %v2408_v2 }
0x3c87   :  { %v2446_v40 = vpop.f32.mrf.mxu1 }
0x3c88   :  { %v2452_v9 = vadd.f32 %v2446_v40, %v1868_v13 }
0x3c89   :  { %v2979_v8 = vpop.f32.mrf.mxu1 }
0x3c8a   :  { %3184 = vtanh.f32 %v2452_v9  ;;  %v2665_v15 = vmul.f32 -1.442695, %v2452_v9 }
0x3c8b   :  { %v2449_v45 = vpop.f32.mrf.mxu1 }
0x3c8c   :  { %3186 = vpow2.f32 %v2665_v15 }
0x3c8d   :  { %v2980_v49 = vpop.f32.mrf.mxu1 }
0x3c97   :  { %v3185_v36 = vpop.eup %3184 }
0x3c98   :  { %2466 = vrot.lane.b32.xlu1 %v3185_v36, %s3203_s4 }
0x3c99   :  { %v3187_v29 = vpop.eup %3186 }
0x3c9a   :  { %v2456_v57 = vadd.f32 1.0, %v3187_v29 }
0x3c9c   :  { %3188 = vrcp.f32 %v2456_v57 }
0x3ca9   :  { %v3189_v5 = vpop.eup %3188 }
0x3caa   :  { %v2464_v62 = vmul.f32 %v3189_v5, %v2462_v34 }
0x3d0a   :  { %v2467_v32 = vpop.permute.xlu1 %2466 }
0x3d0b   :  { %v2469_v31 = vmul.f32 %v3189_v5, %v2467_v32 }
0x3d0d   :  { %2471 = vrot.lane.b32.xlu1 %v2469_v31, %s3204_s23 }
0x3d7f   :  { %v2472_v3 = vpop.permute.xlu1 %2471 }
0x3d80   :  { %v2474_v13 = vadd.f32 %v2472_v3, %v2464_v62 }
0x3d82   :  { %3190 = vtanh.f32 %v2474_v13 }
0x3d8f   :  { %v3191_v60 = vpop.eup %3190 }
0x3d90   :  { %2477 = vrot.lane.b32.xlu0 %v3191_v60, %s3203_s4 }
0x3d94   :  { %2489 = vrot.lane.b32.xlu0 %v2474_v13, %s3205_s24 }
0x3e02   :  { %v2478_v37 = vpop.permute.xlu0 %2477 }
0x3e03   :  { %v2480_v41 = vmul.f32 %v3189_v5, %v2478_v37 }
0x3e05   :  { %2484 = vrot.lane.b32.xlu1 %v2480_v41, %s3204_s23 }
0x3e06   :  { %v2490_v26 = vpop.permute.xlu0 %2489 }
0x3e07   :  { %v2492_v44 = vsel %vm2482_vm5, %v2490_v26, %v2405_v39 }
0x3e08   :  { %2548 = vrot.lane.b32.xlu0 %v2492_v44, %s3204_s23 }
0x3e77   :  { %v2485_v47 = vpop.permute.xlu1 %2484 }
0x3e78   :  { %v2487_v55 = vsel %vm2482_vm5, %v2485_v47, %v2400_v42  ;;  %v2493_v59 = vsel %vm2482_vm5, %v2485_v47, 0.0 }
0x3e79   :  { %v2495_v54 = vpack.c.bf16 %v2487_v55, %v2487_v55  ;;  %v2576_v10 = vsel %vm54_vm9, %v2058_v7, %v2493_v59  ;;  %v2581_v56 = vsel %vm54_vm9, %v2493_v59, %v2058_v7 }
0x3e7a   :  { %2584 = vst.msk [vmem:[%s4239_s11 + $0x8] sm:$0xff] %vm209_vm4, %v2576_v10  ;;  %2589 = vst.msk [vmem:[%s4239_s11 + $0x30] sm:$0xff] %vm209_vm4, %v2581_v56  ;;  %v2549_v35 = vpop.permute.xlu0 %2548 }
0x3e7b   :  { %2986 = vmatmul.mubr.msk.bf16.vlgmr.msra.gmra.mxu0 %vm209_vm4, %v2495_v54 }
0x3f3b   :  { %v2533_v46 = vpop.f32.mrf.mxu0 }
0x3f3c   :  { %v2539_v53 = vadd.f32 %v2533_v46, %v1869_v30 }
0x3f3d   :  { %v2987_v50 = vpop.f32.mrf.mxu0 }
0x3f3e   :  { %3192 = vtanh.f32 %v2539_v53  ;;  %v2667_v33 = vmul.f32 -1.442695, %v2539_v53 }
0x3f3f   :  { %v2536_v61 = vpop.f32.mrf.mxu0 }
0x3f40   :  { %3194 = vpow2.f32 %v2667_v33 }
0x3f41   :  { %v2988_v43 = vpop.f32.mrf.mxu0 }
0x3f4b   :  { %v3193_v52 = vpop.eup %3192 }
0x3f4c   :  { %2553 = vrot.lane.b32.xlu1 %v3193_v52, %s3203_s4 }
0x3f4d   :  { %v3195_v4 = vpop.eup %3194 }
0x3f4e   :  { %v2543_v1 = vadd.f32 1.0, %v3195_v4 }
0x3f50   :  { %3196 = vrcp.f32 %v2543_v1 }
0x3f5d   :  { %v3197_v0 = vpop.eup %3196 }
0x3f5e   :  { %v2551_v18 = vmul.f32 %v3197_v0, %v2549_v35 }
0x3fbe   :  { %v2554_v16 = vpop.permute.xlu1 %2553 }
0x3fbf   :  { %v2556_v28 = vmul.f32 %v3197_v0, %v2554_v16 }
0x3fc1   :  { %2558 = vrot.lane.b32.xlu1 %v2556_v28, %s3204_s23 }
0x4033   :  { %v2559_v14 = vpop.permute.xlu1 %2558 }
0x4034   :  { %v2561_v30 = vadd.f32 %v2559_v14, %v2551_v18 }
0x4036   :  { %3198 = vtanh.f32 %v2561_v30 }
0x4043   :  { %v3199_v51 = vpop.eup %3198 }
0x4044   :  { %2564 = vrot.lane.b32.xlu0 %v3199_v51, %s3203_s4 }
0x40b6   :  { %v2565_v58 = vpop.permute.xlu0 %2564 }
0x40b7   :  { %v2567_v6 = vmul.f32 %v3197_v0, %v2565_v58 }
0x40b9   :  { %2571 = vrot.lane.b32.xlu1 %v2567_v6, %s3204_s23 }
0x412b   :  { %v2572_v38 = vpop.permute.xlu1 %2571 }
0x412c   :  { %v2574_v17 = vsel %vm2569_vm2, %v2572_v38, 0.0 }
0x412d   :  { %v2575_v19 = vsel %vm54_vm9, %v4018_v27, %v2574_v17  ;;  %v2582_v20 = vsel %vm54_vm9, %v2574_v17, %v4018_v27 }
0x412e   :  { %2583 = vst.msk [vmem:[%s4239_s11] sm:$0xff] %vm209_vm4, %v2575_v19  ;;  %2590 = vst.msk [vmem:[%s4239_s11 + $0x38] sm:$0xff] %vm209_vm4, %v2582_v20 }

</bundles_post_ra>
